<compile_context>
chip_gen: v7x
topology: tpu7x:2x2x1
jax: 0.10.0
libtpu: 0.0.40
codegen_flags: <defaults>
</compile_context>

<pallas_src>
import functools

import numpy as np
import jax
import jax.numpy as jnp
from jax.experimental import pallas as pl
from jax.experimental.pallas import tpu as pltpu


# ---------------------------------------------------------------------------
# Fused forward kernel
# ---------------------------------------------------------------------------

def _cnn_fused_kernel(x_ref, w1_ref, b1_ref, w2_ref, b2_ref, w3_ref, b3_ref,
                      fw1_ref, fb1_ref, fw2_ref, fb2_ref, o_ref, *, bt):
    """Whole CNNClassifierA forward for one tile of `bt` images.

    Activation layout: 2-D [rows, lanes], rows = spatial_row*bt + batch,
    lanes = out_column_block*C + channel (column blocks stay uncompacted after
    pooling; invalid blocks are masked by zero rows in the next weight).
    """
    f32, bf16 = jnp.float32, jnp.bfloat16

    def conv_taps(tap, w_ref, taps, kpt):
        # sum_di  tap(di) @ w_ref[di*kpt:(di+1)*kpt, :]   (f32 MXU accumulate)
        acc = jnp.dot(tap(0), w_ref[0:kpt, :], preferred_element_type=f32)
        for di in range(1, taps):
            acc = acc + jnp.dot(tap(di), w_ref[di * kpt:(di + 1) * kpt, :],
                                preferred_element_type=f32)
        return acc

    def hpool(h, rows_out):
        # rows = i*bt + b; max over (2i, 2i+1) row-block pairs (bt-aligned).
        he = jnp.concatenate([h[(2 * i) * bt:(2 * i + 1) * bt, :]
                              for i in range(rows_out)], axis=0)
        ho = jnp.concatenate([h[(2 * i + 1) * bt:(2 * i + 2) * bt, :]
                              for i in range(rows_out)], axis=0)
        return jnp.maximum(he, ho)

    def wpool(m, cblk):
        # lanes = j*cblk + c; pair (2j, 2j+1) via an XLU lane rotation instead
        # of a compacting lane gather.  Valid maxima land at even cblk blocks;
        # odd blocks hold garbage that the next layer's zero weight rows kill.
        lanes = m.shape[1]
        return jnp.maximum(m, pltpu.roll(m, lanes - cblk, 1))

    def bias_relu(x, b_ref):
        return jnp.maximum(x + b_ref[...], 0.0)

    # conv1 5x5 (1->16): 28x28 -> 24x24; pool before bias/ReLU/cast.
    h1 = conv_taps(lambda di: x_ref[di * bt:(di + 24) * bt, :], w1_ref, 5, 32)
    p1 = bias_relu(wpool(hpool(h1, 12), 16), b1_ref).astype(bf16)  # [12*bt,384]

    # conv2 5x5 (16->32) on the uncompacted-lane 12x12 map -> 8x8; pool.
    h2 = conv_taps(lambda di: p1[di * bt:(di + 8) * bt, :], w2_ref, 5, 384)
    p2 = bias_relu(wpool(hpool(h2, 4), 32), b2_ref).astype(bf16)   # [4*bt,256]

    # conv3 3x3 (32->64) on the uncompacted-lane 4x4 map -> 2x2.
    h3 = conv_taps(lambda di: p2[di * bt:(di + 2) * bt, :], w3_ref, 3, 256)
    h3 = bias_relu(h3, b3_ref).astype(bf16)                        # [2*bt,128]

    # flatten (NCHW order folded into fw1's row permutation) + fc1 + fc2.
    z = jnp.concatenate([h3[0:bt, :], h3[bt:2 * bt, :]], axis=1)   # [bt, 256]
    y1 = jnp.maximum(jnp.dot(z, fw1_ref[...], preferred_element_type=f32)
                     + fb1_ref[...], 0.0).astype(bf16)             # [bt, 256]
    o_ref[...] = (jnp.dot(y1, fw2_ref[...], preferred_element_type=f32)
                  + fb2_ref[...])                                  # [bt, 128]


# ---------------------------------------------------------------------------
# Host-side weight packing (done once)
# ---------------------------------------------------------------------------

def pack_params(params):
    """Repack HWIO conv / [in,out] fc parameters into the kernel layout.

    Conv weights become per-tap banded matrices (im2col along W folded in);
    conv2/conv3 bands are built against the UNCOMPACTED pooled lane layout
    (valid data at even channel blocks, zero rows elsewhere).  fc1 rows are
    permuted to absorb the NCHW flatten; fc2 is zero-padded to 128 outputs.
    # TODO(synk): when importing a real PyTorch checkpoint, first convert conv
    # weights OIHW->HWIO and Linear weights [out,in]->[in,out].
    """
    def np32(a):
        return np.asarray(a, np.float32)

    def banded(w, w_valid_in, w_out, tap_rows, in_stride):
        kh, kw, ci, co = w.shape
        m = np.zeros((kh * tap_rows, w_out * co), np.float32)
        for di in range(kh):
            for jin in range(w_valid_in):
                for jo in range(w_out):
                    dj = jin - jo
                    if 0 <= dj < kw:
                        r0 = di * tap_rows + in_stride * jin * ci
                        m[r0:r0 + ci, jo * co:(jo + 1) * co] = w[di, dj]
        return m

    # conv3 output lane order is (i, j, c); PyTorch flattens NCHW [B,64,2,2]
    # as (c, i, j) -> permute fc1 weight rows accordingly.
    perm = np.array([c * 4 + i * 2 + j
                     for i in range(2) for j in range(2) for c in range(64)],
                    np.int32)

    fw2 = np.zeros((256, 128), np.float32)
    fw2[:, :10] = np32(params["fc2_w"])
    fb2 = np.zeros((1, 128), np.float32)
    fb2[0, :10] = np32(params["fc2_b"])

    bf16 = jnp.bfloat16
    return {
        # conv1: 5 tap bands of 32 rows each (input lanes padded 28 -> 32).
        "w1": jnp.asarray(banded(np32(params["conv1_w"]), 28, 24, 32, 1), bf16),
        "b1": jnp.asarray(np.tile(np32(params["conv1_b"]), 24)[None, :]),
        # conv2/conv3: bands against the uncompacted pooled layout (stride 2).
        "w2": jnp.asarray(banded(np32(params["conv2_w"]), 12, 8, 384, 2), bf16),
        "b2": jnp.asarray(np.tile(np32(params["conv2_b"]), 8)[None, :]),
        "w3": jnp.asarray(banded(np32(params["conv3_w"]), 4, 2, 256, 2), bf16),
        "b3": jnp.asarray(np.tile(np32(params["conv3_b"]), 2)[None, :]),
        "fw1": jnp.asarray(np32(params["fc1_w"])[perm, :], bf16),
        "fb1": jnp.asarray(np32(params["fc1_b"])[None, :]),
        "fw2": jnp.asarray(fw2, bf16),
        "fb2": jnp.asarray(fb2),
    }


# ---------------------------------------------------------------------------
# Forward wrapper
# ---------------------------------------------------------------------------

def _pick_batch_tile(B):
    cdiv = lambda a, b: -(-a // b)
    bt = min(128, 16 * cdiv(B, 16))          # multiple of 16, clamped near B
    if B > 16 and cdiv(B, bt) < 2:
        # Prefer >=2 grid steps so the "parallel" axis can shard across v7x's
        # two TensorCores (negligible extra overhead on single-core chips).
        bt = 16 * cdiv(cdiv(B, 2), 16)
    return bt


def cnn_classifier_a(packed, x_nchw):
    """CNNClassifierA.forward; x_nchw: [B, 1, 28, 28] float32 -> [B, 10]."""
    assert x_nchw.shape[1:] == (1, 28, 28), x_nchw.shape
    B = x_nchw.shape[0]
    bt = _pick_batch_tile(B)
    g = -(-B // bt)
    bp = g * bt

    x = x_nchw[:, 0, :, :].astype(jnp.bfloat16)
    if bp != B:
        x = jnp.pad(x, ((0, bp - B), (0, 0), (0, 0)))
    # [bp,28,28] -> [g, 28*bt, 32]: rows = h*bt + b_local, lanes padded 28->32
    # (pad lanes so conv1's K matches the 32-row weight tap bands).
    xg = x.reshape(g, bt, 28, 28).transpose(0, 2, 1, 3).reshape(g, 28 * bt, 28)
    xg = jnp.pad(xg, ((0, 0), (0, 0), (0, 4)))

    flops = 2 * bp * (24 * 160 * 384 + 8 * 1920 * 256 + 2 * 768 * 128
                      + 256 * 256 + 256 * 128)
    bytes_accessed = (xg.size * 2 + bp * 128 * 4
                      + sum(v.size * v.dtype.itemsize for v in packed.values()))

    out = pl.pallas_call(
        functools.partial(_cnn_fused_kernel, bt=bt),
        out_shape=jax.ShapeDtypeStruct((bp, 128), jnp.float32),
        grid=(g,),
        in_specs=[
            pl.BlockSpec((None, 28 * bt, 32), lambda i: (i, 0, 0)),   # input
            pl.BlockSpec((160, 384), lambda i: (0, 0)),               # w1 bands
            pl.BlockSpec((1, 384), lambda i: (0, 0)),                 # b1
            pl.BlockSpec((1920, 256), lambda i: (0, 0)),              # w2 bands
            pl.BlockSpec((1, 256), lambda i: (0, 0)),                 # b2
            pl.BlockSpec((768, 128), lambda i: (0, 0)),               # w3 bands
            pl.BlockSpec((1, 128), lambda i: (0, 0)),                 # b3
            pl.BlockSpec((256, 256), lambda i: (0, 0)),               # fc1 (perm)
            pl.BlockSpec((1, 256), lambda i: (0, 0)),                 # fc1 bias
            pl.BlockSpec((256, 128), lambda i: (0, 0)),               # fc2 (pad)
            pl.BlockSpec((1, 128), lambda i: (0, 0)),                 # fc2 bias
        ],
        out_specs=pl.BlockSpec((bt, 128), lambda i: (i, 0)),
        compiler_params=pltpu.CompilerParams(
            dimension_semantics=("parallel",),
            vmem_limit_bytes=48 * 1024 * 1024),
        cost_estimate=pl.CostEstimate(flops=flops, transcendentals=0,
                                      bytes_accessed=bytes_accessed),
    )(xg, packed["w1"], packed["b1"], packed["w2"], packed["b2"],
      packed["w3"], packed["b3"], packed["fw1"], packed["fb1"],
      packed["fw2"], packed["fb2"])
    return out[:B, :10]


# ---------------------------------------------------------------------------
# Pure-jnp reference (no Pallas) and synthetic parameters
# ---------------------------------------------------------------------------

def reference_forward(params, x_nchw):
    x = jnp.transpose(x_nchw, (0, 2, 3, 1))                     # NHWC

    def conv_relu(x, w, b):
        kh, kw, ci, co = w.shape
        B, H, W, _ = x.shape
        ho, wo = H - kh + 1, W - kw + 1
        cols = [x[:, di:di + ho, dj:dj + wo, :]
                for di in range(kh) for dj in range(kw)]
        p = jnp.stack(cols, axis=3).reshape(B * ho * wo, kh * kw * ci)
        y = p @ w.reshape(kh * kw * ci, co) + b
        return jnp.maximum(y, 0.0).reshape(B, ho, wo, co)

    def pool(x):
        return jnp.maximum(
            jnp.maximum(x[:, 0::2, 0::2, :], x[:, 0::2, 1::2, :]),
            jnp.maximum(x[:, 1::2, 0::2, :], x[:, 1::2, 1::2, :]))

    x = pool(conv_relu(x, params["conv1_w"], params["conv1_b"]))
    x = pool(conv_relu(x, params["conv2_w"], params["conv2_b"]))
    x = conv_relu(x, params["conv3_w"], params["conv3_b"])
    x = jnp.transpose(x, (0, 3, 1, 2)).reshape(x.shape[0], -1)  # NCHW flatten
    x = jnp.maximum(x @ params["fc1_w"] + params["fc1_b"], 0.0)
    return x @ params["fc2_w"] + params["fc2_b"]


def init_params(key):
    """Deterministic synthetic parameters matching the nn.Module shapes."""
    ks = jax.random.split(key, 10)

    def w(k, shape, fan_in):
        return (jax.random.normal(k, shape, jnp.float32)
                / jnp.sqrt(jnp.float32(fan_in)))

    return {
        "conv1_w": w(ks[0], (5, 5, 1, 16), 25.0),    # Conv2d(1, 16, 5)  HWIO
        "conv1_b": w(ks[1], (16,), 25.0),
        "conv2_w": w(ks[2], (5, 5, 16, 32), 400.0),  # Conv2d(16, 32, 5) HWIO
        "conv2_b": w(ks[3], (32,), 400.0),
        "conv3_w": w(ks[4], (3, 3, 32, 64), 288.0),  # Conv2d(32, 64, 3) HWIO
        "conv3_b": w(ks[5], (64,), 288.0),
        "fc1_w": w(ks[6], (256, 256), 256.0),        # Linear(256, 256) [in,out]
        "fc1_b": w(ks[7], (256,), 256.0),
        "fc2_w": w(ks[8], (256, 10), 256.0),         # Linear(256, 10)  [in,out]
        "fc2_b": w(ks[9], (10,), 256.0),
    }


if __name__ == "__main__":
    key = jax.random.PRNGKey(0)
    pkey, xkey = jax.random.split(key)
    params = init_params(pkey)
    packed = pack_params(params)
    # Spatial size must be 28x28 so the flatten yields 256 features.
    x = jax.random.normal(xkey, (2, 1, 28, 28), jnp.float32)

    fwd = jax.jit(cnn_classifier_a)
    out = jax.block_until_ready(fwd(packed, x))

    ref = jax.block_until_ready(jax.jit(reference_forward)(params, x))

    assert out.shape == (2, 10), out.shape
    assert bool(jnp.all(jnp.isfinite(out)))
    # bf16 MXU inputs -> allow a small deviation from the f32 reference.
    max_err = float(jnp.max(jnp.abs(out - ref)))
    assert max_err < 0.3, f"max abs error vs reference: {max_err}"
    print("KERNEL_OK")
</pallas_src>

<mosaic_0001>
module attributes {stable_mosaic.version = 11 : i64} {
  func.func @_cnn_fused_kernel(%arg0: i32, %arg1: memref<1x448x32xbf16, #tpu.memory_space<vmem>>, %arg2: memref<160x384xbf16, #tpu.memory_space<vmem>>, %arg3: memref<1x384xf32, #tpu.memory_space<vmem>>, %arg4: memref<1920x256xbf16, #tpu.memory_space<vmem>>, %arg5: memref<1x256xf32, #tpu.memory_space<vmem>>, %arg6: memref<768x128xbf16, #tpu.memory_space<vmem>>, %arg7: memref<1x128xf32, #tpu.memory_space<vmem>>, %arg8: memref<256x256xbf16, #tpu.memory_space<vmem>>, %arg9: memref<1x256xf32, #tpu.memory_space<vmem>>, %arg10: memref<256x128xbf16, #tpu.memory_space<vmem>>, %arg11: memref<1x128xf32, #tpu.memory_space<vmem>>, %arg12: memref<16x128xf32, #tpu.memory_space<vmem>>) attributes {dimension_semantics = [#tpu.dimension_semantics<parallel>], iteration_bounds = array<i64: 1>, scalar_prefetch = 0 : i64, scratch_operands = 0 : i64, tpu.core_type = #tpu.core_type<tc>, window_params = [{transform_indices = @transform_0, window_bounds = array<i64: 1, 448, 32>}, {pipeline_mode = #tpu.pipeline_mode<synchronous>, transform_indices = @transform_1, window_bounds = array<i64: 160, 384>}, {pipeline_mode = #tpu.pipeline_mode<synchronous>, transform_indices = @transform_2, window_bounds = array<i64: 1, 384>}, {pipeline_mode = #tpu.pipeline_mode<synchronous>, transform_indices = @transform_3, window_bounds = array<i64: 1920, 256>}, {pipeline_mode = #tpu.pipeline_mode<synchronous>, transform_indices = @transform_4, window_bounds = array<i64: 1, 256>}, {pipeline_mode = #tpu.pipeline_mode<synchronous>, transform_indices = @transform_5, window_bounds = array<i64: 768, 128>}, {pipeline_mode = #tpu.pipeline_mode<synchronous>, transform_indices = @transform_6, window_bounds = array<i64: 1, 128>}, {pipeline_mode = #tpu.pipeline_mode<synchronous>, transform_indices = @transform_7, window_bounds = array<i64: 256, 256>}, {pipeline_mode = #tpu.pipeline_mode<synchronous>, transform_indices = @transform_8, window_bounds = array<i64: 1, 256>}, {pipeline_mode = #tpu.pipeline_mode<synchronous>, transform_indices = @transform_9, window_bounds = array<i64: 256, 128>}, {pipeline_mode = #tpu.pipeline_mode<synchronous>, transform_indices = @transform_10, window_bounds = array<i64: 1, 128>}, {transform_indices = @transform_11, window_bounds = array<i64: 16, 128>}]} {
    %c0 = arith.constant 0 : index
    %c0_0 = arith.constant 0 : index
    %c0_1 = arith.constant 0 : index
    %0 = vector.load %arg1[%c0, %c0_0, %c0_1] : memref<1x448x32xbf16, #tpu.memory_space<vmem>>, vector<1x384x32xbf16>
    %1 = vector.shape_cast %0 : vector<1x384x32xbf16> to vector<384x32xbf16>
    %c0_2 = arith.constant 0 : index
    %c0_3 = arith.constant 0 : index
    %2 = vector.load %arg2[%c0_2, %c0_3] : memref<160x384xbf16, #tpu.memory_space<vmem>>, vector<32x384xbf16>
    %cst = arith.constant dense<0.000000e+00> : vector<384x384xf32>
    %3 = tpu.matmul %1, %2, %cst {dimension_numbers = #tpu.dot_dimension_numbers<[1], [0], [0], [1], [0, 0, 1, 1], [], []>} : vector<384x32xbf16>, vector<32x384xbf16>, vector<384x384xf32> -> vector<384x384xf32>
    %c0_4 = arith.constant 0 : index
    %c16 = arith.constant 16 : index
    %c0_5 = arith.constant 0 : index
    %4 = vector.load %arg1[%c0_4, %c16, %c0_5] : memref<1x448x32xbf16, #tpu.memory_space<vmem>>, vector<1x384x32xbf16>
    %5 = vector.shape_cast %4 : vector<1x384x32xbf16> to vector<384x32xbf16>
    %c32 = arith.constant 32 : index
    %c0_6 = arith.constant 0 : index
    %6 = vector.load %arg2[%c32, %c0_6] : memref<160x384xbf16, #tpu.memory_space<vmem>>, vector<32x384xbf16>
    %cst_7 = arith.constant dense<0.000000e+00> : vector<384x384xf32>
    %7 = tpu.matmul %5, %6, %cst_7 {dimension_numbers = #tpu.dot_dimension_numbers<[1], [0], [0], [1], [0, 0, 1, 1], [], []>} : vector<384x32xbf16>, vector<32x384xbf16>, vector<384x384xf32> -> vector<384x384xf32>
    %8 = arith.addf %3, %7 : vector<384x384xf32>
    %c0_8 = arith.constant 0 : index
    %c32_9 = arith.constant 32 : index
    %c0_10 = arith.constant 0 : index
    %9 = vector.load %arg1[%c0_8, %c32_9, %c0_10] : memref<1x448x32xbf16, #tpu.memory_space<vmem>>, vector<1x384x32xbf16>
    %10 = vector.shape_cast %9 : vector<1x384x32xbf16> to vector<384x32xbf16>
    %c64 = arith.constant 64 : index
    %c0_11 = arith.constant 0 : index
    %11 = vector.load %arg2[%c64, %c0_11] : memref<160x384xbf16, #tpu.memory_space<vmem>>, vector<32x384xbf16>
    %cst_12 = arith.constant dense<0.000000e+00> : vector<384x384xf32>
    %12 = tpu.matmul %10, %11, %cst_12 {dimension_numbers = #tpu.dot_dimension_numbers<[1], [0], [0], [1], [0, 0, 1, 1], [], []>} : vector<384x32xbf16>, vector<32x384xbf16>, vector<384x384xf32> -> vector<384x384xf32>
    %13 = arith.addf %8, %12 : vector<384x384xf32>
    %c0_13 = arith.constant 0 : index
    %c48 = arith.constant 48 : index
    %c0_14 = arith.constant 0 : index
    %14 = vector.load %arg1[%c0_13, %c48, %c0_14] : memref<1x448x32xbf16, #tpu.memory_space<vmem>>, vector<1x384x32xbf16>
    %15 = vector.shape_cast %14 : vector<1x384x32xbf16> to vector<384x32xbf16>
    %c96 = arith.constant 96 : index
    %c0_15 = arith.constant 0 : index
    %16 = vector.load %arg2[%c96, %c0_15] : memref<160x384xbf16, #tpu.memory_space<vmem>>, vector<32x384xbf16>
    %cst_16 = arith.constant dense<0.000000e+00> : vector<384x384xf32>
    %17 = tpu.matmul %15, %16, %cst_16 {dimension_numbers = #tpu.dot_dimension_numbers<[1], [0], [0], [1], [0, 0, 1, 1], [], []>} : vector<384x32xbf16>, vector<32x384xbf16>, vector<384x384xf32> -> vector<384x384xf32>
    %18 = arith.addf %13, %17 : vector<384x384xf32>
    %c0_17 = arith.constant 0 : index
    %c64_18 = arith.constant 64 : index
    %c0_19 = arith.constant 0 : index
    %19 = vector.load %arg1[%c0_17, %c64_18, %c0_19] : memref<1x448x32xbf16, #tpu.memory_space<vmem>>, vector<1x384x32xbf16>
    %20 = vector.shape_cast %19 : vector<1x384x32xbf16> to vector<384x32xbf16>
    %c128 = arith.constant 128 : index
    %c0_20 = arith.constant 0 : index
    %21 = vector.load %arg2[%c128, %c0_20] : memref<160x384xbf16, #tpu.memory_space<vmem>>, vector<32x384xbf16>
    %cst_21 = arith.constant dense<0.000000e+00> : vector<384x384xf32>
    %22 = tpu.matmul %20, %21, %cst_21 {dimension_numbers = #tpu.dot_dimension_numbers<[1], [0], [0], [1], [0, 0, 1, 1], [], []>} : vector<384x32xbf16>, vector<32x384xbf16>, vector<384x384xf32> -> vector<384x384xf32>
    %23 = arith.addf %18, %22 : vector<384x384xf32>
    %24 = vector.extract_strided_slice %23 {offsets = [0, 0], sizes = [16, 384], strides = [1, 1]} : vector<384x384xf32> to vector<16x384xf32>
    %25 = vector.extract_strided_slice %23 {offsets = [32, 0], sizes = [16, 384], strides = [1, 1]} : vector<384x384xf32> to vector<16x384xf32>
    %26 = vector.extract_strided_slice %23 {offsets = [64, 0], sizes = [16, 384], strides = [1, 1]} : vector<384x384xf32> to vector<16x384xf32>
    %27 = vector.extract_strided_slice %23 {offsets = [96, 0], sizes = [16, 384], strides = [1, 1]} : vector<384x384xf32> to vector<16x384xf32>
    %28 = vector.extract_strided_slice %23 {offsets = [128, 0], sizes = [16, 384], strides = [1, 1]} : vector<384x384xf32> to vector<16x384xf32>
    %29 = vector.extract_strided_slice %23 {offsets = [160, 0], sizes = [16, 384], strides = [1, 1]} : vector<384x384xf32> to vector<16x384xf32>
    %30 = vector.extract_strided_slice %23 {offsets = [192, 0], sizes = [16, 384], strides = [1, 1]} : vector<384x384xf32> to vector<16x384xf32>
    %31 = vector.extract_strided_slice %23 {offsets = [224, 0], sizes = [16, 384], strides = [1, 1]} : vector<384x384xf32> to vector<16x384xf32>
    %32 = vector.extract_strided_slice %23 {offsets = [256, 0], sizes = [16, 384], strides = [1, 1]} : vector<384x384xf32> to vector<16x384xf32>
    %33 = vector.extract_strided_slice %23 {offsets = [288, 0], sizes = [16, 384], strides = [1, 1]} : vector<384x384xf32> to vector<16x384xf32>
    %34 = vector.extract_strided_slice %23 {offsets = [320, 0], sizes = [16, 384], strides = [1, 1]} : vector<384x384xf32> to vector<16x384xf32>
    %35 = vector.extract_strided_slice %23 {offsets = [352, 0], sizes = [16, 384], strides = [1, 1]} : vector<384x384xf32> to vector<16x384xf32>
    %36 = tpu.concatenate %24, %25, %26, %27, %28, %29, %30, %31, %32, %33, %34, %35 in 0 : vector<16x384xf32>, vector<16x384xf32>, vector<16x384xf32>, vector<16x384xf32>, vector<16x384xf32>, vector<16x384xf32>, vector<16x384xf32>, vector<16x384xf32>, vector<16x384xf32>, vector<16x384xf32>, vector<16x384xf32>, vector<16x384xf32> -> vector<192x384xf32>
    %37 = vector.extract_strided_slice %23 {offsets = [16, 0], sizes = [16, 384], strides = [1, 1]} : vector<384x384xf32> to vector<16x384xf32>
    %38 = vector.extract_strided_slice %23 {offsets = [48, 0], sizes = [16, 384], strides = [1, 1]} : vector<384x384xf32> to vector<16x384xf32>
    %39 = vector.extract_strided_slice %23 {offsets = [80, 0], sizes = [16, 384], strides = [1, 1]} : vector<384x384xf32> to vector<16x384xf32>
    %40 = vector.extract_strided_slice %23 {offsets = [112, 0], sizes = [16, 384], strides = [1, 1]} : vector<384x384xf32> to vector<16x384xf32>
    %41 = vector.extract_strided_slice %23 {offsets = [144, 0], sizes = [16, 384], strides = [1, 1]} : vector<384x384xf32> to vector<16x384xf32>
    %42 = vector.extract_strided_slice %23 {offsets = [176, 0], sizes = [16, 384], strides = [1, 1]} : vector<384x384xf32> to vector<16x384xf32>
    %43 = vector.extract_strided_slice %23 {offsets = [208, 0], sizes = [16, 384], strides = [1, 1]} : vector<384x384xf32> to vector<16x384xf32>
    %44 = vector.extract_strided_slice %23 {offsets = [240, 0], sizes = [16, 384], strides = [1, 1]} : vector<384x384xf32> to vector<16x384xf32>
    %45 = vector.extract_strided_slice %23 {offsets = [272, 0], sizes = [16, 384], strides = [1, 1]} : vector<384x384xf32> to vector<16x384xf32>
    %46 = vector.extract_strided_slice %23 {offsets = [304, 0], sizes = [16, 384], strides = [1, 1]} : vector<384x384xf32> to vector<16x384xf32>
    %47 = vector.extract_strided_slice %23 {offsets = [336, 0], sizes = [16, 384], strides = [1, 1]} : vector<384x384xf32> to vector<16x384xf32>
    %48 = vector.extract_strided_slice %23 {offsets = [368, 0], sizes = [16, 384], strides = [1, 1]} : vector<384x384xf32> to vector<16x384xf32>
    %49 = tpu.concatenate %37, %38, %39, %40, %41, %42, %43, %44, %45, %46, %47, %48 in 0 : vector<16x384xf32>, vector<16x384xf32>, vector<16x384xf32>, vector<16x384xf32>, vector<16x384xf32>, vector<16x384xf32>, vector<16x384xf32>, vector<16x384xf32>, vector<16x384xf32>, vector<16x384xf32>, vector<16x384xf32>, vector<16x384xf32> -> vector<192x384xf32>
    %50 = arith.maximumf %36, %49 : vector<192x384xf32>
    %c368_i32 = arith.constant 368 : i32
    %51 = tpu.dynamic_rotate %50 by %c368_i32 dim 1 : vector<192x384xf32>, i32 -> vector<192x384xf32>
    %52 = arith.maximumf %50, %51 : vector<192x384xf32>
    %c0_22 = arith.constant 0 : index
    %c0_23 = arith.constant 0 : index
    %53 = vector.load %arg3[%c0_22, %c0_23] : memref<1x384xf32, #tpu.memory_space<vmem>>, vector<1x384xf32>
    %54 = vector.broadcast %53 : vector<1x384xf32> to vector<192x384xf32>
    %55 = arith.addf %52, %54 : vector<192x384xf32>
    %cst_24 = arith.constant 0.000000e+00 : f32
    %56 = vector.broadcast %cst_24 : f32 to vector<192x384xf32>
    %57 = arith.maximumf %55, %56 : vector<192x384xf32>
    %58 = arith.truncf %57 : vector<192x384xf32> to vector<192x384xbf16>
    %59 = vector.extract_strided_slice %58 {offsets = [0, 0], sizes = [128, 384], strides = [1, 1]} : vector<192x384xbf16> to vector<128x384xbf16>
    %c0_25 = arith.constant 0 : index
    %c0_26 = arith.constant 0 : index
    %60 = vector.load %arg4[%c0_25, %c0_26] : memref<1920x256xbf16, #tpu.memory_space<vmem>>, vector<384x256xbf16>
    %cst_27 = arith.constant dense<0.000000e+00> : vector<128x256xf32>
    %61 = tpu.matmul %59, %60, %cst_27 {dimension_numbers = #tpu.dot_dimension_numbers<[1], [0], [0], [1], [0, 0, 1, 1], [], []>} : vector<128x384xbf16>, vector<384x256xbf16>, vector<128x256xf32> -> vector<128x256xf32>
    %62 = vector.extract_strided_slice %58 {offsets = [16, 0], sizes = [128, 384], strides = [1, 1]} : vector<192x384xbf16> to vector<128x384xbf16>
    %c384 = arith.constant 384 : index
    %c0_28 = arith.constant 0 : index
    %63 = vector.load %arg4[%c384, %c0_28] : memref<1920x256xbf16, #tpu.memory_space<vmem>>, vector<384x256xbf16>
    %cst_29 = arith.constant dense<0.000000e+00> : vector<128x256xf32>
    %64 = tpu.matmul %62, %63, %cst_29 {dimension_numbers = #tpu.dot_dimension_numbers<[1], [0], [0], [1], [0, 0, 1, 1], [], []>} : vector<128x384xbf16>, vector<384x256xbf16>, vector<128x256xf32> -> vector<128x256xf32>
    %65 = arith.addf %61, %64 : vector<128x256xf32>
    %66 = vector.extract_strided_slice %58 {offsets = [32, 0], sizes = [128, 384], strides = [1, 1]} : vector<192x384xbf16> to vector<128x384xbf16>
    %c768 = arith.constant 768 : index
    %c0_30 = arith.constant 0 : index
    %67 = vector.load %arg4[%c768, %c0_30] : memref<1920x256xbf16, #tpu.memory_space<vmem>>, vector<384x256xbf16>
    %cst_31 = arith.constant dense<0.000000e+00> : vector<128x256xf32>
    %68 = tpu.matmul %66, %67, %cst_31 {dimension_numbers = #tpu.dot_dimension_numbers<[1], [0], [0], [1], [0, 0, 1, 1], [], []>} : vector<128x384xbf16>, vector<384x256xbf16>, vector<128x256xf32> -> vector<128x256xf32>
    %69 = arith.addf %65, %68 : vector<128x256xf32>
    %70 = vector.extract_strided_slice %58 {offsets = [48, 0], sizes = [128, 384], strides = [1, 1]} : vector<192x384xbf16> to vector<128x384xbf16>
    %c1152 = arith.constant 1152 : index
    %c0_32 = arith.constant 0 : index
    %71 = vector.load %arg4[%c1152, %c0_32] : memref<1920x256xbf16, #tpu.memory_space<vmem>>, vector<384x256xbf16>
    %cst_33 = arith.constant dense<0.000000e+00> : vector<128x256xf32>
    %72 = tpu.matmul %70, %71, %cst_33 {dimension_numbers = #tpu.dot_dimension_numbers<[1], [0], [0], [1], [0, 0, 1, 1], [], []>} : vector<128x384xbf16>, vector<384x256xbf16>, vector<128x256xf32> -> vector<128x256xf32>
    %73 = arith.addf %69, %72 : vector<128x256xf32>
    %74 = vector.extract_strided_slice %58 {offsets = [64, 0], sizes = [128, 384], strides = [1, 1]} : vector<192x384xbf16> to vector<128x384xbf16>
    %c1536 = arith.constant 1536 : index
    %c0_34 = arith.constant 0 : index
    %75 = vector.load %arg4[%c1536, %c0_34] : memref<1920x256xbf16, #tpu.memory_space<vmem>>, vector<384x256xbf16>
    %cst_35 = arith.constant dense<0.000000e+00> : vector<128x256xf32>
    %76 = tpu.matmul %74, %75, %cst_35 {dimension_numbers = #tpu.dot_dimension_numbers<[1], [0], [0], [1], [0, 0, 1, 1], [], []>} : vector<128x384xbf16>, vector<384x256xbf16>, vector<128x256xf32> -> vector<128x256xf32>
    %77 = arith.addf %73, %76 : vector<128x256xf32>
    %78 = vector.extract_strided_slice %77 {offsets = [0, 0], sizes = [16, 256], strides = [1, 1]} : vector<128x256xf32> to vector<16x256xf32>
    %79 = vector.extract_strided_slice %77 {offsets = [32, 0], sizes = [16, 256], strides = [1, 1]} : vector<128x256xf32> to vector<16x256xf32>
    %80 = vector.extract_strided_slice %77 {offsets = [64, 0], sizes = [16, 256], strides = [1, 1]} : vector<128x256xf32> to vector<16x256xf32>
    %81 = vector.extract_strided_slice %77 {offsets = [96, 0], sizes = [16, 256], strides = [1, 1]} : vector<128x256xf32> to vector<16x256xf32>
    %82 = tpu.concatenate %78, %79, %80, %81 in 0 : vector<16x256xf32>, vector<16x256xf32>, vector<16x256xf32>, vector<16x256xf32> -> vector<64x256xf32>
    %83 = vector.extract_strided_slice %77 {offsets = [16, 0], sizes = [16, 256], strides = [1, 1]} : vector<128x256xf32> to vector<16x256xf32>
    %84 = vector.extract_strided_slice %77 {offsets = [48, 0], sizes = [16, 256], strides = [1, 1]} : vector<128x256xf32> to vector<16x256xf32>
    %85 = vector.extract_strided_slice %77 {offsets = [80, 0], sizes = [16, 256], strides = [1, 1]} : vector<128x256xf32> to vector<16x256xf32>
    %86 = vector.extract_strided_slice %77 {offsets = [112, 0], sizes = [16, 256], strides = [1, 1]} : vector<128x256xf32> to vector<16x256xf32>
    %87 = tpu.concatenate %83, %84, %85, %86 in 0 : vector<16x256xf32>, vector<16x256xf32>, vector<16x256xf32>, vector<16x256xf32> -> vector<64x256xf32>
    %88 = arith.maximumf %82, %87 : vector<64x256xf32>
    %c224_i32 = arith.constant 224 : i32
    %89 = tpu.dynamic_rotate %88 by %c224_i32 dim 1 : vector<64x256xf32>, i32 -> vector<64x256xf32>
    %90 = arith.maximumf %88, %89 : vector<64x256xf32>
    %c0_36 = arith.constant 0 : index
    %c0_37 = arith.constant 0 : index
    %91 = vector.load %arg5[%c0_36, %c0_37] : memref<1x256xf32, #tpu.memory_space<vmem>>, vector<1x256xf32>
    %92 = vector.broadcast %91 : vector<1x256xf32> to vector<64x256xf32>
    %93 = arith.addf %90, %92 : vector<64x256xf32>
    %cst_38 = arith.constant 0.000000e+00 : f32
    %94 = vector.broadcast %cst_38 : f32 to vector<64x256xf32>
    %95 = arith.maximumf %93, %94 : vector<64x256xf32>
    %96 = arith.truncf %95 : vector<64x256xf32> to vector<64x256xbf16>
    %97 = vector.extract_strided_slice %96 {offsets = [0, 0], sizes = [32, 256], strides = [1, 1]} : vector<64x256xbf16> to vector<32x256xbf16>
    %c0_39 = arith.constant 0 : index
    %c0_40 = arith.constant 0 : index
    %98 = vector.load %arg6[%c0_39, %c0_40] : memref<768x128xbf16, #tpu.memory_space<vmem>>, vector<256x128xbf16>
    %cst_41 = arith.constant dense<0.000000e+00> : vector<32x128xf32>
    %99 = tpu.matmul %97, %98, %cst_41 {dimension_numbers = #tpu.dot_dimension_numbers<[1], [0], [0], [1], [0, 0, 1, 1], [], []>} : vector<32x256xbf16>, vector<256x128xbf16>, vector<32x128xf32> -> vector<32x128xf32>
    %100 = vector.extract_strided_slice %96 {offsets = [16, 0], sizes = [32, 256], strides = [1, 1]} : vector<64x256xbf16> to vector<32x256xbf16>
    %c256 = arith.constant 256 : index
    %c0_42 = arith.constant 0 : index
    %101 = vector.load %arg6[%c256, %c0_42] : memref<768x128xbf16, #tpu.memory_space<vmem>>, vector<256x128xbf16>
    %cst_43 = arith.constant dense<0.000000e+00> : vector<32x128xf32>
    %102 = tpu.matmul %100, %101, %cst_43 {dimension_numbers = #tpu.dot_dimension_numbers<[1], [0], [0], [1], [0, 0, 1, 1], [], []>} : vector<32x256xbf16>, vector<256x128xbf16>, vector<32x128xf32> -> vector<32x128xf32>
    %103 = arith.addf %99, %102 : vector<32x128xf32>
    %104 = vector.extract_strided_slice %96 {offsets = [32, 0], sizes = [32, 256], strides = [1, 1]} : vector<64x256xbf16> to vector<32x256xbf16>
    %c512 = arith.constant 512 : index
    %c0_44 = arith.constant 0 : index
    %105 = vector.load %arg6[%c512, %c0_44] : memref<768x128xbf16, #tpu.memory_space<vmem>>, vector<256x128xbf16>
    %cst_45 = arith.constant dense<0.000000e+00> : vector<32x128xf32>
    %106 = tpu.matmul %104, %105, %cst_45 {dimension_numbers = #tpu.dot_dimension_numbers<[1], [0], [0], [1], [0, 0, 1, 1], [], []>} : vector<32x256xbf16>, vector<256x128xbf16>, vector<32x128xf32> -> vector<32x128xf32>
    %107 = arith.addf %103, %106 : vector<32x128xf32>
    %c0_46 = arith.constant 0 : index
    %c0_47 = arith.constant 0 : index
    %108 = vector.load %arg7[%c0_46, %c0_47] : memref<1x128xf32, #tpu.memory_space<vmem>>, vector<1x128xf32>
    %109 = vector.broadcast %108 : vector<1x128xf32> to vector<32x128xf32>
    %110 = arith.addf %107, %109 : vector<32x128xf32>
    %cst_48 = arith.constant 0.000000e+00 : f32
    %111 = vector.broadcast %cst_48 : f32 to vector<32x128xf32>
    %112 = arith.maximumf %110, %111 : vector<32x128xf32>
    %113 = arith.truncf %112 : vector<32x128xf32> to vector<32x128xbf16>
    %114 = vector.extract_strided_slice %113 {offsets = [0, 0], sizes = [16, 128], strides = [1, 1]} : vector<32x128xbf16> to vector<16x128xbf16>
    %115 = vector.extract_strided_slice %113 {offsets = [16, 0], sizes = [16, 128], strides = [1, 1]} : vector<32x128xbf16> to vector<16x128xbf16>
    %116 = tpu.concatenate %114, %115 in 1 : vector<16x128xbf16>, vector<16x128xbf16> -> vector<16x256xbf16>
    %c0_49 = arith.constant 0 : index
    %c0_50 = arith.constant 0 : index
    %117 = vector.load %arg8[%c0_49, %c0_50] : memref<256x256xbf16, #tpu.memory_space<vmem>>, vector<256x256xbf16>
    %cst_51 = arith.constant dense<0.000000e+00> : vector<16x256xf32>
    %118 = tpu.matmul %116, %117, %cst_51 {dimension_numbers = #tpu.dot_dimension_numbers<[1], [0], [0], [1], [0, 0, 1, 1], [], []>} : vector<16x256xbf16>, vector<256x256xbf16>, vector<16x256xf32> -> vector<16x256xf32>
    %c0_52 = arith.constant 0 : index
    %c0_53 = arith.constant 0 : index
    %119 = vector.load %arg9[%c0_52, %c0_53] : memref<1x256xf32, #tpu.memory_space<vmem>>, vector<1x256xf32>
    %120 = vector.broadcast %119 : vector<1x256xf32> to vector<16x256xf32>
    %121 = arith.addf %118, %120 : vector<16x256xf32>
    %cst_54 = arith.constant 0.000000e+00 : f32
    %122 = vector.broadcast %cst_54 : f32 to vector<16x256xf32>
    %123 = arith.maximumf %121, %122 : vector<16x256xf32>
    %124 = arith.truncf %123 : vector<16x256xf32> to vector<16x256xbf16>
    %c0_55 = arith.constant 0 : index
    %c0_56 = arith.constant 0 : index
    %125 = vector.load %arg10[%c0_55, %c0_56] : memref<256x128xbf16, #tpu.memory_space<vmem>>, vector<256x128xbf16>
    %cst_57 = arith.constant dense<0.000000e+00> : vector<16x128xf32>
    %126 = tpu.matmul %124, %125, %cst_57 {dimension_numbers = #tpu.dot_dimension_numbers<[1], [0], [0], [1], [0, 0, 1, 1], [], []>} : vector<16x256xbf16>, vector<256x128xbf16>, vector<16x128xf32> -> vector<16x128xf32>
    %c0_58 = arith.constant 0 : index
    %c0_59 = arith.constant 0 : index
    %127 = vector.load %arg11[%c0_58, %c0_59] : memref<1x128xf32, #tpu.memory_space<vmem>>, vector<1x128xf32>
    %128 = vector.broadcast %127 : vector<1x128xf32> to vector<16x128xf32>
    %129 = arith.addf %126, %128 : vector<16x128xf32>
    %c0_60 = arith.constant 0 : index
    %c0_61 = arith.constant 0 : index
    %130 = vector.load %arg12[%c0_60, %c0_61] : memref<16x128xf32, #tpu.memory_space<vmem>>, vector<16x128xf32>
    tpu.vector_store %arg12[%c0_60, %c0_61], %129 {strides = array<i32>} : memref<16x128xf32, #tpu.memory_space<vmem>>, vector<16x128xf32>,
    return
  }
  func.func @transform_0(%arg0: i32) -> (i32, i32, i32) {
    %c0_i32 = arith.constant 0 : i32
    %c0_i32_0 = arith.constant 0 : i32
    %c0_i32_1 = arith.constant 0 : i32
    return %arg0, %c0_i32, %c0_i32_0 : i32, i32, i32
  }
  func.func @transform_1(%arg0: i32) -> (i32, i32) {
    %c0_i32 = arith.constant 0 : i32
    %c0_i32_0 = arith.constant 0 : i32
    %c0_i32_1 = arith.constant 0 : i32
    return %c0_i32, %c0_i32_0 : i32, i32
  }
  func.func @transform_2(%arg0: i32) -> (i32, i32) {
    %c0_i32 = arith.constant 0 : i32
    %c0_i32_0 = arith.constant 0 : i32
    %c0_i32_1 = arith.constant 0 : i32
    return %c0_i32, %c0_i32_0 : i32, i32
  }
  func.func @transform_3(%arg0: i32) -> (i32, i32) {
    %c0_i32 = arith.constant 0 : i32
    %c0_i32_0 = arith.constant 0 : i32
    %c0_i32_1 = arith.constant 0 : i32
    return %c0_i32, %c0_i32_0 : i32, i32
  }
  func.func @transform_4(%arg0: i32) -> (i32, i32) {
    %c0_i32 = arith.constant 0 : i32
    %c0_i32_0 = arith.constant 0 : i32
    %c0_i32_1 = arith.constant 0 : i32
    return %c0_i32, %c0_i32_0 : i32, i32
  }
  func.func @transform_5(%arg0: i32) -> (i32, i32) {
    %c0_i32 = arith.constant 0 : i32
    %c0_i32_0 = arith.constant 0 : i32
    %c0_i32_1 = arith.constant 0 : i32
    return %c0_i32, %c0_i32_0 : i32, i32
  }
  func.func @transform_6(%arg0: i32) -> (i32, i32) {
    %c0_i32 = arith.constant 0 : i32
    %c0_i32_0 = arith.constant 0 : i32
    %c0_i32_1 = arith.constant 0 : i32
    return %c0_i32, %c0_i32_0 : i32, i32
  }
  func.func @transform_7(%arg0: i32) -> (i32, i32) {
    %c0_i32 = arith.constant 0 : i32
    %c0_i32_0 = arith.constant 0 : i32
    %c0_i32_1 = arith.constant 0 : i32
    return %c0_i32, %c0_i32_0 : i32, i32
  }
  func.func @transform_8(%arg0: i32) -> (i32, i32) {
    %c0_i32 = arith.constant 0 : i32
    %c0_i32_0 = arith.constant 0 : i32
    %c0_i32_1 = arith.constant 0 : i32
    return %c0_i32, %c0_i32_0 : i32, i32
  }
  func.func @transform_9(%arg0: i32) -> (i32, i32) {
    %c0_i32 = arith.constant 0 : i32
    %c0_i32_0 = arith.constant 0 : i32
    %c0_i32_1 = arith.constant 0 : i32
    return %c0_i32, %c0_i32_0 : i32, i32
  }
  func.func @transform_10(%arg0: i32) -> (i32, i32) {
    %c0_i32 = arith.constant 0 : i32
    %c0_i32_0 = arith.constant 0 : i32
    %c0_i32_1 = arith.constant 0 : i32
    return %c0_i32, %c0_i32_0 : i32, i32
  }
  func.func @transform_11(%arg0: i32) -> (i32, i32) {
    %c0_i32 = arith.constant 0 : i32
    %c0_i32_0 = arith.constant 0 : i32
    return %arg0, %c0_i32 : i32, i32
  }
}

</mosaic_0001>

<bundles_post_ra>
// kernel: cnn_classifier_a.1
= control target key start
LH: loop header
LB: loop body
LE: loop exit
PB: predicated region body
PF: predicated region fallthrough
CT: control target
= control target key end

     0   :  { %16 = vsyncpa [#allocation3], 0  ;;  %s13952_s0 = inlined_call_operand.vmem [shape: bf16[1,448,32], index: 0, kind: input, shape index: {}]   ;;  %s13953_s1 = inlined_call_operand.vmem [shape: bf16[160,384], index: 1, kind: input, shape index: {}]   ;;  %s13954_s2 = inlined_call_operand.vmem [shape: f32[1,384], index: 2, kind: input, shape index: {}]   ;;  %s13955_s3 = inlined_call_operand.hbm [shape: bf16[1920,256], index: 3, kind: input, shape index: {}]   ;;  %s13956_s4 = inlined_call_operand.vmem [shape: f32[1,256], index: 4, kind: input, shape index: {}]   ;;  %s13957_s5 = inlined_call_operand.vmem [shape: bf16[768,128], index: 5, kind: input, shape index: {}]   ;;  %s13958_s6 = inlined_call_operand.vmem [shape: f32[1,128], index: 6, kind: input, shape index: {}]   ;;  %s13959_s7 = inlined_call_operand.vmem [shape: bf16[256,256], index: 7, kind: input, shape index: {}]   ;;  %s13960_s8 = inlined_call_operand.vmem [shape: f32[1,256], index: 8, kind: input, shape index: {}]   ;;  %s13961_s9 = inlined_call_operand.hbm [shape: bf16[256,128], index: 9, kind: input, shape index: {}]   ;;  %s13962_s10 = inlined_call_operand.vmem [shape: f32[1,128], index: 10, kind: input, shape index: {}]   ;;  %s13963_s11 = inlined_call_operand.vmem [shape: f32[16,128], index: 11, kind: output, shape index: {}]  }
   0x1   :  { %17 = vsyncpa [#allocation5], 0  ;;  %s11262_s17 = smov [#allocation2]   ;;  %s11214_s21 = scalar_lea.hbm %s13955_s3, 30720 }
   0x2   :  { %s29_s18 = sshll.u32 %s11262_s17, 4  ;;  %p11215_p0 = scmp.ne.s32.totalorder %s13955_s3, %s11214_s21  ;;  %s30_s18 = int_to_ptr.vmem [resolvable:$true] %s29_s18 }
   0x3   :  { %p11218_p1 = scmp.lt.u32.totalorder %s11214_s21, %s13955_s3 }
   0x5   :  { %p11220_p2 = pnand %p11218_p1, %p11215_p0 }
   0x7   :  { %11223 = shalt.err (!%p11220_p2)
}
   0x8   :  { %s11224_s26 = scalar_lea.vmem %s30_s18, 30720  ;;  %p11229_p4 = scmp.lt.s32.totalorder %s30_s18, %s30_s18 }
   0x9   :  { %p11225_p3 = scmp.ne.s32.totalorder %s30_s18, %s11224_s26  ;;  %p11230_p5 = scmp.lt.s32.totalorder %s11224_s26, %s11224_s26 }
   0xb   :  { %p11231_p6 = por %p11230_p5, %p11229_p4 }
   0xd   :  { %p11232_p7 = pnand %p11231_p6, %p11225_p3 }
   0xf   :  { %11235 = shalt.err (!%p11232_p7)
}
  0x10   :  { %s11263_s27 = smov 128   ;;  %s11264_s28 = smov 8  }
  0x11   :  { %35 = dma.hbm_to_vmem [thread:$0]  %s13955_s3, 30720, %s30_s18, [#allocation3], %s11263_s27, %s11263_s27, %s11264_s28  }
  0x12   :  { %s11265_s12 = smov [#allocation4]   ;;  %s11236_s16 = scalar_lea.hbm %s13961_s9, 2048 }
  0x13   :  { %s51_s13 = sshll.u32 %s11265_s12, 4  ;;  %p11237_p8 = scmp.ne.s32.totalorder %s13961_s9, %s11236_s16  ;;  %s52_s13 = int_to_ptr.vmem [resolvable:$true] %s51_s13 }
  0x14   :  { %p11240_p9 = scmp.lt.u32.totalorder %s11236_s16, %s13961_s9 }
  0x16   :  { %p11242_p10 = pnand %p11240_p9, %p11237_p8 }
  0x18   :  { %11245 = shalt.err (!%p11242_p10)
}
  0x19   :  { %s11246_s22 = scalar_lea.vmem %s52_s13, 2048  ;;  %p11251_p12 = scmp.lt.s32.totalorder %s52_s13, %s52_s13 }
  0x1a   :  { %p11247_p11 = scmp.ne.s32.totalorder %s52_s13, %s11246_s22  ;;  %p11252_p13 = scmp.lt.s32.totalorder %s11246_s22, %s11246_s22 }
  0x1c   :  { %p11253_p0 = por %p11252_p13, %p11251_p12 }
  0x1e   :  { %p11254_p1 = pnand %p11253_p0, %p11247_p11 }
  0x20   :  { %11257 = shalt.err (!%p11254_p1)
}
  0x21   :  { %s11266_s3 = smov 64   ;;  %s11267_s18 = smov 4  }
  0x22   :  { %57 = dma.hbm_to_vmem [thread:$0]  %s13961_s9, 2048, %s52_s13, [#allocation5], %s11266_s3, %s11266_s3, %s11267_s18  }
  0x23   :  { %11258 = dma.done.wait [#allocation3], 30720  }
  0x24   :  { %11259 = vsyncadd [#allocation3], 4294936576 }
  0x25   :  { %11260 = dma.done.wait [#allocation5], 2048  }
  0x26   :  { %11261 = vsyncadd [#allocation5], 4294965248  ;;  %v13967_v0 = vmov 0   ;;  %v10582_v1 = vld [vmem:[%s13953_s1 + $0x34] ss:$12 sps:$4 sm:$0xff]   ;;  %v11371_v5 = vld [vmem:[%s13952_s0 + $0x8] sm:$0xff]  }
  0x27   :  { %390 = vmatprep.mubr.bf16.mxu0 %v13967_v0  ;;  %v10584_v2 = vld [vmem:[%s13953_s1 + $0x30] ss:$12 sps:$4 sm:$0xff]   ;;  %358 = vmatprep.subr.bf16.mxu0 %v10582_v1  ;;  %v10585_v3 = vld [vmem:[%s13953_s1 + $0x4c] ss:$12 sps:$4 sm:$0xff]   ;;  %v10587_v4 = vld [vmem:[%s13953_s1 + $0x48] ss:$12 sps:$4 sm:$0xff]  }
  0x28   :  { %359 = vmatpush1.bf16.msra.mxu0 %v10584_v2  ;;  %vm285_vm0 = vcmask 261120   ;;  %v10591_v6 = vld [vmem:[%s13953_s1 + $0x4] ss:$12 sps:$4 sm:$0xff]   ;;  %v10589_v9 = vld [vmem:[%s13953_s1] ss:$12 sps:$4 sm:$0xff]   ;;  %v11398_v11 = vld [vmem:[%s13952_s0 + $0x18] sm:$0xff]  }
  0x29   :  { %360 = vmatprep.subr.bf16.mxu0 %v10585_v3  ;;  %v10592_v7 = vld [vmem:[%s13953_s1 + $0x38] ss:$12 sps:$4 sm:$0xff]   ;;  %9453 = vmatprep.mubr.msk.bf16.mxu1 %vm285_vm0, %v11371_v5  ;;  %v10593_v8 = vld [vmem:[%s13953_s1 + $0x50] ss:$12 sps:$4 sm:$0xff]   ;;  %v11415_v13 = vld [vmem:[%s13952_s0 + $0x28] sm:$0xff]   ;;  %s11270_s20 = smov 96  }
  0x2a   :  { %9449 = vmatprep.subr.bf16.mxu1 %v10592_v7  ;;  %v11393_v10 = vld [vmem:[%s13952_s0 + $0x10] sm:$0xff]   ;;  %v11410_v12 = vld [vmem:[%s13952_s0 + $0x20] sm:$0xff]   ;;  %v11432_v15 = vld [vmem:[%s13952_s0 + $0x38] sm:$0xff]  }
  0x2b   :  { %9450 = vmatpush3.bf16.msra.mxu1 %v10592_v7  ;;  %v11426_v14 = vld [vmem:[%s13952_s0 + $0x30] sm:$0xff]   ;;  %v10615_v16 = vld [vmem:[%s13953_s1 + $0x18] ss:$12 sps:$4 sm:$0xff]   ;;  %v10617_v17 = vld [vmem:[%s13953_s1 + $0x1c] ss:$12 sps:$4 sm:$0xff]  }
  0x2c   :  { %361 = vmatpush1.bf16.msra.mxu0 %v10587_v4  ;;  %9451 = vmatprep.subr.bf16.mxu1 %v10593_v8  ;;  %v10620_v18 = vld [vmem:[%s13953_s1 + $0x8] ss:$12 sps:$4 sm:$0xff]   ;;  %v11450_v19 = vld [vmem:[%s13952_s0 + $0x40] sm:$0xff]   ;;  %v11477_v23 = vld [vmem:[%s13952_s0 + $0x58] sm:$0xff]  }
  0x2d   :  { %896 = vmatprep.subr.bf16.mxu0 %v10591_v6  ;;  %v10621_v20 = vld [vmem:[%s13953_s1 + $0x20] ss:$12 sps:$4 sm:$0xff]   ;;  %v11470_v22 = vld [vmem:[%s13952_s0 + $0x50] sm:$0xff]   ;;  %v11511_v27 = vld [vmem:[%s13952_s0 + $0x78] sm:$0xff]  }
  0x2e   :  { %v11460_v21 = vld [vmem:[%s13952_s0 + $0x48] sm:$0xff]   ;;  %v11487_v24 = vld [vmem:[%s13952_s0 + $0x60] sm:$0xff]   ;;  %v11504_v26 = vld [vmem:[%s13952_s0 + $0x70] sm:$0xff]  }
  0x2f   :  { %8538 = vmatmul.mubr.msk.bf16.vlgmr.msra.gmra.mrb[0].mxu0 %vm285_vm0, %v11371_v5  ;;  %9452 = vmatpush3.bf16.msra.mxu1 %v10593_v8  ;;  %v11494_v25 = vld [vmem:[%s13952_s0 + $0x68] sm:$0xff]   ;;  %v11521_v28 = vld [vmem:[%s13952_s0 + $0x80] sm:$0xff]   ;;  %v11543_v31 = vld [vmem:[%s13952_s0 + $0x90] sm:$0xff]  }
  0x30   :  { %897 = vmatpush1.bf16.msra.mxu0 %v10589_v9  ;;  %400 = vmatprep.mubr.bf16.mxu0 %v13967_v0  ;;  %v11528_v29 = vld [vmem:[%s13952_s0 + $0x88] sm:$0xff]   ;;  %v10625_v32 = vld [vmem:[%s13953_s1 + $0x64] ss:$12 sps:$4 sm:$0xff]   ;;  %v11552_v33 = vld [vmem:[%s13952_s0 + $0x98] sm:$0xff]  }
  0x31   :  { %898 = vmatprep.subr.bf16.mxu0 %v10617_v17  ;;  %9501 = vmatprep.subr.bf16.mxu1 %v10620_v18  ;;  %v10626_v30 = vld [vmem:[%s13953_s1 + $0x68] ss:$12 sps:$4 sm:$0xff]   ;;  %v11561_v34 = vld [vmem:[%s13952_s0 + $0xa0] sm:$0xff]   ;;  %v11583_v37 = vld [vmem:[%s13952_s0 + $0xb8] sm:$0xff]  }
  0x32   :  { %9454 = vmatmul.mubr.msk.bf16.vlgmr.msra.gmra.mrb[0].mxu1 %vm285_vm0, %v11393_v10  ;;  %v11568_v35 = vld [vmem:[%s13952_s0 + $0xa8] sm:$0xff]   ;;  %v10614_v36 = vld [vmem:[%s13952_s0 + $0xb0] sm:$0xff]   ;;  %v10619_v38 = vld [vmem:[%s13952_s0 + $0xc0] sm:$0xff]  }
  0x33   :  { %9457 = vmatprep.mubr.msk.bf16.mxu1 %vm285_vm0, %v11398_v11  ;;  %9502 = vmatpush3.bf16.msra.mxu1 %v10620_v18  ;;  %v11597_v39 = vld [vmem:[%s13952_s0] sm:$0xff]   ;;  %v11688_v42 = vld [vmem:[%s13952_s0 + $0x10] sm:$0xff]   ;;  %v10652_v44 = vld [vmem:[%s13953_s1 + $0x7c] ss:$12 sps:$4 sm:$0xff]  }
  0x34   :  { %899 = vmatpush1.bf16.msra.mxu0 %v10615_v16  ;;  %9503 = vmatprep.subr.bf16.mxu1 %v10621_v20  ;;  %v10627_v40 = vld [vmem:[%s13953_s1 + $0x80] ss:$12 sps:$4 sm:$0xff]   ;;  %v10655_v41 = vld [vmem:[%s13953_s1 + $0x98] ss:$12 sps:$4 sm:$0xff]   ;;  %v10656_v48 = vld [vmem:[%s13953_s1 + $0xb0] ss:$12 sps:$4 sm:$0xff]  }
  0x35   :  { %1674 = vmatprep.subr.bf16.mxu0 %v10625_v32  ;;  %v10623_v43 = vld [vmem:[%s13953_s1 + $0x60] ss:$12 sps:$4 sm:$0xff]   ;;  %v11704_v45 = vld [vmem:[%s13952_s0 + $0x18] sm:$0xff]   ;;  %v11736_v51 = vld [vmem:[%s13952_s0 + $0x30] sm:$0xff]  }
  0x36   :  { %v10650_v46 = vld [vmem:[%s13953_s1 + $0x78] ss:$12 sps:$4 sm:$0xff]   ;;  %v11727_v49 = vld [vmem:[%s13952_s0 + $0x28] sm:$0xff]   ;;  %v11192_v53 = vld [vmem:[%s13952_s0 + $0x10] sm:$0xff]  }
  0x37   :  { %8539 = vmatmul.mubr.msk.bf16.gmra.mrb[4].mxu0 %vm285_vm0, %v11393_v10  ;;  %9504 = vmatpush3.bf16.msra.mxu1 %v10621_v20  ;;  %v11714_v47 = vld [vmem:[%s13952_s0 + $0x20] sm:$0xff]   ;;  %v11191_v50 = vld [vmem:[%s13952_s0 + $0x8] sm:$0xff]   ;;  %v11746_v52 = vld [vmem:[%s13952_s0 + $0x38] sm:$0xff]  }
  0x38   :  { %410 = vmatprep.mubr.bf16.mxu0 %v13967_v0  ;;  %9553 = vmatprep.subr.bf16.mxu1 %v10626_v30  ;;  %v11755_v54 = vld [vmem:[%s13952_s0 + $0x40] sm:$0xff]   ;;  %v11765_v55 = vld [vmem:[%s13952_s0 + $0x48] sm:$0xff]   ;;  %v11193_v56 = vld [vmem:[%s13952_s0 + $0x18] sm:$0xff]  }
  0x39   :  { %v11774_v57 = vld [vmem:[%s13952_s0 + $0x50] sm:$0xff]   ;;  %v11784_v58 = vld [vmem:[%s13952_s0 + $0x58] sm:$0xff]   ;;  %v11194_v59 = vld [vmem:[%s13952_s0 + $0x20] sm:$0xff]  }
  0x3a   :  { %9458 = vmatmul.mubr.msk.bf16.gmra.mrb[4].mxu1 %vm285_vm0, %v11410_v12  ;;  %v11793_v60 = vld [vmem:[%s13952_s0 + $0x60] sm:$0xff]   ;;  %v11195_v61 = vld [vmem:[%s13952_s0 + $0x28] sm:$0xff]   ;;  %v11813_v63 = vld [vmem:[%s13952_s0 + $0x70] sm:$0xff]  }
  0x3b   :  { %9461 = vmatprep.mubr.msk.bf16.mxu1 %vm285_vm0, %v11415_v13  ;;  %v11808_v62 = vld [vmem:[%s13952_s0 + $0x68] sm:$0xff]   ;;  %v11196_v1 = vld [vmem:[%s13952_s0 + $0x30] sm:$0xff]   ;;  %v11827_v2 = vld [vmem:[%s13952_s0 + $0x78] sm:$0xff]  }
  0x3c   :  { %v11832_v3 = vld [vmem:[%s13952_s0 + $0x80] sm:$0xff]   ;;  %v11197_v4 = vld [vmem:[%s13952_s0 + $0x38] sm:$0xff]   ;;  %v11851_v6 = vld [vmem:[%s13952_s0 + $0x90] sm:$0xff]  }
  0x3d   :  { %v10684_v7 = vld [vmem:[%s13953_s1 + $0xc8] ss:$12 sps:$4 sm:$0xff]   ;;  %v11198_v8 = vld [vmem:[%s13952_s0 + $0x40] sm:$0xff]   ;;  %v11909_v16 = vld [vmem:[%s13952_s0 + $0xb8] sm:$0xff]  }
  0x3e   :  { %v10681_v9 = vld [vmem:[%s13953_s1 + $0x94] ss:$12 sps:$4 sm:$0xff]   ;;  %v11201_v18 = vld [vmem:[%s13952_s0 + $0x58] sm:$0xff]  }
  0x3f   :  { %8540 = vmatmul.mubr.msk.bf16.gmra.mrb[8].mxu0 %vm285_vm0, %v11398_v11  ;;  %v11914_v17 = vld [vmem:[%s13952_s0 + $0xc0] sm:$0xff]   ;;  %v11933_v20 = vld [vmem:[%s13952_s0 + $0x18] sm:$0xff]   ;;  %v12007_v32 = vld [vmem:[%s13952_s0 + $0x50] sm:$0xff]  }
  0x40   :  { %420 = vmatprep.mubr.bf16.mxu0 %v13967_v0 }
  0x42   :  { %9462 = vmatmul.mubr.msk.bf16.gmra.mrb[8].mxu1 %vm285_vm0, %v11426_v14 }
  0x43   :  { %9465 = vmatprep.mubr.msk.bf16.mxu1 %vm285_vm0, %v11432_v15 }
  0x47   :  { %8541 = vmatmul.mubr.msk.bf16.gmra.mrb[12].mxu0 %vm285_vm0, %v11410_v12 }
  0x48   :  { %430 = vmatprep.mubr.bf16.mxu0 %v13967_v0 }
  0x4a   :  { %9466 = vmatmul.mubr.msk.bf16.gmra.mrb[12].mxu1 %vm285_vm0, %v11450_v19 }
  0x4b   :  { %9469 = vmatprep.mubr.msk.bf16.mxu1 %vm285_vm0, %v11460_v21 }
  0x4f   :  { %8542 = vmatmul.mubr.msk.bf16.gmra.mrb[16].mxu0 %vm285_vm0, %v11415_v13 }
  0x50   :  { %440 = vmatprep.mubr.bf16.mxu0 %v13967_v0 }
  0x52   :  { %9470 = vmatmul.mubr.msk.bf16.gmra.mrb[16].mxu1 %vm285_vm0, %v11470_v22 }
  0x53   :  { %9473 = vmatprep.mubr.msk.bf16.mxu1 %vm285_vm0, %v11477_v23 }
  0x57   :  { %8543 = vmatmul.mubr.msk.bf16.gmra.mrb[20].mxu0 %vm285_vm0, %v11426_v14 }
  0x58   :  { %450 = vmatprep.mubr.bf16.mxu0 %v13967_v0 }
  0x5a   :  { %9474 = vmatmul.mubr.msk.bf16.gmra.mrb[20].mxu1 %vm285_vm0, %v11487_v24 }
  0x5b   :  { %9477 = vmatprep.mubr.msk.bf16.mxu1 %vm285_vm0, %v11494_v25 }
  0x5f   :  { %8544 = vmatmul.mubr.msk.bf16.gmra.mrb[24].mxu0 %vm285_vm0, %v11432_v15 }
  0x60   :  { %460 = vmatprep.mubr.bf16.mxu0 %v13967_v0 }
  0x62   :  { %9478 = vmatmul.mubr.msk.bf16.gmra.mrb[24].mxu1 %vm285_vm0, %v11504_v26 }
  0x63   :  { %9481 = vmatprep.mubr.msk.bf16.mxu1 %vm285_vm0, %v11511_v27 }
  0x67   :  { %8545 = vmatmul.mubr.msk.bf16.gmra.mrb[28].mxu0 %vm285_vm0, %v11450_v19 }
  0x68   :  { %470 = vmatprep.mubr.bf16.mxu0 %v13967_v0 }
  0x6a   :  { %9482 = vmatmul.mubr.msk.bf16.gmra.mrb[28].mxu1 %vm285_vm0, %v11521_v28 }
  0x6b   :  { %9485 = vmatprep.mubr.msk.bf16.mxu1 %vm285_vm0, %v11528_v29 }
  0x6f   :  { %8546 = vmatmul.mubr.msk.bf16.gmra.mrb[32].mxu0 %vm285_vm0, %v11460_v21 }
  0x70   :  { %480 = vmatprep.mubr.bf16.mxu0 %v13967_v0 }
  0x72   :  { %9486 = vmatmul.mubr.msk.bf16.gmra.mrb[32].mxu1 %vm285_vm0, %v11543_v31 }
  0x73   :  { %9489 = vmatprep.mubr.msk.bf16.mxu1 %vm285_vm0, %v11552_v33 }
  0x77   :  { %8547 = vmatmul.mubr.msk.bf16.gmra.mrb[36].mxu0 %vm285_vm0, %v11470_v22 }
  0x78   :  { %490 = vmatprep.mubr.bf16.mxu0 %v13967_v0 }
  0x7a   :  { %9490 = vmatmul.mubr.msk.bf16.gmra.mrb[36].mxu1 %vm285_vm0, %v11561_v34 }
  0x7b   :  { %9493 = vmatprep.mubr.msk.bf16.mxu1 %vm285_vm0, %v11568_v35 }
  0x7f   :  { %8548 = vmatmul.mubr.msk.bf16.gmra.mrb[40].mxu0 %vm285_vm0, %v11477_v23 }
  0x80   :  { %500 = vmatprep.mubr.bf16.mxu0 %v13967_v0 }
  0x82   :  { %9494 = vmatmul.mubr.msk.bf16.gmra.mrb[40].mxu1 %vm285_vm0, %v10614_v36 }
  0x83   :  { %9497 = vmatprep.mubr.msk.bf16.mxu1 %vm285_vm0, %v11583_v37 }
  0x87   :  { %8549 = vmatmul.mubr.msk.bf16.gmra.mrb[44].mxu0 %vm285_vm0, %v11487_v24 }
  0x88   :  { %510 = vmatprep.mubr.bf16.mxu0 %v13967_v0 }
  0x8a   :  { %9498 = vmatmul.mubr.msk.bf16.gmra.mrb[44].mxu1 %vm285_vm0, %v10619_v38 }
  0x8b   :  { %9505 = vmatprep.mubr.msk.bf16.mxu1 %vm285_vm0, %v11597_v39 }
  0x8f   :  { %8550 = vmatmul.mubr.msk.bf16.gmra.mrb[48].mxu0 %vm285_vm0, %v11494_v25 }
  0x90   :  { %520 = vmatprep.mubr.bf16.mxu0 %v13967_v0 }
  0x92   :  { %9506 = vmatmul.mubr.msk.bf16.vlgmr.msra.gmra.mrb[0].mxu1 %vm285_vm0, %v11371_v5  ;;  %v11846_v5 = vld [vmem:[%s13952_s0 + $0x88] sm:$0xff]  }
  0x93   :  { %9509 = vmatprep.mubr.msk.bf16.mxu1 %vm285_vm0, %v11393_v10  ;;  %9554 = vmatpush3.bf16.msra.mxu1 %v10626_v30  ;;  %v11871_v10 = vld [vmem:[%s13952_s0 + $0x98] sm:$0xff]   ;;  %v11993_v30 = vld [vmem:[%s13952_s0 + $0x48] sm:$0xff]  }
  0x94   :  { %9555 = vmatprep.subr.bf16.mxu1 %v10627_v40 }
  0x97   :  { %8551 = vmatmul.mubr.msk.bf16.gmra.mrb[52].mxu0 %vm285_vm0, %v11504_v26  ;;  %9556 = vmatpush3.bf16.msra.mxu1 %v10627_v40  ;;  %v11208_v40 = vld [vmem:[%s13952_s0 + $0x90] sm:$0xff]  }
  0x98   :  { %530 = vmatprep.mubr.bf16.mxu0 %v13967_v0  ;;  %9605 = vmatprep.subr.bf16.mxu1 %v10655_v41 }
  0x9a   :  { %9510 = vmatmul.mubr.msk.bf16.gmra.mrb[4].mxu1 %vm285_vm0, %v11398_v11  ;;  %v11876_v11 = vld [vmem:[%s13952_s0 + $0xa0] sm:$0xff]  }
  0x9b   :  { %9513 = vmatprep.mubr.msk.bf16.mxu1 %vm285_vm0, %v11410_v12  ;;  %v11199_v12 = vld [vmem:[%s13952_s0 + $0x48] sm:$0xff]  }
  0x9f   :  { %8552 = vmatmul.mubr.msk.bf16.gmra.mrb[56].mxu0 %vm285_vm0, %v11511_v27 }
  0xa0   :  { %540 = vmatprep.mubr.bf16.mxu0 %v13967_v0 }
  0xa2   :  { %9514 = vmatmul.mubr.msk.bf16.gmra.mrb[8].mxu1 %vm285_vm0, %v11415_v13  ;;  %v11890_v13 = vld [vmem:[%s13952_s0 + $0xa8] sm:$0xff]  }
  0xa3   :  { %9517 = vmatprep.mubr.msk.bf16.mxu1 %vm285_vm0, %v11426_v14  ;;  %v11895_v14 = vld [vmem:[%s13952_s0 + $0xb0] sm:$0xff]  }
  0xa7   :  { %8553 = vmatmul.mubr.msk.bf16.gmra.mrb[60].mxu0 %vm285_vm0, %v11521_v28 }
  0xa8   :  { %550 = vmatprep.mubr.bf16.mxu0 %v13967_v0 }
  0xaa   :  { %9518 = vmatmul.mubr.msk.bf16.gmra.mrb[12].mxu1 %vm285_vm0, %v11432_v15  ;;  %v11200_v15 = vld [vmem:[%s13952_s0 + $0x50] sm:$0xff]  }
  0xab   :  { %9521 = vmatprep.mubr.msk.bf16.mxu1 %vm285_vm0, %v11450_v19  ;;  %v11928_v19 = vld [vmem:[%s13952_s0 + $0xc8] sm:$0xff]  }
  0xaf   :  { %8554 = vmatmul.mubr.msk.bf16.gmra.mrb[64].mxu0 %vm285_vm0, %v11528_v29 }
  0xb0   :  { %560 = vmatprep.mubr.bf16.mxu0 %v13967_v0 }
  0xb2   :  { %9522 = vmatmul.mubr.msk.bf16.gmra.mrb[16].mxu1 %vm285_vm0, %v11460_v21  ;;  %v11202_v21 = vld [vmem:[%s13952_s0 + $0x60] sm:$0xff]  }
  0xb3   :  { %9525 = vmatprep.mubr.msk.bf16.mxu1 %vm285_vm0, %v11470_v22  ;;  %v11947_v22 = vld [vmem:[%s13952_s0 + $0x20] sm:$0xff]  }
  0xb7   :  { %8555 = vmatmul.mubr.msk.bf16.gmra.mrb[68].mxu0 %vm285_vm0, %v11543_v31 }
  0xb8   :  { %570 = vmatprep.mubr.bf16.mxu0 %v13967_v0 }
  0xba   :  { %9526 = vmatmul.mubr.msk.bf16.gmra.mrb[20].mxu1 %vm285_vm0, %v11477_v23  ;;  %v11952_v23 = vld [vmem:[%s13952_s0 + $0x28] sm:$0xff]  }
  0xbb   :  { %9529 = vmatprep.mubr.msk.bf16.mxu1 %vm285_vm0, %v11487_v24  ;;  %v10685_v24 = vld [vmem:[%s13953_s1 + $0xe0] ss:$12 sps:$4 sm:$0xff]  }
  0xbf   :  { %8556 = vmatmul.mubr.msk.bf16.gmra.mrb[72].mxu0 %vm285_vm0, %v11552_v33 }
  0xc0   :  { %580 = vmatprep.mubr.bf16.mxu0 %v13967_v0 }
  0xc2   :  { %9530 = vmatmul.mubr.msk.bf16.gmra.mrb[24].mxu1 %vm285_vm0, %v11494_v25  ;;  %v11203_v25 = vld [vmem:[%s13952_s0 + $0x68] sm:$0xff]  }
  0xc3   :  { %9533 = vmatprep.mubr.msk.bf16.mxu1 %vm285_vm0, %v11504_v26  ;;  %v11969_v26 = vld [vmem:[%s13952_s0 + $0x30] sm:$0xff]  }
  0xc7   :  { %8557 = vmatmul.mubr.msk.bf16.gmra.mrb[76].mxu0 %vm285_vm0, %v11561_v34 }
  0xc8   :  { %590 = vmatprep.mubr.bf16.mxu0 %v13967_v0 }
  0xca   :  { %9534 = vmatmul.mubr.msk.bf16.gmra.mrb[28].mxu1 %vm285_vm0, %v11511_v27  ;;  %v11974_v27 = vld [vmem:[%s13952_s0 + $0x38] sm:$0xff]  }
  0xcb   :  { %9537 = vmatprep.mubr.msk.bf16.mxu1 %vm285_vm0, %v11521_v28  ;;  %v11204_v28 = vld [vmem:[%s13952_s0 + $0x70] sm:$0xff]  }
  0xcf   :  { %8558 = vmatmul.mubr.msk.bf16.gmra.mrb[80].mxu0 %vm285_vm0, %v11568_v35 }
  0xd0   :  { %600 = vmatprep.mubr.bf16.mxu0 %v13967_v0 }
  0xd2   :  { %9538 = vmatmul.mubr.msk.bf16.gmra.mrb[32].mxu1 %vm285_vm0, %v11528_v29  ;;  %v11988_v29 = vld [vmem:[%s13952_s0 + $0x40] sm:$0xff]  }
  0xd3   :  { %9541 = vmatprep.mubr.msk.bf16.mxu1 %vm285_vm0, %v11543_v31  ;;  %v11205_v31 = vld [vmem:[%s13952_s0 + $0x78] sm:$0xff]  }
  0xd7   :  { %8559 = vmatmul.mubr.msk.bf16.gmra.mrb[84].mxu0 %vm285_vm0, %v10614_v36 }
  0xd8   :  { %610 = vmatprep.mubr.bf16.mxu0 %v13967_v0 }
  0xda   :  { %9542 = vmatmul.mubr.msk.bf16.gmra.mrb[36].mxu1 %vm285_vm0, %v11552_v33  ;;  %v12012_v33 = vld [vmem:[%s13952_s0 + $0x58] sm:$0xff]  }
  0xdb   :  { %9545 = vmatprep.mubr.msk.bf16.mxu1 %vm285_vm0, %v11561_v34  ;;  %v11206_v34 = vld [vmem:[%s13952_s0 + $0x80] sm:$0xff]  }
  0xdf   :  { %8560 = vmatmul.mubr.msk.bf16.gmra.mrb[88].mxu0 %vm285_vm0, %v11583_v37 }
  0xe0   :  { %620 = vmatprep.mubr.bf16.mxu0 %v13967_v0 }
  0xe2   :  { %9546 = vmatmul.mubr.msk.bf16.gmra.mrb[40].mxu1 %vm285_vm0, %v11568_v35  ;;  %v12026_v35 = vld [vmem:[%s13952_s0 + $0x60] sm:$0xff]  }
  0xe3   :  { %9549 = vmatprep.mubr.msk.bf16.mxu1 %vm285_vm0, %v10614_v36  ;;  %v12031_v36 = vld [vmem:[%s13952_s0 + $0x68] sm:$0xff]  }
  0xe7   :  { %8561 = vmatmul.mubr.msk.bf16.gmra.mrb[92].mxu0 %vm285_vm0, %v10619_v38  ;;  %v12045_v38 = vld [vmem:[%s13952_s0 + $0x70] sm:$0xff]  }
  0xe8   :  { %928 = vmatprep.mubr.bf16.mxu0 %v13967_v0 }
  0xea   :  { %9550 = vmatmul.mubr.msk.bf16.gmra.mrb[44].mxu1 %vm285_vm0, %v11583_v37  ;;  %v11207_v37 = vld [vmem:[%s13952_s0 + $0x88] sm:$0xff]  }
  0xeb   :  { %9557 = vmatprep.mubr.msk.bf16.mxu1 %vm285_vm0, %v11688_v42 }
  0xef   :  { %8593 = vmatmul.mubr.msk.bf16.vlgmr.msra.gmra.mrb[0].mxu0 %vm285_vm0, %v11597_v39  ;;  %v12050_v39 = vld [vmem:[%s13952_s0 + $0x78] sm:$0xff]  }
  0xf0   :  { %1675 = vmatpush1.bf16.msra.mxu0 %v10623_v43  ;;  %938 = vmatprep.mubr.bf16.mxu0 %v13967_v0  ;;  %v12069_v43 = vld [vmem:[%s13952_s0 + $0x88] sm:$0xff]  }
  0xf1   :  { %1676 = vmatprep.subr.bf16.mxu0 %v10652_v44  ;;  %v11209_v44 = vld [vmem:[%s13952_s0 + $0x98] sm:$0xff]  }
  0xf2   :  { %9558 = vmatmul.mubr.msk.bf16.vlgmr.msra.gmra.mrb[0].mxu1 %vm285_vm0, %v11704_v45 }
  0xf3   :  { %9561 = vmatprep.mubr.msk.bf16.mxu1 %vm285_vm0, %v11714_v47  ;;  %9606 = vmatpush3.bf16.msra.mxu1 %v10655_v41  ;;  %v12064_v41 = vld [vmem:[%s13952_s0 + $0x80] sm:$0xff]  }
  0xf4   :  { %1677 = vmatpush1.bf16.msra.mxu0 %v10650_v46  ;;  %9607 = vmatprep.subr.bf16.mxu1 %v10656_v48  ;;  %v12083_v46 = vld [vmem:[%s13952_s0 + $0x90] sm:$0xff]  }
  0xf5   :  { %2596 = vmatprep.subr.bf16.mxu0 %v10681_v9  ;;  %v11213_v9 = vld [vmem:[%s13952_s0 + $0xb8] sm:$0xff]  }
  0xf7   :  { %8594 = vmatmul.mubr.msk.bf16.gmra.mrb[4].mxu0 %vm285_vm0, %v11191_v50  ;;  %9608 = vmatpush3.bf16.msra.mxu1 %v10656_v48  ;;  %v12088_v48 = vld [vmem:[%s13952_s0 + $0x98] sm:$0xff]   ;;  %v11210_v50 = vld [vmem:[%s13952_s0 + $0xa0] sm:$0xff]  }
  0xf8   :  { %948 = vmatprep.mubr.bf16.mxu0 %v13967_v0  ;;  %9657 = vmatprep.subr.bf16.mxu1 %v10684_v7 }
  0xfa   :  { %9562 = vmatmul.mubr.msk.bf16.gmra.mrb[4].mxu1 %vm285_vm0, %v11727_v49 }
  0xfb   :  { %9565 = vmatprep.mubr.msk.bf16.mxu1 %vm285_vm0, %v11736_v51 }
  0xff   :  { %8595 = vmatmul.mubr.msk.bf16.gmra.mrb[8].mxu0 %vm285_vm0, %v11192_v53  ;;  %v12102_v53 = vld [vmem:[%s13952_s0 + $0xa0] sm:$0xff]  }
 0x100   :  { %958 = vmatprep.mubr.bf16.mxu0 %v13967_v0 }
 0x102   :  { %9566 = vmatmul.mubr.msk.bf16.gmra.mrb[8].mxu1 %vm285_vm0, %v11746_v52 }
 0x103   :  { %9569 = vmatprep.mubr.msk.bf16.mxu1 %vm285_vm0, %v11755_v54 }
 0x107   :  { %8596 = vmatmul.mubr.msk.bf16.gmra.mrb[12].mxu0 %vm285_vm0, %v11193_v56  ;;  %v12107_v56 = vld [vmem:[%s13952_s0 + $0xa8] sm:$0xff]  }
 0x108   :  { %968 = vmatprep.mubr.bf16.mxu0 %v13967_v0 }
 0x10a   :  { %9570 = vmatmul.mubr.msk.bf16.gmra.mrb[12].mxu1 %vm285_vm0, %v11765_v55 }
 0x10b   :  { %9573 = vmatprep.mubr.msk.bf16.mxu1 %vm285_vm0, %v11774_v57 }
 0x10f   :  { %8597 = vmatmul.mubr.msk.bf16.gmra.mrb[16].mxu0 %vm285_vm0, %v11194_v59  ;;  %v11211_v59 = vld [vmem:[%s13952_s0 + $0xa8] sm:$0xff]  }
 0x110   :  { %978 = vmatprep.mubr.bf16.mxu0 %v13967_v0 }
 0x112   :  { %9574 = vmatmul.mubr.msk.bf16.gmra.mrb[16].mxu1 %vm285_vm0, %v11784_v58 }
 0x113   :  { %9577 = vmatprep.mubr.msk.bf16.mxu1 %vm285_vm0, %v11793_v60 }
 0x117   :  { %8598 = vmatmul.mubr.msk.bf16.gmra.mrb[20].mxu0 %vm285_vm0, %v11195_v61  ;;  %v12121_v61 = vld [vmem:[%s13952_s0 + $0xb0] sm:$0xff]  }
 0x118   :  { %988 = vmatprep.mubr.bf16.mxu0 %v13967_v0 }
 0x11a   :  { %9578 = vmatmul.mubr.msk.bf16.gmra.mrb[20].mxu1 %vm285_vm0, %v11808_v62 }
 0x11b   :  { %9581 = vmatprep.mubr.msk.bf16.mxu1 %vm285_vm0, %v11813_v63 }
 0x11f   :  { %8599 = vmatmul.mubr.msk.bf16.gmra.mrb[24].mxu0 %vm285_vm0, %v11196_v1  ;;  %v12126_v1 = vld [vmem:[%s13952_s0 + $0xb8] sm:$0xff]  }
 0x120   :  { %998 = vmatprep.mubr.bf16.mxu0 %v13967_v0 }
 0x122   :  { %9582 = vmatmul.mubr.msk.bf16.gmra.mrb[24].mxu1 %vm285_vm0, %v11827_v2 }
 0x123   :  { %9585 = vmatprep.mubr.msk.bf16.mxu1 %vm285_vm0, %v11832_v3 }
 0x127   :  { %8600 = vmatmul.mubr.msk.bf16.gmra.mrb[28].mxu0 %vm285_vm0, %v11197_v4  ;;  %v11212_v4 = vld [vmem:[%s13952_s0 + $0xb0] sm:$0xff]  }
 0x128   :  { %1008 = vmatprep.mubr.bf16.mxu0 %v13967_v0 }
 0x12a   :  { %9586 = vmatmul.mubr.msk.bf16.gmra.mrb[28].mxu1 %vm285_vm0, %v11846_v5 }
 0x12b   :  { %9589 = vmatprep.mubr.msk.bf16.mxu1 %vm285_vm0, %v11851_v6 }
 0x12f   :  { %8601 = vmatmul.mubr.msk.bf16.gmra.mrb[32].mxu0 %vm285_vm0, %v11198_v8  ;;  %v12145_v8 = vld [vmem:[%s13952_s0 + $0xc8] sm:$0xff]  }
 0x130   :  { %1018 = vmatprep.mubr.bf16.mxu0 %v13967_v0 }
 0x132   :  { %9590 = vmatmul.mubr.msk.bf16.gmra.mrb[32].mxu1 %vm285_vm0, %v11871_v10 }
 0x133   :  { %9593 = vmatprep.mubr.msk.bf16.mxu1 %vm285_vm0, %v11876_v11 }
 0x137   :  { %8602 = vmatmul.mubr.msk.bf16.gmra.mrb[36].mxu0 %vm285_vm0, %v11199_v12  ;;  %v12159_v12 = vld [vmem:[%s13952_s0 + $0xd0] sm:$0xff]  }
 0x138   :  { %1028 = vmatprep.mubr.bf16.mxu0 %v13967_v0 }
 0x13a   :  { %9594 = vmatmul.mubr.msk.bf16.gmra.mrb[36].mxu1 %vm285_vm0, %v11890_v13 }
 0x13b   :  { %9597 = vmatprep.mubr.msk.bf16.mxu1 %vm285_vm0, %v11895_v14 }
 0x13f   :  { %8603 = vmatmul.mubr.msk.bf16.gmra.mrb[40].mxu0 %vm285_vm0, %v11200_v15  ;;  %v12164_v15 = vld [vmem:[%s13952_s0 + $0x20] sm:$0xff]  }
 0x140   :  { %1038 = vmatprep.mubr.bf16.mxu0 %v13967_v0 }
 0x142   :  { %9598 = vmatmul.mubr.msk.bf16.gmra.mrb[40].mxu1 %vm285_vm0, %v11909_v16 }
 0x143   :  { %9601 = vmatprep.mubr.msk.bf16.mxu1 %vm285_vm0, %v11914_v17 }
 0x147   :  { %8604 = vmatmul.mubr.msk.bf16.gmra.mrb[44].mxu0 %vm285_vm0, %v11201_v18  ;;  %v10679_v18 = vld [vmem:[%s13953_s1 + $0x90] ss:$12 sps:$4 sm:$0xff]  }
 0x148   :  { %1048 = vmatprep.mubr.bf16.mxu0 %v13967_v0 }
 0x14a   :  { %9602 = vmatmul.mubr.msk.bf16.gmra.mrb[44].mxu1 %vm285_vm0, %v11928_v19 }
 0x14b   :  { %9609 = vmatprep.mubr.msk.bf16.mxu1 %vm285_vm0, %v11933_v20 }
 0x14f   :  { %8605 = vmatmul.mubr.msk.bf16.gmra.mrb[48].mxu0 %vm285_vm0, %v11202_v21  ;;  %v10710_v21 = vld [vmem:[%s13953_s1 + $0xac] ss:$12 sps:$4 sm:$0xff]  }
 0x150   :  { %1058 = vmatprep.mubr.bf16.mxu0 %v13967_v0 }
 0x152   :  { %9610 = vmatmul.mubr.msk.bf16.vlgmr.msra.gmra.mrb[0].mxu1 %vm285_vm0, %v11947_v22 }
 0x153   :  { %9613 = vmatprep.mubr.msk.bf16.mxu1 %vm285_vm0, %v11952_v23  ;;  %9658 = vmatpush3.bf16.msra.mxu1 %v10684_v7  ;;  %v12140_v7 = vld [vmem:[%s13952_s0 + $0xc0] sm:$0xff]  }
 0x154   :  { %9659 = vmatprep.subr.bf16.mxu1 %v10685_v24 }
 0x157   :  { %8606 = vmatmul.mubr.msk.bf16.gmra.mrb[52].mxu0 %vm285_vm0, %v11203_v25  ;;  %9660 = vmatpush3.bf16.msra.mxu1 %v10685_v24  ;;  %v12182_v24 = vld [vmem:[%s13952_s0 + $0x28] sm:$0xff]  }
 0x158   :  { %1068 = vmatprep.mubr.bf16.mxu0 %v13967_v0  ;;  %v10708_v25 = vld [vmem:[%s13953_s1 + $0xa8] ss:$12 sps:$4 sm:$0xff]  }
 0x15a   :  { %9614 = vmatmul.mubr.msk.bf16.gmra.mrb[4].mxu1 %vm285_vm0, %v11969_v26 }
 0x15b   :  { %9617 = vmatprep.mubr.msk.bf16.mxu1 %vm285_vm0, %v11974_v27 }
 0x15f   :  { %8607 = vmatmul.mubr.msk.bf16.gmra.mrb[56].mxu0 %vm285_vm0, %v11204_v28  ;;  %v12190_v28 = vld [vmem:[%s13952_s0 + $0x30] sm:$0xff]  }
 0x160   :  { %1078 = vmatprep.mubr.bf16.mxu0 %v13967_v0 }
 0x162   :  { %9618 = vmatmul.mubr.msk.bf16.gmra.mrb[8].mxu1 %vm285_vm0, %v11988_v29 }
 0x163   :  { %9621 = vmatprep.mubr.msk.bf16.mxu1 %vm285_vm0, %v11993_v30 }
 0x167   :  { %8608 = vmatmul.mubr.msk.bf16.gmra.mrb[60].mxu0 %vm285_vm0, %v11205_v31  ;;  %v12207_v31 = vld [vmem:[%s13952_s0 + $0x40] sm:$0xff]  }
 0x168   :  { %1088 = vmatprep.mubr.bf16.mxu0 %v13967_v0 }
 0x16a   :  { %9622 = vmatmul.mubr.msk.bf16.gmra.mrb[12].mxu1 %vm285_vm0, %v12007_v32 }
 0x16b   :  { %9625 = vmatprep.mubr.msk.bf16.mxu1 %vm285_vm0, %v12012_v33 }
 0x16f   :  { %8609 = vmatmul.mubr.msk.bf16.gmra.mrb[64].mxu0 %vm285_vm0, %v11206_v34  ;;  %v12224_v34 = vld [vmem:[%s13952_s0 + $0x50] sm:$0xff]  }
 0x170   :  { %1098 = vmatprep.mubr.bf16.mxu0 %v13967_v0 }
 0x172   :  { %9626 = vmatmul.mubr.msk.bf16.gmra.mrb[16].mxu1 %vm285_vm0, %v12026_v35 }
 0x173   :  { %9629 = vmatprep.mubr.msk.bf16.mxu1 %vm285_vm0, %v12031_v36 }
 0x177   :  { %8610 = vmatmul.mubr.msk.bf16.gmra.mrb[68].mxu0 %vm285_vm0, %v11207_v37  ;;  %v12241_v37 = vld [vmem:[%s13952_s0 + $0x60] sm:$0xff]  }
 0x178   :  { %1108 = vmatprep.mubr.bf16.mxu0 %v13967_v0 }
 0x17a   :  { %9630 = vmatmul.mubr.msk.bf16.gmra.mrb[20].mxu1 %vm285_vm0, %v12045_v38 }
 0x17b   :  { %9633 = vmatprep.mubr.msk.bf16.mxu1 %vm285_vm0, %v12050_v39 }
 0x17f   :  { %8611 = vmatmul.mubr.msk.bf16.gmra.mrb[72].mxu0 %vm285_vm0, %v11208_v40  ;;  %v12258_v40 = vld [vmem:[%s13952_s0 + $0x70] sm:$0xff]  }
 0x180   :  { %1118 = vmatprep.mubr.bf16.mxu0 %v13967_v0 }
 0x182   :  { %9634 = vmatmul.mubr.msk.bf16.gmra.mrb[24].mxu1 %vm285_vm0, %v12064_v41 }
 0x183   :  { %9637 = vmatprep.mubr.msk.bf16.mxu1 %vm285_vm0, %v12069_v43 }
 0x187   :  { %8612 = vmatmul.mubr.msk.bf16.gmra.mrb[76].mxu0 %vm285_vm0, %v11209_v44  ;;  %v12275_v44 = vld [vmem:[%s13952_s0 + $0x80] sm:$0xff]  }
 0x188   :  { %1128 = vmatprep.mubr.bf16.mxu0 %v13967_v0 }
 0x18a   :  { %9638 = vmatmul.mubr.msk.bf16.gmra.mrb[28].mxu1 %vm285_vm0, %v12083_v46 }
 0x18b   :  { %9641 = vmatprep.mubr.msk.bf16.mxu1 %vm285_vm0, %v12088_v48 }
 0x18f   :  { %8613 = vmatmul.mubr.msk.bf16.gmra.mrb[80].mxu0 %vm285_vm0, %v11210_v50  ;;  %v12292_v50 = vld [vmem:[%s13952_s0 + $0x90] sm:$0xff]  }
 0x190   :  { %1138 = vmatprep.mubr.bf16.mxu0 %v13967_v0 }
 0x192   :  { %9642 = vmatmul.mubr.msk.bf16.gmra.mrb[32].mxu1 %vm285_vm0, %v12102_v53 }
 0x193   :  { %9645 = vmatprep.mubr.msk.bf16.mxu1 %vm285_vm0, %v12107_v56 }
 0x197   :  { %8614 = vmatmul.mubr.msk.bf16.gmra.mrb[84].mxu0 %vm285_vm0, %v11211_v59  ;;  %v12309_v59 = vld [vmem:[%s13952_s0 + $0xa0] sm:$0xff]  }
 0x198   :  { %1148 = vmatprep.mubr.bf16.mxu0 %v13967_v0 }
 0x19a   :  { %9646 = vmatmul.mubr.msk.bf16.gmra.mrb[36].mxu1 %vm285_vm0, %v12121_v61 }
 0x19b   :  { %9649 = vmatprep.mubr.msk.bf16.mxu1 %vm285_vm0, %v12126_v1 }
 0x19f   :  { %8615 = vmatmul.mubr.msk.bf16.gmra.mrb[88].mxu0 %vm285_vm0, %v11212_v4  ;;  %v12324_v4 = vld [vmem:[%s13952_s0 + $0xa8] sm:$0xff]  }
 0x1a0   :  { %1158 = vmatprep.mubr.bf16.mxu0 %v13967_v0 }
 0x1a2   :  { %9650 = vmatmul.mubr.msk.bf16.gmra.mrb[40].mxu1 %vm285_vm0, %v12140_v7 }
 0x1a3   :  { %9653 = vmatprep.mubr.msk.bf16.mxu1 %vm285_vm0, %v12145_v8 }
 0x1a7   :  { %8616 = vmatmul.mubr.msk.bf16.gmra.mrb[92].mxu0 %vm285_vm0, %v11213_v9  ;;  %v12329_v9 = vld [vmem:[%s13952_s0 + $0xb0] sm:$0xff]  }
 0x1a8   :  { %1706 = vmatprep.mubr.bf16.mxu0 %v13967_v0 }
 0x1aa   :  { %9654 = vmatmul.mubr.msk.bf16.gmra.mrb[44].mxu1 %vm285_vm0, %v12159_v12 }
 0x1ab   :  { %9661 = vmatprep.mubr.msk.bf16.mxu1 %vm285_vm0, %v12164_v15 }
 0x1af   :  { %8671 = vmatmul.mubr.msk.bf16.vlgmr.msra.gmra.mrb[0].mxu0 %vm285_vm0, %v11688_v42  ;;  %v12202_v42 = vld [vmem:[%s13952_s0 + $0x38] sm:$0xff]  }
 0x1b0   :  { %2597 = vmatpush1.bf16.msra.mxu0 %v10679_v18  ;;  %1716 = vmatprep.mubr.bf16.mxu0 %v13967_v0  ;;  %v12346_v18 = vld [vmem:[%s13952_s0 + $0xc0] sm:$0xff]  }
 0x1b1   :  { %2598 = vmatprep.subr.bf16.mxu0 %v10710_v21  ;;  %v12363_v21 = vld [vmem:[%s13952_s0 + $0xd0] sm:$0xff]  }
 0x1b2   :  { %9662 = vmatmul.mubr.msk.bf16.vlgmr.msra.gmra.mrb[0].mxu1 %vm285_vm0, %v12182_v24 }
 0x1b3   :  { %9665 = vmatprep.mubr.msk.bf16.mxu1 %vm285_vm0, %v12190_v28 }
 0x1b4   :  { %2599 = vmatpush1.bf16.msra.mxu0 %v10708_v25 }
 0x1b7   :  { %8672 = vmatmul.mubr.msk.bf16.gmra.mrb[4].mxu0 %vm285_vm0, %v11704_v45  ;;  %v12219_v45 = vld [vmem:[%s13952_s0 + $0x48] sm:$0xff]  }
 0x1b8   :  { %1726 = vmatprep.mubr.bf16.mxu0 %v13967_v0 }
 0x1ba   :  { %9666 = vmatmul.mubr.msk.bf16.gmra.mrb[4].mxu1 %vm285_vm0, %v12202_v42 }
 0x1bb   :  { %9669 = vmatprep.mubr.msk.bf16.mxu1 %vm285_vm0, %v12207_v31 }
 0x1bf   :  { %8673 = vmatmul.mubr.msk.bf16.gmra.mrb[8].mxu0 %vm285_vm0, %v11714_v47  ;;  %v12236_v47 = vld [vmem:[%s13952_s0 + $0x58] sm:$0xff]  }
 0x1c0   :  { %1736 = vmatprep.mubr.bf16.mxu0 %v13967_v0 }
 0x1c2   :  { %9670 = vmatmul.mubr.msk.bf16.gmra.mrb[8].mxu1 %vm285_vm0, %v12219_v45 }
 0x1c3   :  { %9673 = vmatprep.mubr.msk.bf16.mxu1 %vm285_vm0, %v12224_v34 }
 0x1c7   :  { %8674 = vmatmul.mubr.msk.bf16.gmra.mrb[12].mxu0 %vm285_vm0, %v11727_v49  ;;  %v12253_v49 = vld [vmem:[%s13952_s0 + $0x68] sm:$0xff]  }
 0x1c8   :  { %1746 = vmatprep.mubr.bf16.mxu0 %v13967_v0 }
 0x1ca   :  { %9674 = vmatmul.mubr.msk.bf16.gmra.mrb[12].mxu1 %vm285_vm0, %v12236_v47 }
 0x1cb   :  { %9677 = vmatprep.mubr.msk.bf16.mxu1 %vm285_vm0, %v12241_v37 }
 0x1cf   :  { %8675 = vmatmul.mubr.msk.bf16.gmra.mrb[16].mxu0 %vm285_vm0, %v11736_v51  ;;  %v12270_v51 = vld [vmem:[%s13952_s0 + $0x78] sm:$0xff]  }
 0x1d0   :  { %1756 = vmatprep.mubr.bf16.mxu0 %v13967_v0 }
 0x1d2   :  { %9678 = vmatmul.mubr.msk.bf16.gmra.mrb[16].mxu1 %vm285_vm0, %v12253_v49 }
 0x1d3   :  { %9681 = vmatprep.mubr.msk.bf16.mxu1 %vm285_vm0, %v12258_v40 }
 0x1d7   :  { %8676 = vmatmul.mubr.msk.bf16.gmra.mrb[20].mxu0 %vm285_vm0, %v11746_v52  ;;  %v12287_v52 = vld [vmem:[%s13952_s0 + $0x88] sm:$0xff]  }
 0x1d8   :  { %1766 = vmatprep.mubr.bf16.mxu0 %v13967_v0 }
 0x1da   :  { %9682 = vmatmul.mubr.msk.bf16.gmra.mrb[20].mxu1 %vm285_vm0, %v12270_v51 }
 0x1db   :  { %9685 = vmatprep.mubr.msk.bf16.mxu1 %vm285_vm0, %v12275_v44 }
 0x1df   :  { %8677 = vmatmul.mubr.msk.bf16.gmra.mrb[24].mxu0 %vm285_vm0, %v11755_v54  ;;  %v12304_v54 = vld [vmem:[%s13952_s0 + $0x98] sm:$0xff]  }
 0x1e0   :  { %1776 = vmatprep.mubr.bf16.mxu0 %v13967_v0 }
 0x1e2   :  { %9686 = vmatmul.mubr.msk.bf16.gmra.mrb[24].mxu1 %vm285_vm0, %v12287_v52 }
 0x1e3   :  { %9689 = vmatprep.mubr.msk.bf16.mxu1 %vm285_vm0, %v12292_v50 }
 0x1e7   :  { %8678 = vmatmul.mubr.msk.bf16.gmra.mrb[28].mxu0 %vm285_vm0, %v11765_v55  ;;  %v10715_v55 = vld [vmem:[%s13953_s1 + $0xc4] ss:$12 sps:$4 sm:$0xff]  }
 0x1e8   :  { %1786 = vmatprep.mubr.bf16.mxu0 %v13967_v0  ;;  %3518 = vmatprep.subr.bf16.mxu0 %v10715_v55 }
 0x1ea   :  { %9690 = vmatmul.mubr.msk.bf16.gmra.mrb[28].mxu1 %vm285_vm0, %v12304_v54 }
 0x1eb   :  { %9693 = vmatprep.mubr.msk.bf16.mxu1 %vm285_vm0, %v12309_v59 }
 0x1ef   :  { %8679 = vmatmul.mubr.msk.bf16.gmra.mrb[32].mxu0 %vm285_vm0, %v11774_v57  ;;  %v12341_v57 = vld [vmem:[%s13952_s0 + $0xb8] sm:$0xff]  }
 0x1f0   :  { %1796 = vmatprep.mubr.bf16.mxu0 %v13967_v0 }
 0x1f2   :  { %9694 = vmatmul.mubr.msk.bf16.gmra.mrb[32].mxu1 %vm285_vm0, %v12324_v4 }
 0x1f3   :  { %9697 = vmatprep.mubr.msk.bf16.mxu1 %vm285_vm0, %v12329_v9 }
 0x1f7   :  { %8680 = vmatmul.mubr.msk.bf16.gmra.mrb[36].mxu0 %vm285_vm0, %v11784_v58  ;;  %v12358_v58 = vld [vmem:[%s13952_s0 + $0xc8] sm:$0xff]  }
 0x1f8   :  { %1806 = vmatprep.mubr.bf16.mxu0 %v13967_v0 }
 0x1fa   :  { %9698 = vmatmul.mubr.msk.bf16.gmra.mrb[36].mxu1 %vm285_vm0, %v12341_v57 }
 0x1fb   :  { %9701 = vmatprep.mubr.msk.bf16.mxu1 %vm285_vm0, %v12346_v18 }
 0x1ff   :  { %8681 = vmatmul.mubr.msk.bf16.gmra.mrb[40].mxu0 %vm285_vm0, %v11793_v60  ;;  %v12375_v60 = vld [vmem:[%s13952_s0 + $0xd8] sm:$0xff]  }
 0x200   :  { %1816 = vmatprep.mubr.bf16.mxu0 %v13967_v0 }
 0x202   :  { %9702 = vmatmul.mubr.msk.bf16.gmra.mrb[40].mxu1 %vm285_vm0, %v12358_v58 }
 0x203   :  { %9705 = vmatprep.mubr.msk.bf16.mxu1 %vm285_vm0, %v12363_v21 }
 0x207   :  { %8682 = vmatmul.mubr.msk.bf16.gmra.mrb[44].mxu0 %vm285_vm0, %v11808_v62  ;;  %v10713_v62 = vld [vmem:[%s13953_s1 + $0xc0] ss:$12 sps:$4 sm:$0xff]  }
 0x208   :  { %1826 = vmatprep.mubr.bf16.mxu0 %v13967_v0 }
 0x20a   :  { %9706 = vmatmul.mubr.msk.bf16.gmra.mrb[44].mxu1 %vm285_vm0, %v12375_v60 }
 0x20f   :  { %8683 = vmatmul.mubr.msk.bf16.gmra.mrb[48].mxu0 %vm285_vm0, %v11813_v63  ;;  %v10718_v63 = vld [vmem:[%s13953_s1 + $0xdc] ss:$12 sps:$4 sm:$0xff]  }
 0x210   :  { %1836 = vmatprep.mubr.bf16.mxu0 %v13967_v0 }
 0x217   :  { %8684 = vmatmul.mubr.msk.bf16.gmra.mrb[52].mxu0 %vm285_vm0, %v11827_v2  ;;  %v10716_v2 = vld [vmem:[%s13953_s1 + $0xd8] ss:$12 sps:$4 sm:$0xff]   ;;  %s11269_s1 = smov 112  }
 0x218   :  { %1846 = vmatprep.mubr.bf16.mxu0 %v13967_v0 }
 0x21f   :  { %8685 = vmatmul.mubr.msk.bf16.gmra.mrb[56].mxu0 %vm285_vm0, %v11832_v3 }
 0x220   :  { %1856 = vmatprep.mubr.bf16.mxu0 %v13967_v0 }
 0x227   :  { %8686 = vmatmul.mubr.msk.bf16.gmra.mrb[60].mxu0 %vm285_vm0, %v11846_v5 }
 0x228   :  { %1866 = vmatprep.mubr.bf16.mxu0 %v13967_v0 }
 0x22f   :  { %8687 = vmatmul.mubr.msk.bf16.gmra.mrb[64].mxu0 %vm285_vm0, %v11851_v6 }
 0x230   :  { %1876 = vmatprep.mubr.bf16.mxu0 %v13967_v0 }
 0x237   :  { %8688 = vmatmul.mubr.msk.bf16.gmra.mrb[68].mxu0 %vm285_vm0, %v11871_v10 }
 0x238   :  { %1886 = vmatprep.mubr.bf16.mxu0 %v13967_v0 }
 0x23f   :  { %8689 = vmatmul.mubr.msk.bf16.gmra.mrb[72].mxu0 %vm285_vm0, %v11876_v11 }
 0x240   :  { %1896 = vmatprep.mubr.bf16.mxu0 %v13967_v0 }
 0x247   :  { %8690 = vmatmul.mubr.msk.bf16.gmra.mrb[76].mxu0 %vm285_vm0, %v11890_v13 }
 0x248   :  { %1906 = vmatprep.mubr.bf16.mxu0 %v13967_v0 }
 0x24f   :  { %8691 = vmatmul.mubr.msk.bf16.gmra.mrb[80].mxu0 %vm285_vm0, %v11895_v14 }
 0x250   :  { %1916 = vmatprep.mubr.bf16.mxu0 %v13967_v0 }
 0x257   :  { %8692 = vmatmul.mubr.msk.bf16.gmra.mrb[84].mxu0 %vm285_vm0, %v11909_v16 }
 0x258   :  { %1926 = vmatprep.mubr.bf16.mxu0 %v13967_v0 }
 0x25f   :  { %8693 = vmatmul.mubr.msk.bf16.gmra.mrb[88].mxu0 %vm285_vm0, %v11914_v17 }
 0x260   :  { %1936 = vmatprep.mubr.bf16.mxu0 %v13967_v0 }
 0x267   :  { %8694 = vmatmul.mubr.msk.bf16.gmra.mrb[92].mxu0 %vm285_vm0, %v11928_v19 }
 0x268   :  { %2628 = vmatprep.mubr.bf16.mxu0 %v13967_v0 }
 0x26f   :  { %8749 = vmatmul.mubr.msk.bf16.vlgmr.msra.gmra.mrb[0].mxu0 %vm285_vm0, %v11933_v20 }
 0x270   :  { %3519 = vmatpush1.bf16.msra.mxu0 %v10713_v62  ;;  %2638 = vmatprep.mubr.bf16.mxu0 %v13967_v0 }
 0x271   :  { %3520 = vmatprep.subr.bf16.mxu0 %v10718_v63 }
 0x274   :  { %3521 = vmatpush1.bf16.msra.mxu0 %v10716_v2 }
 0x277   :  { %8750 = vmatmul.mubr.msk.bf16.gmra.mrb[4].mxu0 %vm285_vm0, %v11947_v22 }
 0x278   :  { %2648 = vmatprep.mubr.bf16.mxu0 %v13967_v0 }
 0x27f   :  { %8751 = vmatmul.mubr.msk.bf16.gmra.mrb[8].mxu0 %vm285_vm0, %v11952_v23 }
 0x280   :  { %2658 = vmatprep.mubr.bf16.mxu0 %v13967_v0 }
 0x285   :  { %v9663_v3 = vpop.f32.mrb[0].mxu1 }
 0x286   :  { %v3825_v5 = vpop.f32.mrb[1].mxu1 }
 0x287   :  { %8752 = vmatmul.mubr.msk.bf16.gmra.mrb[12].mxu0 %vm285_vm0, %v11969_v26  ;;  %v12436_v6 = vmax.f32 %v3825_v5, %v9663_v3  ;;  %v9664_v10 = vpop.f32.mrb[2].mxu1 }
 0x288   :  { %2668 = vmatprep.mubr.bf16.mxu0 %v13967_v0  ;;  %v3828_v11 = vpop.f32.mrb[3].mxu1 }
 0x289   :  { %v12438_v13 = vmax.f32 %v3828_v11, %v9664_v10 }
 0x28d   :  { %v9667_v14 = vpop.f32.mrb[4].mxu1 }
 0x28e   :  { %v3841_v16 = vpop.f32.mrb[5].mxu1 }
 0x28f   :  { %8753 = vmatmul.mubr.msk.bf16.gmra.mrb[16].mxu0 %vm285_vm0, %v11974_v27  ;;  %v12443_v17 = vmax.f32 %v3841_v16, %v9667_v14  ;;  %v9668_v19 = vpop.f32.mrb[6].mxu1 }
 0x290   :  { %2678 = vmatprep.mubr.bf16.mxu0 %v13967_v0  ;;  %v3844_v20 = vpop.f32.mrb[7].mxu1 }
 0x291   :  { %4332 = vrot.lane.b32.xlu1 %v12443_v17, %s11269_s1  ;;  %v12447_v22 = vmax.f32 %v3844_v20, %v9668_v19 }
 0x295   :  { %4334 = vrot.lane.b32.xlu1 %v12447_v22, %s11269_s1  ;;  %v9671_v23 = vpop.f32.mrb[8].mxu1 }
 0x296   :  { %v3857_v26 = vpop.f32.mrb[9].mxu1 }
 0x297   :  { %8754 = vmatmul.mubr.msk.bf16.gmra.mrb[20].mxu0 %vm285_vm0, %v11988_v29  ;;  %v12454_v27 = vmax.f32 %v3857_v26, %v9671_v23  ;;  %v9672_v25 = vpop.f32.mrb[10].mxu1 }
 0x298   :  { %2688 = vmatprep.mubr.bf16.mxu0 %v13967_v0  ;;  %v3860_v55 = vpop.f32.mrb[11].mxu1 }
 0x299   :  { %v12456_v62 = vmax.f32 %v3860_v55, %v9672_v25  ;;  %4336 = vrot.lane.b32.xlu0 %v12454_v27, %s11269_s1 }
 0x29b   :  { %4338 = vrot.lane.b32.xlu1 %v12456_v62, %s11269_s1 }
 0x29d   :  { %v9675_v29 = vpop.f32.mrb[12].mxu1 }
 0x29e   :  { %v3873_v63 = vpop.f32.mrb[13].mxu1 }
 0x29f   :  { %8755 = vmatmul.mubr.msk.bf16.gmra.mrb[24].mxu0 %vm285_vm0, %v11993_v30  ;;  %v12465_v2 = vmax.f32 %v3873_v63, %v9675_v29  ;;  %v9676_v3 = vpop.f32.mrb[14].mxu1 }
 0x2a0   :  { %2698 = vmatprep.mubr.bf16.mxu0 %v13967_v0  ;;  %v3876_v5 = vpop.f32.mrb[15].mxu1 }
 0x2a1   :  { %v12467_v10 = vmax.f32 %v3876_v5, %v9676_v3  ;;  %4340 = vrot.lane.b32.xlu0 %v12465_v2, %s11269_s1 }
 0x2a3   :  { %4342 = vrot.lane.b32.xlu1 %v12467_v10, %s11269_s1 }
 0x2a5   :  { %v9679_v30 = vpop.f32.mrb[16].mxu1 }
 0x2a6   :  { %v3889_v11 = vpop.f32.mrb[17].mxu1 }
 0x2a7   :  { %8756 = vmatmul.mubr.msk.bf16.gmra.mrb[28].mxu0 %vm285_vm0, %v12007_v32  ;;  %v12476_v14 = vmax.f32 %v3889_v11, %v9679_v30  ;;  %v9680_v16 = vpop.f32.mrb[18].mxu1 }
 0x2a8   :  { %2708 = vmatprep.mubr.bf16.mxu0 %v13967_v0  ;;  %v3892_v19 = vpop.f32.mrb[19].mxu1 }
 0x2a9   :  { %v12478_v20 = vmax.f32 %v3892_v19, %v9680_v16  ;;  %4344 = vrot.lane.b32.xlu0 %v12476_v14, %s11269_s1 }
 0x2ab   :  { %4346 = vrot.lane.b32.xlu1 %v12478_v20, %s11269_s1 }
 0x2ad   :  { %v9683_v32 = vpop.f32.mrb[20].mxu1 }
 0x2ae   :  { %v3905_v23 = vpop.f32.mrb[21].mxu1 }
 0x2af   :  { %8757 = vmatmul.mubr.msk.bf16.gmra.mrb[32].mxu0 %vm285_vm0, %v12012_v33  ;;  %v12487_v26 = vmax.f32 %v3905_v23, %v9683_v32  ;;  %v9684_v25 = vpop.f32.mrb[22].mxu1 }
 0x2b0   :  { %2718 = vmatprep.mubr.bf16.mxu0 %v13967_v0  ;;  %v3908_v55 = vpop.f32.mrb[23].mxu1 }
 0x2b1   :  { %14025 = vst [vmem:[#allocation8_spill] sm:$0xff] %v12487_v26  ;;  %v12489_v29 = vmax.f32 %v3908_v55, %v9684_v25  ;;  %4348 = vrot.lane.b32.xlu0 %v12487_v26, %s11269_s1 }
 0x2b3   :  { %14026 = vst [vmem:[#allocation9_spill] sm:$0xff] %v12489_v29  ;;  %4350 = vrot.lane.b32.xlu1 %v12489_v29, %s11269_s1 }
 0x2b5   :  { %v9687_v33 = vpop.f32.mrb[24].mxu1 }
 0x2b6   :  { %v3921_v63 = vpop.f32.mrb[25].mxu1 }
 0x2b7   :  { %8758 = vmatmul.mubr.msk.bf16.gmra.mrb[36].mxu0 %vm285_vm0, %v12026_v35  ;;  %v12498_v3 = vmax.f32 %v3921_v63, %v9687_v33  ;;  %v9688_v5 = vpop.f32.mrb[26].mxu1 }
 0x2b8   :  { %2728 = vmatprep.mubr.bf16.mxu0 %v13967_v0  ;;  %v3924_v30 = vpop.f32.mrb[27].mxu1 }
 0x2b9   :  { %14027 = vst [vmem:[#allocation10_spill] sm:$0xff] %v12498_v3  ;;  %v12500_v11 = vmax.f32 %v3924_v30, %v9688_v5  ;;  %4352 = vrot.lane.b32.xlu0 %v12498_v3, %s11269_s1 }
 0x2bb   :  { %14028 = vst [vmem:[#allocation11_spill] sm:$0xff] %v12500_v11  ;;  %4354 = vrot.lane.b32.xlu1 %v12500_v11, %s11269_s1 }
 0x2bd   :  { %v9691_v35 = vpop.f32.mrb[28].mxu1 }
 0x2be   :  { %v3937_v16 = vpop.f32.mrb[29].mxu1 }
 0x2bf   :  { %8759 = vmatmul.mubr.msk.bf16.gmra.mrb[40].mxu0 %vm285_vm0, %v12031_v36  ;;  %v12509_v19 = vmax.f32 %v3937_v16, %v9691_v35  ;;  %v9692_v32 = vpop.f32.mrb[30].mxu1 }
 0x2c0   :  { %2738 = vmatprep.mubr.bf16.mxu0 %v13967_v0  ;;  %v3940_v23 = vpop.f32.mrb[31].mxu1 }
 0x2c1   :  { %14029 = vst [vmem:[#allocation12_spill] sm:$0xff] %v12509_v19  ;;  %v12511_v25 = vmax.f32 %v3940_v23, %v9692_v32  ;;  %4356 = vrot.lane.b32.xlu0 %v12509_v19, %s11269_s1 }
 0x2c3   :  { %14030 = vst [vmem:[#allocation13_spill] sm:$0xff] %v12511_v25  ;;  %4358 = vrot.lane.b32.xlu1 %v12511_v25, %s11269_s1 }
 0x2c5   :  { %v9695_v36 = vpop.f32.mrb[32].mxu1 }
 0x2c6   :  { %v3953_v55 = vpop.f32.mrb[33].mxu1 }
 0x2c7   :  { %8760 = vmatmul.mubr.msk.bf16.gmra.mrb[44].mxu0 %vm285_vm0, %v12045_v38  ;;  %v12520_v33 = vmax.f32 %v3953_v55, %v9695_v36  ;;  %v9696_v63 = vpop.f32.mrb[34].mxu1 }
 0x2c8   :  { %2748 = vmatprep.mubr.bf16.mxu0 %v13967_v0  ;;  %v3956_v5 = vpop.f32.mrb[35].mxu1 }
 0x2c9   :  { %14031 = vst [vmem:[#allocation14_spill] sm:$0xff] %v12520_v33  ;;  %v12522_v30 = vmax.f32 %v3956_v5, %v9696_v63 }
 0x2cb   :  { %14032 = vst [vmem:[#allocation15_spill] sm:$0xff] %v12522_v30 }
 0x2cd   :  { %v9699_v35 = vpop.f32.mrb[36].mxu1 }
 0x2ce   :  { %v3969_v16 = vpop.f32.mrb[37].mxu1 }
 0x2cf   :  { %8761 = vmatmul.mubr.msk.bf16.gmra.mrb[48].mxu0 %vm285_vm0, %v12050_v39  ;;  %v12527_v32 = vmax.f32 %v3969_v16, %v9699_v35  ;;  %v9700_v38 = vpop.f32.mrb[38].mxu1 }
 0x2d0   :  { %2758 = vmatprep.mubr.bf16.mxu0 %v13967_v0  ;;  %v3972_v23 = vpop.f32.mrb[39].mxu1 }
 0x2d1   :  { %v12529_v25 = vmax.f32 %v3972_v23, %v9700_v38 }
 0x2d5   :  { %v9703_v36 = vpop.f32.mrb[40].mxu1 }
 0x2d6   :  { %v3985_v55 = vpop.f32.mrb[41].mxu1 }
 0x2d7   :  { %8762 = vmatmul.mubr.msk.bf16.gmra.mrb[52].mxu0 %vm285_vm0, %v12064_v41  ;;  %v12534_v63 = vmax.f32 %v3985_v55, %v9703_v36  ;;  %v9704_v39 = vpop.f32.mrb[42].mxu1  ;;  %v10752_v55 = vld [vmem:[#allocation2 + $0x230] ss:$8 sps:$4 sm:$0xff]  }
 0x2d8   :  { %2768 = vmatprep.mubr.bf16.mxu0 %v13967_v0  ;;  %v3988_v5 = vpop.f32.mrb[43].mxu1 }
 0x2d9   :  { %v12536_v19 = vmax.f32 %v3988_v5, %v9704_v39 }
 0x2dd   :  { %v9707_v35 = vpop.f32.mrb[44].mxu1 }
 0x2de   :  { %v4001_v16 = vpop.f32.mrb[45].mxu1 }
 0x2df   :  { %8763 = vmatmul.mubr.msk.bf16.gmra.mrb[56].mxu0 %vm285_vm0, %v12069_v43  ;;  %v12541_v38 = vmax.f32 %v4001_v16, %v9707_v35  ;;  %v9708_v41 = vpop.f32.mrb[46].mxu1  ;;  %v10721_v43 = vld [vmem:[#allocation2 + $0x184] ss:$8 sps:$4 sm:$0xff]   ;;  %v12657_v35 = vld [vmem:[%s13954_s2] sm:$0x7] }
 0x2e0   :  { %2778 = vmatprep.mubr.bf16.mxu0 %v13967_v0  ;;  %v4004_v23 = vpop.f32.mrb[47].mxu1  ;;  %5056 = vmatprep.subr.bf16.mxu1 %v10721_v43  ;;  %v10755_v43 = vld [vmem:[#allocation2 + $0x240] ss:$8 sps:$4 sm:$0xff]  }
 0x2e1   :  { %v12543_v11 = vmax.f32 %v4004_v23, %v9708_v41  ;;  %v10757_v41 = vld [vmem:[#allocation2 + $0x244] ss:$8 sps:$4 sm:$0xff]  }
 0x2e7   :  { %8764 = vmatmul.mubr.msk.bf16.gmra.mrb[60].mxu0 %vm285_vm0, %v12083_v46  ;;  %v10719_v46 = vld [vmem:[#allocation2 + $0x180] ss:$8 sps:$4 sm:$0xff]  }
 0x2e8   :  { %2788 = vmatprep.mubr.bf16.mxu0 %v13967_v0  ;;  %5057 = vmatpush1.bf16.msra.mxu1 %v10719_v46 }
 0x2ef   :  { %8765 = vmatmul.mubr.msk.bf16.gmra.mrb[64].mxu0 %vm285_vm0, %v12088_v48  ;;  %v10724_v48 = vld [vmem:[#allocation2 + $0x194] ss:$8 sps:$4 sm:$0xff]  }
 0x2f0   :  { %2798 = vmatprep.mubr.bf16.mxu0 %v13967_v0  ;;  %5058 = vmatprep.subr.bf16.mxu1 %v10724_v48 }
 0x2f7   :  { %8766 = vmatmul.mubr.msk.bf16.gmra.mrb[68].mxu0 %vm285_vm0, %v12102_v53  ;;  %v10722_v53 = vld [vmem:[#allocation2 + $0x190] ss:$8 sps:$4 sm:$0xff]  }
 0x2f8   :  { %2808 = vmatprep.mubr.bf16.mxu0 %v13967_v0  ;;  %5059 = vmatpush1.bf16.msra.mxu1 %v10722_v53 }
 0x2ff   :  { %8767 = vmatmul.mubr.msk.bf16.gmra.mrb[72].mxu0 %vm285_vm0, %v12107_v56  ;;  %v10727_v56 = vld [vmem:[#allocation2 + $0x1a4] ss:$8 sps:$4 sm:$0xff]  }
 0x300   :  { %2818 = vmatprep.mubr.bf16.mxu0 %v13967_v0  ;;  %5060 = vmatprep.subr.bf16.mxu1 %v10727_v56  ;;  %v10760_v56 = vld [vmem:[#allocation2 + $0x254] ss:$8 sps:$4 sm:$0xff]  }
 0x307   :  { %8768 = vmatmul.mubr.msk.bf16.gmra.mrb[76].mxu0 %vm285_vm0, %v12121_v61  ;;  %v10725_v61 = vld [vmem:[#allocation2 + $0x1a0] ss:$8 sps:$4 sm:$0xff]  }
 0x308   :  { %2828 = vmatprep.mubr.bf16.mxu0 %v13967_v0  ;;  %5061 = vmatpush1.bf16.msra.mxu1 %v10725_v61 }
 0x30f   :  { %8769 = vmatmul.mubr.msk.bf16.gmra.mrb[80].mxu0 %vm285_vm0, %v12126_v1  ;;  %v10730_v1 = vld [vmem:[#allocation2 + $0x1b4] ss:$8 sps:$4 sm:$0xff]  }
 0x310   :  { %2838 = vmatprep.mubr.bf16.mxu0 %v13967_v0  ;;  %5062 = vmatprep.subr.bf16.mxu1 %v10730_v1  ;;  %v10758_v1 = vld [vmem:[#allocation2 + $0x250] ss:$8 sps:$4 sm:$0xff]  }
 0x317   :  { %8770 = vmatmul.mubr.msk.bf16.gmra.mrb[84].mxu0 %vm285_vm0, %v12140_v7  ;;  %v10728_v7 = vld [vmem:[#allocation2 + $0x1b0] ss:$8 sps:$4 sm:$0xff]  }
 0x318   :  { %2848 = vmatprep.mubr.bf16.mxu0 %v13967_v0  ;;  %5063 = vmatpush1.bf16.msra.mxu1 %v10728_v7  ;;  %v10763_v7 = vld [vmem:[#allocation2 + $0x264] ss:$8 sps:$4 sm:$0xff]  }
 0x31f   :  { %8771 = vmatmul.mubr.msk.bf16.gmra.mrb[88].mxu0 %vm285_vm0, %v12145_v8  ;;  %v10733_v8 = vld [vmem:[#allocation2 + $0x1c4] ss:$8 sps:$4 sm:$0xff]  }
 0x320   :  { %2858 = vmatprep.mubr.bf16.mxu0 %v13967_v0  ;;  %5064 = vmatprep.subr.bf16.mxu1 %v10733_v8 }
 0x327   :  { %8772 = vmatmul.mubr.msk.bf16.gmra.mrb[92].mxu0 %vm285_vm0, %v12159_v12  ;;  %v10731_v12 = vld [vmem:[#allocation2 + $0x1c0] ss:$8 sps:$4 sm:$0xff]  }
 0x328   :  { %3550 = vmatprep.mubr.bf16.mxu0 %v13967_v0  ;;  %5065 = vmatpush1.bf16.msra.mxu1 %v10731_v12  ;;  %v10761_v12 = vld [vmem:[#allocation2 + $0x260] ss:$8 sps:$4 sm:$0xff]  }
 0x32f   :  { %8827 = vmatmul.mubr.msk.bf16.vlgmr.msra.gmra.mrb[0].mxu0 %vm285_vm0, %v12164_v15  ;;  %v10736_v15 = vld [vmem:[#allocation2 + $0x1d4] ss:$8 sps:$4 sm:$0xff]  }
 0x330   :  { %3560 = vmatprep.mubr.bf16.mxu0 %v13967_v0  ;;  %5066 = vmatprep.subr.bf16.mxu1 %v10736_v15 }
 0x337   :  { %8828 = vmatmul.mubr.msk.bf16.gmra.mrb[4].mxu0 %vm285_vm0, %v12182_v24  ;;  %v10734_v24 = vld [vmem:[#allocation2 + $0x1d0] ss:$8 sps:$4 sm:$0xff]  }
 0x338   :  { %3570 = vmatprep.mubr.bf16.mxu0 %v13967_v0  ;;  %5067 = vmatpush1.bf16.msra.mxu1 %v10734_v24 }
 0x33f   :  { %8829 = vmatmul.mubr.msk.bf16.gmra.mrb[8].mxu0 %vm285_vm0, %v12190_v28  ;;  %v10739_v28 = vld [vmem:[#allocation2 + $0x1e4] ss:$8 sps:$4 sm:$0xff]  }
 0x340   :  { %3580 = vmatprep.mubr.bf16.mxu0 %v13967_v0  ;;  %5068 = vmatprep.subr.bf16.mxu1 %v10739_v28 }
 0x347   :  { %8830 = vmatmul.mubr.msk.bf16.gmra.mrb[12].mxu0 %vm285_vm0, %v12202_v42  ;;  %v10737_v42 = vld [vmem:[#allocation2 + $0x1e0] ss:$8 sps:$4 sm:$0xff]  }
 0x348   :  { %3590 = vmatprep.mubr.bf16.mxu0 %v13967_v0  ;;  %5069 = vmatpush1.bf16.msra.mxu1 %v10737_v42 }
 0x34f   :  { %8831 = vmatmul.mubr.msk.bf16.gmra.mrb[16].mxu0 %vm285_vm0, %v12207_v31  ;;  %v10742_v31 = vld [vmem:[#allocation2 + $0x1f4] ss:$8 sps:$4 sm:$0xff]  }
 0x350   :  { %3600 = vmatprep.mubr.bf16.mxu0 %v13967_v0  ;;  %5070 = vmatprep.subr.bf16.mxu1 %v10742_v31 }
 0x357   :  { %8832 = vmatmul.mubr.msk.bf16.gmra.mrb[20].mxu0 %vm285_vm0, %v12219_v45  ;;  %v10740_v45 = vld [vmem:[#allocation2 + $0x1f0] ss:$8 sps:$4 sm:$0xff]  }
 0x358   :  { %3610 = vmatprep.mubr.bf16.mxu0 %v13967_v0  ;;  %5071 = vmatpush1.bf16.msra.mxu1 %v10740_v45 }
 0x35f   :  { %8833 = vmatmul.mubr.msk.bf16.gmra.mrb[24].mxu0 %vm285_vm0, %v12224_v34  ;;  %v10745_v34 = vld [vmem:[#allocation2 + $0x204] ss:$8 sps:$4 sm:$0xff]  }
 0x360   :  { %3620 = vmatprep.mubr.bf16.mxu0 %v13967_v0  ;;  %5072 = vmatprep.subr.bf16.mxu1 %v10745_v34  ;;  %v10766_v34 = vld [vmem:[#allocation2 + $0x274] ss:$8 sps:$4 sm:$0xff]  }
 0x367   :  { %8834 = vmatmul.mubr.msk.bf16.gmra.mrb[28].mxu0 %vm285_vm0, %v12236_v47  ;;  %v10743_v47 = vld [vmem:[#allocation2 + $0x200] ss:$8 sps:$4 sm:$0xff]  }
 0x368   :  { %3630 = vmatprep.mubr.bf16.mxu0 %v13967_v0  ;;  %5073 = vmatpush1.bf16.msra.mxu1 %v10743_v47 }
 0x36f   :  { %8835 = vmatmul.mubr.msk.bf16.gmra.mrb[32].mxu0 %vm285_vm0, %v12241_v37 }
 0x370   :  { %3640 = vmatprep.mubr.bf16.mxu0 %v13967_v0 }
 0x377   :  { %8836 = vmatmul.mubr.msk.bf16.gmra.mrb[36].mxu0 %vm285_vm0, %v12253_v49 }
 0x378   :  { %3650 = vmatprep.mubr.bf16.mxu0 %v13967_v0 }
 0x37f   :  { %8837 = vmatmul.mubr.msk.bf16.gmra.mrb[40].mxu0 %vm285_vm0, %v12258_v40 }
 0x380   :  { %3660 = vmatprep.mubr.bf16.mxu0 %v13967_v0 }
 0x387   :  { %8838 = vmatmul.mubr.msk.bf16.gmra.mrb[44].mxu0 %vm285_vm0, %v12270_v51  ;;  %v10748_v51 = vld [vmem:[#allocation2 + $0x214] ss:$8 sps:$4 sm:$0xff]  }
 0x388   :  { %3670 = vmatprep.mubr.bf16.mxu0 %v13967_v0  ;;  %5074 = vmatprep.subr.bf16.mxu1 %v10748_v51 }
 0x38f   :  { %8839 = vmatmul.mubr.msk.bf16.gmra.mrb[48].mxu0 %vm285_vm0, %v12275_v44 }
 0x390   :  { %3680 = vmatprep.mubr.bf16.mxu0 %v13967_v0 }
 0x397   :  { %8840 = vmatmul.mubr.msk.bf16.gmra.mrb[52].mxu0 %vm285_vm0, %v12287_v52  ;;  %v10746_v52 = vld [vmem:[#allocation2 + $0x210] ss:$8 sps:$4 sm:$0xff]  }
 0x398   :  { %3690 = vmatprep.mubr.bf16.mxu0 %v13967_v0  ;;  %5075 = vmatpush1.bf16.msra.mxu1 %v10746_v52 }
 0x39f   :  { %8841 = vmatmul.mubr.msk.bf16.gmra.mrb[56].mxu0 %vm285_vm0, %v12292_v50  ;;  %v10751_v50 = vld [vmem:[#allocation2 + $0x224] ss:$8 sps:$4 sm:$0xff]  }
 0x3a0   :  { %3700 = vmatprep.mubr.bf16.mxu0 %v13967_v0  ;;  %5076 = vmatprep.subr.bf16.mxu1 %v10751_v50 }
 0x3a7   :  { %8842 = vmatmul.mubr.msk.bf16.gmra.mrb[60].mxu0 %vm285_vm0, %v12304_v54  ;;  %v10749_v54 = vld [vmem:[#allocation2 + $0x220] ss:$8 sps:$4 sm:$0xff]  }
 0x3a8   :  { %3710 = vmatprep.mubr.bf16.mxu0 %v13967_v0  ;;  %5077 = vmatpush1.bf16.msra.mxu1 %v10749_v54 }
 0x3af   :  { %8843 = vmatmul.mubr.msk.bf16.gmra.mrb[64].mxu0 %vm285_vm0, %v12309_v59 }
 0x3b0   :  { %3720 = vmatprep.mubr.bf16.mxu0 %v13967_v0 }
 0x3b7   :  { %8844 = vmatmul.mubr.msk.bf16.gmra.mrb[68].mxu0 %vm285_vm0, %v12324_v4 }
 0x3b8   :  { %3730 = vmatprep.mubr.bf16.mxu0 %v13967_v0 }
 0x3bf   :  { %8845 = vmatmul.mubr.msk.bf16.gmra.mrb[72].mxu0 %vm285_vm0, %v12329_v9 }
 0x3c0   :  { %3740 = vmatprep.mubr.bf16.mxu0 %v13967_v0 }
 0x3c7   :  { %8846 = vmatmul.mubr.msk.bf16.gmra.mrb[76].mxu0 %vm285_vm0, %v12341_v57  ;;  %v13969_v57 = vlaneseq }
 0x3c8   :  { %3750 = vmatprep.mubr.bf16.mxu0 %v13967_v0 }
 0x3c9   :  { %v12650_v39 = vshrl.u32 %v13969_v57, 7 }
 0x3cb   :  { %v4535_v16 = vsub.s32 2, %v12650_v39 }
 0x3cd   :  { %v12661_v23 = vrot.slane %v12657_v35, %v4535_v16 }
 0x3cf   :  { %8847 = vmatmul.mubr.msk.bf16.gmra.mrb[80].mxu0 %vm285_vm0, %v12346_v18 }
 0x3d0   :  { %3760 = vmatprep.mubr.bf16.mxu0 %v13967_v0 }
 0x3d7   :  { %8848 = vmatmul.mubr.msk.bf16.gmra.mrb[84].mxu0 %vm285_vm0, %v12358_v58 }
 0x3d8   :  { %3770 = vmatprep.mubr.bf16.mxu0 %v13967_v0 }
 0x3df   :  { %8849 = vmatmul.mubr.msk.bf16.gmra.mrb[88].mxu0 %vm285_vm0, %v12363_v21  ;;  %v10754_v21 = vld [vmem:[#allocation2 + $0x234] ss:$8 sps:$4 sm:$0xff]  }
 0x3e0   :  { %3780 = vmatprep.mubr.bf16.mxu0 %v13967_v0  ;;  %5078 = vmatprep.subr.bf16.mxu1 %v10754_v21 }
 0x3e1   :  { %5079 = vmatpush1.bf16.msra.mxu1 %v10752_v55 }
 0x3e2   :  { %5080 = vmatprep.subr.bf16.mxu1 %v10757_v41 }
 0x3e5   :  { %5081 = vmatpush1.bf16.msra.mxu1 %v10755_v43 }
 0x3e6   :  { %5082 = vmatprep.subr.bf16.mxu1 %v10760_v56 }
 0x3e7   :  { %8850 = vmatmul.mubr.msk.bf16.gmra.mrb[92].mxu0 %vm285_vm0, %v12375_v60 }
 0x3e9   :  { %5083 = vmatpush1.bf16.msra.mxu1 %v10758_v1 }
 0x3ea   :  { %5084 = vmatprep.subr.bf16.mxu1 %v10763_v7 }
 0x3ed   :  { %5085 = vmatpush1.bf16.msra.mxu1 %v10761_v12 }
 0x3ee   :  { %5086 = vmatprep.subr.bf16.mxu1 %v10766_v34 }
 0x402   :  { %v3552_v37 = vpop.f32.mrb[0].mxu0 }
 0x403   :  { %v3554_v49 = vpop.f32.mrb[1].mxu0 }
 0x404   :  { %v3556_v40 = vpop.f32.mrb[2].mxu0 }
 0x405   :  { %v3558_v44 = vpop.f32.mrb[3].mxu0 }
 0x40a   :  { %v3562_v59 = vpop.f32.mrb[4].mxu0 }
 0x40b   :  { %v12643_v4 = vmax.f32 %v3552_v37, %v3562_v59  ;;  %v3564_v9 = vpop.f32.mrb[5].mxu0  ;;  %v10764_v37 = vld [vmem:[#allocation2 + $0x270] ss:$8 sps:$4 sm:$0xff]  }
 0x40c   :  { %v12645_v18 = vmax.f32 %v3554_v49, %v3564_v9  ;;  %v3566_v58 = vpop.f32.mrb[6].mxu0  ;;  %5087 = vmatpush1.bf16.msra.mxu1 %v10764_v37 }
 0x40d   :  { %v12647_v60 = vmax.f32 %v3556_v40, %v3566_v58  ;;  %v3568_v36 = vpop.f32.mrb[7].mxu0 }
 0x40e   :  { %v12652_v5 = vmax.f32 %v3558_v44, %v3568_v36 }
 0x412   :  { %v3572_v46 = vpop.f32.mrb[8].mxu0 }
 0x413   :  { %v3574_v48 = vpop.f32.mrb[9].mxu0 }
 0x414   :  { %v3576_v53 = vpop.f32.mrb[10].mxu0 }
 0x415   :  { %v3578_v61 = vpop.f32.mrb[11].mxu0 }
 0x41a   :  { %v3582_v8 = vpop.f32.mrb[12].mxu0 }
 0x41b   :  { %v12663_v15 = vmax.f32 %v3572_v46, %v3582_v8  ;;  %v3584_v24 = vpop.f32.mrb[13].mxu0 }
 0x41c   :  { %v12665_v28 = vmax.f32 %v3574_v48, %v3584_v24  ;;  %v3586_v42 = vpop.f32.mrb[14].mxu0 }
 0x41d   :  { %v12667_v31 = vmax.f32 %v3576_v53, %v3586_v42  ;;  %4236 = vrot.lane.b32.xlu0 %v12663_v15, %s11269_s1  ;;  %v3588_v45 = vpop.f32.mrb[15].mxu0 }
 0x41e   :  { %v12671_v47 = vmax.f32 %v3578_v61, %v3588_v45 }
 0x41f   :  { %4238 = vrot.lane.b32.xlu1 %v12667_v31, %s11269_s1 }
 0x421   :  { %4284 = vrot.lane.b32.xlu0 %v12665_v28, %s11269_s1 }
 0x422   :  { %v3592_v49 = vpop.f32.mrb[16].mxu0 }
 0x423   :  { %v3594_v40 = vpop.f32.mrb[17].mxu0 }
 0x424   :  { %v3596_v51 = vpop.f32.mrb[18].mxu0 }
 0x425   :  { %4286 = vrot.lane.b32.xlu0 %v12671_v47, %s11269_s1  ;;  %v3598_v44 = vpop.f32.mrb[19].mxu0 }
 0x42a   :  { %v3602_v52 = vpop.f32.mrb[20].mxu0 }
 0x42b   :  { %v12679_v50 = vmax.f32 %v3592_v49, %v3602_v52  ;;  %v3604_v54 = vpop.f32.mrb[21].mxu0 }
 0x42c   :  { %v12681_v59 = vmax.f32 %v3594_v40, %v3604_v54  ;;  %v3606_v9 = vpop.f32.mrb[22].mxu0 }
 0x42d   :  { %v12683_v58 = vmax.f32 %v3596_v51, %v3606_v9  ;;  %4240 = vrot.lane.b32.xlu0 %v12679_v50, %s11269_s1  ;;  %v3608_v21 = vpop.f32.mrb[23].mxu0 }
 0x42e   :  { %v12687_v36 = vmax.f32 %v3598_v44, %v3608_v21 }
 0x42f   :  { %4242 = vrot.lane.b32.xlu1 %v12683_v58, %s11269_s1 }
 0x431   :  { %4288 = vrot.lane.b32.xlu0 %v12681_v59, %s11269_s1 }
 0x432   :  { %v3612_v55 = vpop.f32.mrb[24].mxu0 }
 0x433   :  { %4290 = vrot.lane.b32.xlu1 %v12687_v36, %s11269_s1  ;;  %v3614_v16 = vpop.f32.mrb[25].mxu0 }
 0x434   :  { %v3616_v41 = vpop.f32.mrb[26].mxu0 }
 0x435   :  { %v3618_v43 = vpop.f32.mrb[27].mxu0 }
 0x43a   :  { %v3622_v46 = vpop.f32.mrb[28].mxu0 }
 0x43b   :  { %v12695_v48 = vmax.f32 %v3612_v55, %v3622_v46  ;;  %v3624_v53 = vpop.f32.mrb[29].mxu0 }
 0x43c   :  { %v12697_v56 = vmax.f32 %v3614_v16, %v3624_v53  ;;  %v3626_v61 = vpop.f32.mrb[30].mxu0 }
 0x43d   :  { %v12699_v1 = vmax.f32 %v3616_v41, %v3626_v61  ;;  %4244 = vrot.lane.b32.xlu0 %v12695_v48, %s11269_s1  ;;  %v3628_v7 = vpop.f32.mrb[31].mxu0 }
 0x43e   :  { %v12703_v8 = vmax.f32 %v3618_v43, %v3628_v7 }
 0x43f   :  { %4246 = vrot.lane.b32.xlu1 %v12699_v1, %s11269_s1 }
 0x441   :  { %4292 = vrot.lane.b32.xlu0 %v12697_v56, %s11269_s1 }
 0x442   :  { %v3632_v12 = vpop.f32.mrb[32].mxu0 }
 0x443   :  { %4294 = vrot.lane.b32.xlu1 %v12703_v8, %s11269_s1  ;;  %v3634_v24 = vpop.f32.mrb[33].mxu0 }
 0x444   :  { %v3636_v42 = vpop.f32.mrb[34].mxu0 }
 0x445   :  { %v3638_v45 = vpop.f32.mrb[35].mxu0 }
 0x44a   :  { %v3642_v34 = vpop.f32.mrb[36].mxu0 }
 0x44b   :  { %v12711_v37 = vmax.f32 %v3632_v12, %v3642_v34  ;;  %v3644_v49 = vpop.f32.mrb[37].mxu0 }
 0x44c   :  { %v12713_v40 = vmax.f32 %v3634_v24, %v3644_v49  ;;  %v3646_v51 = vpop.f32.mrb[38].mxu0 }
 0x44d   :  { %v12715_v44 = vmax.f32 %v3636_v42, %v3646_v51  ;;  %4248 = vrot.lane.b32.xlu0 %v12711_v37, %s11269_s1  ;;  %v3648_v52 = vpop.f32.mrb[39].mxu0  ;;  %v10769_v42 = vld [vmem:[#allocation2 + $0x284] ss:$8 sps:$4 sm:$0xff]  }
 0x44e   :  { %v12719_v54 = vmax.f32 %v3638_v45, %v3648_v52  ;;  %5169 = vmatprep.subr.bf16.mxu1 %v10769_v42 }
 0x44f   :  { %4250 = vrot.lane.b32.xlu1 %v12715_v44, %s11269_s1 }
 0x451   :  { %4296 = vrot.lane.b32.xlu0 %v12713_v40, %s11269_s1 }
 0x452   :  { %v3652_v9 = vpop.f32.mrb[40].mxu0 }
 0x453   :  { %4298 = vrot.lane.b32.xlu1 %v12719_v54, %s11269_s1  ;;  %v3654_v21 = vpop.f32.mrb[41].mxu0 }
 0x454   :  { %v3656_v55 = vpop.f32.mrb[42].mxu0 }
 0x455   :  { %v3658_v16 = vpop.f32.mrb[43].mxu0 }
 0x45a   :  { %v3662_v41 = vpop.f32.mrb[44].mxu0 }
 0x45b   :  { %v12727_v43 = vmax.f32 %v3652_v9, %v3662_v41  ;;  %v3664_v46 = vpop.f32.mrb[45].mxu0 }
 0x45c   :  { %v12729_v53 = vmax.f32 %v3654_v21, %v3664_v46  ;;  %v3666_v61 = vpop.f32.mrb[46].mxu0 }
 0x45d   :  { %14033 = vst [vmem:[#allocation16_spill] sm:$0xff] %v12727_v43  ;;  %v12731_v7 = vmax.f32 %v3656_v55, %v3666_v61  ;;  %4252 = vrot.lane.b32.xlu0 %v12727_v43, %s11269_s1  ;;  %v3668_v12 = vpop.f32.mrb[47].mxu0 }
 0x45e   :  { %14034 = vst [vmem:[#allocation17_spill] sm:$0xff] %v12729_v53  ;;  %v12735_v24 = vmax.f32 %v3658_v16, %v3668_v12  ;;  %v12753_v12 = vpop.permute.xlu1 %4332 }
 0x45f   :  { %14035 = vst [vmem:[#allocation18_spill] sm:$0xff] %v12731_v7  ;;  %4254 = vrot.lane.b32.xlu1 %v12731_v7, %s11269_s1 }
 0x460   :  { %14036 = vst [vmem:[#allocation19_spill] sm:$0xff] %v12735_v24 }
 0x461   :  { %4300 = vrot.lane.b32.xlu0 %v12729_v53, %s11269_s1 }
 0x462   :  { %v3672_v45 = vpop.f32.mrb[48].mxu0 }
 0x463   :  { %4302 = vrot.lane.b32.xlu1 %v12735_v24, %s11269_s1  ;;  %v3674_v34 = vpop.f32.mrb[49].mxu0 }
 0x464   :  { %v3676_v49 = vpop.f32.mrb[50].mxu0 }
 0x465   :  { %v3678_v51 = vpop.f32.mrb[51].mxu0 }
 0x46a   :  { %v3682_v52 = vpop.f32.mrb[52].mxu0 }
 0x46b   :  { %v12743_v9 = vmax.f32 %v3672_v45, %v3682_v52  ;;  %v3684_v21 = vpop.f32.mrb[53].mxu0 }
 0x46c   :  { %v12745_v55 = vmax.f32 %v3674_v34, %v3684_v21  ;;  %v3686_v16 = vpop.f32.mrb[54].mxu0  ;;  %v12763_v21 = vpop.permute.xlu0 %4336 }
 0x46d   :  { %14037 = vst [vmem:[#allocation20_spill] sm:$0xff] %v12743_v9  ;;  %v12747_v41 = vmax.f32 %v3676_v49, %v3686_v16  ;;  %4256 = vrot.lane.b32.xlu0 %v12743_v9, %s11269_s1  ;;  %v3688_v46 = vpop.f32.mrb[55].mxu0  ;;  %v12761_v49 = vpop.permute.xlu1 %4334 }
 0x46e   :  { %14038 = vst [vmem:[#allocation21_spill] sm:$0xff] %v12745_v55  ;;  %v12751_v61 = vmax.f32 %v3678_v51, %v3688_v46 }
 0x46f   :  { %14039 = vst [vmem:[#allocation22_spill] sm:$0xff] %v12747_v41  ;;  %4258 = vrot.lane.b32.xlu1 %v12747_v41, %s11269_s1 }
 0x470   :  { %14040 = vst [vmem:[#allocation23_spill] sm:$0xff] %v12751_v61  ;;  %v12767_v46 = vpop.permute.xlu0 %4340 }
 0x471   :  { %4304 = vrot.lane.b32.xlu0 %v12745_v55, %s11269_s1  ;;  %v12765_v51 = vpop.permute.xlu1 %4338 }
 0x472   :  { %v3692_v42 = vpop.f32.mrb[56].mxu0 }
 0x473   :  { %4306 = vrot.lane.b32.xlu1 %v12751_v61, %s11269_s1  ;;  %v3694_v45 = vpop.f32.mrb[57].mxu0 }
 0x474   :  { %v3696_v34 = vpop.f32.mrb[58].mxu0  ;;  %v12781_v7 = vpop.permute.xlu0 %4344 }
 0x475   :  { %v3698_v52 = vpop.f32.mrb[59].mxu0  ;;  %v12773_v9 = vpop.permute.xlu1 %4342 }
 0x47a   :  { %v3702_v16 = vpop.f32.mrb[60].mxu0 }
 0x47b   :  { %v12769_v0 = vmax.f32 %v3692_v42, %v3702_v16  ;;  %v3704_v57 = vpop.f32.mrb[61].mxu0  ;;  %v12785_v42 = vpop.permute.xlu1 %4346 }
 0x47c   :  { %v12771_v41 = vmax.f32 %v3694_v45, %v3704_v57  ;;  %v3706_v55 = vpop.f32.mrb[62].mxu0  ;;  %v12789_v45 = vpop.permute.xlu0 %4348 }
 0x47d   :  { %14041 = vst [vmem:[#allocation24_spill] sm:$0xff] %v12769_v0  ;;  %v12775_v61 = vmax.f32 %v3696_v34, %v3706_v55  ;;  %4260 = vrot.lane.b32.xlu0 %v12769_v0, %s11269_s1  ;;  %v3708_v3 = vpop.f32.mrb[63].mxu0  ;;  %14045 = vst [vmem:[#allocation28_spill] sm:$0xff] %v12789_v45 }
 0x47e   :  { %14042 = vst [vmem:[#allocation25_spill] sm:$0xff] %v12771_v41  ;;  %v12779_v24 = vmax.f32 %v3698_v52, %v3708_v3 }
 0x47f   :  { %14043 = vst [vmem:[#allocation26_spill] sm:$0xff] %v12775_v61  ;;  %4262 = vrot.lane.b32.xlu1 %v12775_v61, %s11269_s1  ;;  %v12793_v3 = vpop.permute.xlu1 %4350 }
 0x480   :  { %14044 = vst [vmem:[#allocation27_spill] sm:$0xff] %v12779_v24  ;;  %14046 = vst [vmem:[#allocation29_spill] sm:$0xff] %v12793_v3  ;;  %v12797_v16 = vpop.permute.xlu0 %4352 }
 0x481   :  { %4308 = vrot.lane.b32.xlu0 %v12771_v41, %s11269_s1  ;;  %14047 = vst [vmem:[#allocation30_spill] sm:$0xff] %v12797_v16  ;;  %v14048_v41 = vlaneseq }
 0x482   :  { %v3712_v57 = vpop.f32.mrb[64].mxu0 }
 0x483   :  { %4310 = vrot.lane.b32.xlu1 %v12779_v24, %s11269_s1  ;;  %v3714_v55 = vpop.f32.mrb[65].mxu0  ;;  %v12801_v61 = vpop.permute.xlu1 %4354  ;;  %v12804_v0 = vand.u32 127, %v14048_v41 }
 0x484   :  { %v3716_v34 = vpop.f32.mrb[66].mxu0  ;;  %v12806_v24 = vpop.permute.xlu0 %4356 }
 0x485   :  { %4360 = vrot.lane.b32.xlu0 %v12520_v33, %s11269_s1  ;;  %v3718_v52 = vpop.f32.mrb[67].mxu0  ;;  %14049 = vst [vmem:[#allocation31_spill] sm:$0xff] %v12806_v24  ;;  %vm4378_vm1 = vcmp.lt.s32.totalorder %v12804_v0, 112  ;;  %vm7434_vm2 = vcmp.lt.s32.totalorder %v12804_v0, 96 }
 0x487   :  { %4362 = vrot.lane.b32.xlu1 %v12522_v30, %s11269_s1  ;;  %v12812_v26 = vpop.permute.xlu1 %4358 }
 0x488   :  { %14052 = vst [vmem:[#allocation34_spill] sm:$0xff] %v12812_v26 }
 0x48a   :  { %v3722_v53 = vpop.f32.mrb[68].mxu0 }
 0x48b   :  { %v12808_v43 = vmax.f32 %v3712_v57, %v3722_v53  ;;  %v3724_v29 = vpop.f32.mrb[69].mxu0  ;;  %v12828_v57 = vsub.s32 0, %v12650_v39 }
 0x48c   :  { %v12810_v3 = vmax.f32 %v3714_v55, %v3724_v29  ;;  %v3726_v33 = vpop.f32.mrb[70].mxu0 }
 0x48d   :  { %14050 = vst [vmem:[#allocation32_spill] sm:$0xff] %v12808_v43  ;;  %v12814_v16 = vmax.f32 %v3716_v34, %v3726_v33  ;;  %v3728_v45 = vpop.f32.mrb[71].mxu0  ;;  %14055 = vst [vmem:[#allocation37_spill] sm:$0xff] %v12828_v57  ;;  %v12836_v34 = vsub.s32 1, %v12650_v39 }
 0x48e   :  { %14051 = vst [vmem:[#allocation33_spill] sm:$0xff] %v12810_v3  ;;  %v12817_v30 = vmax.f32 %v3718_v52, %v3728_v45  ;;  %4312 = vrot.lane.b32.xlu0 %v12810_v3, %s11269_s1 }
 0x48f   :  { %14053 = vst [vmem:[#allocation35_spill] sm:$0xff] %v12814_v16  ;;  %v4237_v41 = vpop.permute.xlu0 %4236  ;;  %14056 = vst [vmem:[#allocation38_spill] sm:$0xff] %v12836_v34  ;;  %v12855_v24 = vrot.slane %v12657_v35, %v12836_v34 }
 0x490   :  { %14054 = vst [vmem:[#allocation36_spill] sm:$0xff] %v12817_v30  ;;  %v4429_v53 = vsel %vm4378_vm1, %v12753_v12, %v4237_v41  ;;  %4314 = vrot.lane.b32.xlu1 %v12817_v30, %s11269_s1 }
 0x491   :  { %v4459_v29 = vmax.f32 %v12443_v17, %v4429_v53  ;;  %v4239_v33 = vpop.permute.xlu1 %4238 }
 0x492   :  { %v4430_v45 = vsel %vm4378_vm1, %v12761_v49, %v4239_v33  ;;  %4264 = vrot.lane.b32.xlu0 %v12808_v43, %s11269_s1  ;;  %v3732_v55 = vpop.f32.mrb[72].mxu0 }
 0x493   :  { %v4548_v52 = vadd.f32 %v12661_v23, %v4459_v29  ;;  %v4462_v30 = vmax.f32 %v12447_v22, %v4430_v45  ;;  %v4285_v17 = vpop.permute.xlu0 %4284  ;;  %v3734_v53 = vpop.f32.mrb[73].mxu0  ;;  %v12850_v29 = vrot.slane %v12657_v35, %v12828_v57 }
 0x494   :  { %v4381_v3 = vsel %vm4378_vm1, %v4285_v17, %v12753_v12  ;;  %v4405_v26 = vsel %vm4378_vm1, %v4237_v41, %v4285_v17  ;;  %4266 = vrot.lane.b32.xlu1 %v12814_v16, %s11269_s1  ;;  %v3736_v43 = vpop.f32.mrb[74].mxu0 }
 0x495   :  { %v4551_v39 = vadd.f32 %v12661_v23, %v4462_v30  ;;  %v4457_v22 = vmax.f32 %v12663_v15, %v4405_v26  ;;  %v3738_v45 = vpop.f32.mrb[75].mxu0  ;;  %v4458_v12 = vmax.f32 %v12665_v28, %v4381_v3  ;;  %v4620_v41 = vmax.f32 %v4548_v52, 0.0 }
 0x496   :  { %4280 = vrot.lane.b32.xlu0 %v12645_v18, %s11269_s1 }
 0x497   :  { %v4623_v17 = vmax.f32 %v4551_v39, 0.0  ;;  %v4287_v16 = vpop.permute.xlu0 %4286  ;;  %v4546_v15 = vadd.f32 %v12850_v29, %v4457_v22  ;;  %v4547_v3 = vadd.f32 %v12855_v24, %v4458_v12 }
 0x498   :  { %v4382_v30 = vsel %vm4378_vm1, %v4287_v16, %v12761_v49  ;;  %v4406_v26 = vsel %vm4378_vm1, %v4239_v33, %v4287_v16  ;;  %4282 = vrot.lane.b32.xlu1 %v12652_v5, %s11269_s1 }
 0x499   :  { %v12867_v35 = vpack.c.bf16 %v4623_v17, %v4620_v41  ;;  %v4460_v28 = vmax.f32 %v12667_v31, %v4406_v26  ;;  %v4461_v52 = vmax.f32 %v12671_v47, %v4382_v30  ;;  %v4618_v22 = vmax.f32 %v4546_v15, 0.0  ;;  %v10767_v15 = vld [vmem:[#allocation2 + $0x280] ss:$8 sps:$4 sm:$0xff]  }
 0x49a   :  { %4328 = vrot.lane.b32.xlu0 %v12436_v6, %s11269_s1  ;;  %v3742_v49 = vpop.f32.mrb[76].mxu0  ;;  %v4619_v26 = vmax.f32 %v4547_v3, 0.0 }
 0x49b   :  { %v4549_v39 = vadd.f32 %v12850_v29, %v4460_v28  ;;  %v12876_v16 = vmax.f32 %v3732_v55, %v3742_v49  ;;  %v3744_v33 = vpop.f32.mrb[77].mxu0  ;;  %v4550_v41 = vadd.f32 %v12855_v24, %v4461_v52  ;;  %v10772_v52 = vld [vmem:[#allocation2 + $0x294] ss:$8 sps:$4 sm:$0xff]  }
 0x49c   :  { %v12879_v17 = vmax.f32 %v3734_v53, %v3744_v33  ;;  %4330 = vrot.lane.b32.xlu1 %v12438_v13, %s11269_s1  ;;  %v3746_v31 = vpop.f32.mrb[78].mxu0 }
 0x49d   :  { %14057 = vst [vmem:[#allocation39_spill] sm:$0xff] %v12876_v16  ;;  %v4621_v12 = vmax.f32 %v4549_v39, 0.0  ;;  %v12883_v47 = vmax.f32 %v3736_v43, %v3746_v31  ;;  %v3748_v30 = vpop.f32.mrb[79].mxu0  ;;  %v4622_v34 = vmax.f32 %v4550_v41, 0.0 }
 0x49e   :  { %v12885_v57 = vmax.f32 %v3738_v45, %v3748_v30  ;;  %4232 = vrot.lane.b32.xlu0 %v12643_v4, %s11269_s1  ;;  %v10770_v30 = vld [vmem:[#allocation2 + $0x290] ss:$8 sps:$4 sm:$0xff]  }
 0x49f   :  { %14058 = vst [vmem:[#allocation40_spill] sm:$0xff] %v12883_v47  ;;  %v12889_v55 = vpack.c.bf16 %v4621_v12, %v4618_v22  ;;  %v4241_v53 = vpop.permute.xlu0 %4240  ;;  %v12896_v43 = vpack.c.bf16 %v4622_v34, %v4619_v26 }
 0x4a0   :  { %v4431_v28 = vsel %vm4378_vm1, %v12763_v21, %v4241_v53  ;;  %4234 = vrot.lane.b32.xlu1 %v12647_v60, %s11269_s1 }
 0x4a1   :  { %14059 = vst [vmem:[#allocation41_spill] sm:$0xff] %v12889_v55  ;;  %v4465_v3 = vmax.f32 %v12454_v27, %v4431_v28  ;;  %v4243_v45 = vpop.permute.xlu1 %4242  ;;  %5088 = vmatprep.mubr.bf16.mxu1 %v12896_v43 }
 0x4a2   :  { %v4432_v49 = vsel %vm4378_vm1, %v12765_v51, %v4243_v45  ;;  %4364 = vrot.lane.b32.xlu0 %v12527_v32, %s11269_s1  ;;  %v3752_v39 = vpop.f32.mrb[80].mxu0  ;;  %5089 = vmatmul.mubr.bf16.vlgmr.msra.gmra.mrb[48].mxu1 %v12889_v55  ;;  %v10775_v55 = vld [vmem:[#allocation2 + $0x2a4] ss:$8 sps:$4 sm:$0xff]  }
 0x4a3   :  { %v4554_v33 = vadd.f32 %v12661_v23, %v4465_v3  ;;  %v4468_v34 = vmax.f32 %v12456_v62, %v4432_v49  ;;  %v4289_v41 = vpop.permute.xlu0 %4288  ;;  %v3754_v27 = vpop.f32.mrb[81].mxu0  ;;  %5170 = vmatpush1.bf16.msra.mxu1 %v10767_v15 }
 0x4a4   :  { %v4383_v31 = vsel %vm4378_vm1, %v4289_v41, %v12763_v21  ;;  %v4407_v22 = vsel %vm4378_vm1, %v4241_v53, %v4289_v41  ;;  %4366 = vrot.lane.b32.xlu1 %v12529_v25, %s11269_s1  ;;  %v3756_v12 = vpop.f32.mrb[82].mxu0  ;;  %5171 = vmatprep.subr.bf16.mxu1 %v10772_v52 }
 0x4a5   :  { %v4557_v26 = vadd.f32 %v12661_v23, %v4468_v34  ;;  %v4463_v62 = vmax.f32 %v12679_v50, %v4407_v22  ;;  %v4464_v28 = vmax.f32 %v12681_v59, %v4383_v31  ;;  %v4291_v3 = vpop.permute.xlu1 %4290  ;;  %v3758_v49 = vpop.f32.mrb[83].mxu0  ;;  %v4626_v15 = vmax.f32 %v4554_v33, 0.0  ;;  %v10778_v31 = vld [vmem:[#allocation2 + $0x2b4] ss:$8 sps:$4 sm:$0xff]  }
 0x4a6   :  { %v4384_v21 = vsel %vm4378_vm1, %v4291_v3, %v12765_v51  ;;  %v4408_v53 = vsel %vm4378_vm1, %v4243_v45, %v4291_v3  ;;  %4316 = vrot.lane.b32.xlu0 %v12879_v17, %s11269_s1  ;;  %v10773_v51 = vld [vmem:[#allocation2 + $0x2a0] ss:$8 sps:$4 sm:$0xff]  }
 0x4a7   :  { %v4629_v34 = vmax.f32 %v4557_v26, 0.0  ;;  %v4552_v50 = vadd.f32 %v12850_v29, %v4463_v62  ;;  %v4466_v59 = vmax.f32 %v12683_v58, %v4408_v53  ;;  %v4553_v41 = vadd.f32 %v12855_v24, %v4464_v28  ;;  %5172 = vmatpush1.bf16.msra.mxu1 %v10770_v30 }
 0x4a8   :  { %v4467_v52 = vmax.f32 %v12687_v36, %v4384_v21  ;;  %4318 = vrot.lane.b32.xlu1 %v12885_v57, %s11269_s1  ;;  %5173 = vmatprep.subr.bf16.mxu1 %v10775_v55 }
 0x4a9   :  { %v4555_v45 = vadd.f32 %v12850_v29, %v4466_v59  ;;  %v12932_v22 = vpack.c.bf16 %v4629_v34, %v4626_v15  ;;  %v4624_v26 = vmax.f32 %v4552_v50, 0.0  ;;  %v4625_v3 = vmax.f32 %v4553_v41, 0.0  ;;  %v10781_v41 = vld [vmem:[#allocation2 + $0x2c4] ss:$8 sps:$4 sm:$0xff]  }
 0x4aa   :  { %v4556_v33 = vadd.f32 %v12855_v24, %v4467_v52  ;;  %4268 = vrot.lane.b32.xlu0 %v12876_v16, %s11269_s1  ;;  %v3762_v58 = vpop.f32.mrb[84].mxu0 }
 0x4ab   :  { %v4627_v62 = vmax.f32 %v4555_v45, 0.0  ;;  %v12937_v36 = vmax.f32 %v3752_v39, %v3762_v58  ;;  %v3764_v28 = vpop.f32.mrb[85].mxu0  ;;  %5174 = vmatpush1.bf16.msra.mxu1 %v10773_v51 }
 0x4ac   :  { %v4628_v30 = vmax.f32 %v4556_v33, 0.0  ;;  %v12939_v21 = vmax.f32 %v3754_v27, %v3764_v28  ;;  %4270 = vrot.lane.b32.xlu1 %v12883_v47, %s11269_s1  ;;  %v3766_v55 = vpop.f32.mrb[86].mxu0  ;;  %5175 = vmatprep.subr.bf16.mxu1 %v10778_v31  ;;  %v10776_v27 = vld [vmem:[#allocation2 + $0x2b0] ss:$8 sps:$4 sm:$0xff]   ;;  %v10779_v31 = vld [vmem:[#allocation2 + $0x2c0] ss:$8 sps:$4 sm:$0xff]  }
 0x4ad   :  { %14060 = vst [vmem:[#allocation42_spill] sm:$0xff] %v12937_v36  ;;  %v12943_v53 = vmax.f32 %v3756_v12, %v3766_v55  ;;  %v3768_v15 = vpop.f32.mrb[87].mxu0  ;;  %v12945_v34 = vpack.c.bf16 %v4627_v62, %v4624_v26 }
 0x4ae   :  { %14061 = vst [vmem:[#allocation43_spill] sm:$0xff] %v12939_v21  ;;  %v12947_v50 = vmax.f32 %v3758_v49, %v3768_v15  ;;  %4368 = vrot.lane.b32.xlu0 %v12534_v63, %s11269_s1  ;;  %v12951_v39 = vpack.c.bf16 %v4628_v30, %v4625_v3 }
 0x4af   :  { %14062 = vst [vmem:[#allocation44_spill] sm:$0xff] %v12943_v53  ;;  %v4245_v59 = vpop.permute.xlu0 %4244  ;;  %5176 = vmatpush1.bf16.msra.mxu1 %v10776_v27 }
 0x4b0   :  { %14063 = vst [vmem:[#allocation45_spill] sm:$0xff] %v12947_v50  ;;  %5098 = vmatprep.mubr.bf16.mxu1 %v12951_v39  ;;  %v4433_v12 = vsel %vm4378_vm1, %v12767_v46, %v4245_v59  ;;  %4370 = vrot.lane.b32.xlu1 %v12536_v19, %s11269_s1 }
 0x4b1   :  { %v4471_v49 = vmax.f32 %v12465_v2, %v4433_v12  ;;  %5099 = vmatmul.mubr.bf16.gmra.mrb[52].mxu1 %v12945_v34  ;;  %v4247_v52 = vpop.permute.xlu1 %4246  ;;  %5177 = vmatprep.subr.bf16.mxu1 %v10781_v41  ;;  %v10784_v2 = vld [vmem:[#allocation2 + $0x2d4] ss:$8 sps:$4 sm:$0xff]  }
 0x4b2   :  { %v4434_v51 = vsel %vm4378_vm1, %v12773_v9, %v4247_v52  ;;  %4320 = vrot.lane.b32.xlu0 %v12939_v21, %s11269_s1  ;;  %v3772_v45 = vpop.f32.mrb[88].mxu0 }
 0x4b3   :  { %v4560_v33 = vadd.f32 %v12661_v23, %v4471_v49  ;;  %v4474_v58 = vmax.f32 %v12467_v10, %v4434_v51  ;;  %v4293_v26 = vpop.permute.xlu0 %4292  ;;  %v3774_v62 = vpop.f32.mrb[89].mxu0  ;;  %5178 = vmatpush1.bf16.msra.mxu1 %v10779_v31 }
 0x4b4   :  { %v4385_v28 = vsel %vm4378_vm1, %v4293_v26, %v12767_v46  ;;  %v4409_v3 = vsel %vm4378_vm1, %v4245_v59, %v4293_v26  ;;  %4322 = vrot.lane.b32.xlu1 %v12947_v50, %s11269_s1  ;;  %v3776_v30 = vpop.f32.mrb[90].mxu0  ;;  %v10782_v59 = vld [vmem:[#allocation2 + $0x2d0] ss:$8 sps:$4 sm:$0xff]   ;;  %5179 = vmatprep.subr.bf16.mxu1 %v10784_v2  ;;  %v10802_v50 = vld [vmem:[#allocation2 + $0x34] ss:$8 sps:$4 sm:$0xff]  }
 0x4b5   :  { %v4563_v55 = vadd.f32 %v12661_v23, %v4474_v58  ;;  %v4469_v15 = vmax.f32 %v12695_v48, %v4409_v3  ;;  %v4470_v10 = vmax.f32 %v12697_v56, %v4385_v28  ;;  %v4295_v27 = vpop.permute.xlu1 %4294  ;;  %v3778_v41 = vpop.f32.mrb[91].mxu0  ;;  %v4632_v49 = vmax.f32 %v4560_v33, 0.0  ;;  %v10787_v58 = vld [vmem:[#allocation2 + $0x2e4] ss:$8 sps:$4 sm:$0xff]  }
 0x4b6   :  { %v4386_v12 = vsel %vm4378_vm1, %v4295_v27, %v12773_v9  ;;  %v4410_v46 = vsel %vm4378_vm1, %v4247_v52, %v4295_v27  ;;  %4272 = vrot.lane.b32.xlu0 %v12937_v36, %s11269_s1 }
 0x4b7   :  { %v4635_v51 = vmax.f32 %v4563_v55, 0.0  ;;  %v4558_v48 = vadd.f32 %v12850_v29, %v4469_v15  ;;  %v4472_v56 = vmax.f32 %v12699_v1, %v4410_v46  ;;  %v4559_v26 = vadd.f32 %v12855_v24, %v4470_v10  ;;  %5180 = vmatpush1.bf16.msra.mxu1 %v10782_v59  ;;  %v10785_v1 = vld [vmem:[#allocation2 + $0x2e0] ss:$8 sps:$4 sm:$0xff]   ;;  %v10790_v15 = vld [vmem:[#allocation2 + $0x2f4] ss:$8 sps:$4 sm:$0xff]  }
 0x4b8   :  { %v4473_v9 = vmax.f32 %v12703_v8, %v4386_v12  ;;  %4274 = vrot.lane.b32.xlu1 %v12943_v53, %s11269_s1  ;;  %5181 = vmatprep.subr.bf16.mxu1 %v10787_v58  ;;  %v10793_v58 = vld [vmem:[#allocation2 + $0x4] ss:$8 sps:$4 sm:$0xff]   ;;  %v10794_v53 = vld [vmem:[#allocation2 + $0x10] ss:$8 sps:$4 sm:$0xff]  }
 0x4b9   :  { %v12991_v52 = vpack.c.bf16 %v4635_v51, %v4632_v49  ;;  %v4561_v31 = vadd.f32 %v12850_v29, %v4472_v56  ;;  %v4630_v2 = vmax.f32 %v4558_v48, 0.0  ;;  %v4631_v10 = vmax.f32 %v4559_v26, 0.0  ;;  %v10788_v56 = vld [vmem:[#allocation2 + $0x2f0] ss:$8 sps:$4 sm:$0xff]  }
 0x4ba   :  { %v4562_v33 = vadd.f32 %v12855_v24, %v4473_v9  ;;  %4372 = vrot.lane.b32.xlu0 %v12541_v38, %s11269_s1  ;;  %v3782_v28 = vpop.f32.mrb[92].mxu0 }
 0x4bb   :  { %v4633_v3 = vmax.f32 %v4561_v31, 0.0  ;;  %v12997_v55 = vmax.f32 %v3772_v45, %v3782_v28  ;;  %v3784_v8 = vpop.f32.mrb[93].mxu0  ;;  %5182 = vmatpush1.bf16.msra.mxu1 %v10785_v1 }
 0x4bc   :  { %v4634_v27 = vmax.f32 %v4562_v33, 0.0  ;;  %v12999_v12 = vmax.f32 %v3774_v62, %v3784_v8  ;;  %4374 = vrot.lane.b32.xlu1 %v12543_v11, %s11269_s1  ;;  %v3786_v46 = vpop.f32.mrb[94].mxu0  ;;  %5183 = vmatprep.subr.bf16.mxu1 %v10790_v15 }
 0x4bd   :  { %14064 = vst [vmem:[#allocation46_spill] sm:$0xff] %v12997_v55  ;;  %v13003_v49 = vpack.c.bf16 %v4633_v3, %v4630_v2  ;;  %v13005_v51 = vmax.f32 %v3776_v30, %v3786_v46  ;;  %v3788_v59 = vpop.f32.mrb[95].mxu0 }
 0x4be   :  { %14065 = vst [vmem:[#allocation47_spill] sm:$0xff] %v12999_v12  ;;  %v13007_v48 = vpack.c.bf16 %v4634_v27, %v4631_v10  ;;  %v13009_v45 = vmax.f32 %v3778_v41, %v3788_v59  ;;  %4324 = vrot.lane.b32.xlu0 %v12999_v12, %s11269_s1 }
 0x4bf   :  { %14066 = vst [vmem:[#allocation48_spill] sm:$0xff] %v13005_v51  ;;  %v4249_v62 = vpop.permute.xlu0 %4248  ;;  %5184 = vmatpush1.bf16.msra.mxu1 %v10788_v56 }
 0x4c0   :  { %14067 = vst [vmem:[#allocation49_spill] sm:$0xff] %v13009_v45  ;;  %5108 = vmatprep.mubr.bf16.mxu1 %v13007_v48  ;;  %v4435_v30 = vsel %vm4378_vm1, %v12781_v7, %v4249_v62  ;;  %4326 = vrot.lane.b32.xlu1 %v13009_v45, %s11269_s1  ;;  %v14095_v45 = vld [vmem:[#allocation35_spill] sm:$0xff] }
 0x4c1   :  { %v4477_v41 = vmax.f32 %v12476_v14, %v4435_v30  ;;  %5109 = vmatmul.mubr.bf16.gmra.mrb[56].mxu1 %v13003_v49  ;;  %v4251_v26 = vpop.permute.xlu1 %4250  ;;  %5522 = vmatprep.subr.bf16.mxu1 %v10793_v58 }
 0x4c2   :  { %v4436_v9 = vsel %vm4378_vm1, %v12785_v42, %v4251_v26  ;;  %4276 = vrot.lane.b32.xlu0 %v12997_v55, %s11269_s1  ;;  %v14089_v55 = vld [vmem:[#allocation26_spill] sm:$0xff] }
 0x4c3   :  { %v4566_v31 = vadd.f32 %v12661_v23, %v4477_v41  ;;  %v4480_v33 = vmax.f32 %v12478_v20, %v4436_v9  ;;  %v4297_v28 = vpop.permute.xlu0 %4296 }
 0x4c4   :  { %v4387_v14 = vsel %vm4378_vm1, %v4297_v28, %v12781_v7  ;;  %v4411_v1 = vsel %vm4378_vm1, %v4249_v62, %v4297_v28  ;;  %4278 = vrot.lane.b32.xlu1 %v13005_v51, %s11269_s1  ;;  %v14069_v28 = vld [vmem:[#allocation8_spill] sm:$0xff] }
 0x4c5   :  { %v4569_v2 = vadd.f32 %v12661_v23, %v4480_v33  ;;  %v4475_v3 = vmax.f32 %v12711_v37, %v4411_v1  ;;  %v4476_v8 = vmax.f32 %v12713_v40, %v4387_v14  ;;  %v4299_v15 = vpop.permute.xlu1 %4298  ;;  %v4638_v10 = vmax.f32 %v4566_v31, 0.0 }
 0x4c6   :  { %v4388_v20 = vsel %vm4378_vm1, %v4299_v15, %v12785_v42  ;;  %v4412_v7 = vsel %vm4378_vm1, %v4251_v26, %v4299_v15  ;;  %v14071_v15 = vld [vmem:[#allocation9_spill] sm:$0xff] }
 0x4c7   :  { %v4641_v27 = vmax.f32 %v4569_v2, 0.0  ;;  %v4564_v46 = vadd.f32 %v12850_v29, %v4475_v3  ;;  %v4478_v59 = vmax.f32 %v12715_v44, %v4412_v7  ;;  %v4565_v56 = vadd.f32 %v12855_v24, %v4476_v8  ;;  %v14068_v44 = vld [vmem:[#allocation28_spill] sm:$0xff]  ;;  %v14070_v2 = vld [vmem:[#allocation29_spill] sm:$0xff] }
 0x4c8   :  { %v4479_v37 = vmax.f32 %v12719_v54, %v4388_v20 }
 0x4c9   :  { %v13047_v62 = vpack.c.bf16 %v4641_v27, %v4638_v10  ;;  %v4567_v40 = vadd.f32 %v12850_v29, %v4478_v59  ;;  %v4636_v42 = vmax.f32 %v4564_v46, 0.0  ;;  %v4637_v41 = vmax.f32 %v4565_v56, 0.0  ;;  %v14072_v59 = vld [vmem:[#allocation16_spill] sm:$0xff] }
 0x4ca   :  { %v4568_v58 = vadd.f32 %v12855_v24, %v4479_v37  ;;  %v14073_v37 = vld [vmem:[#allocation17_spill] sm:$0xff] }
 0x4cb   :  { %v4639_v30 = vmax.f32 %v4567_v40, 0.0 }
 0x4cc   :  { %v4640_v26 = vmax.f32 %v4568_v58, 0.0 }
 0x4cd   :  { %v13051_v9 = vpack.c.bf16 %v4639_v30, %v4636_v42 }
 0x4ce   :  { %v13053_v31 = vpack.c.bf16 %v4640_v26, %v4637_v41 }
 0x4cf   :  { %v4253_v33 = vpop.permute.xlu0 %4252 }
 0x4d0   :  { %5118 = vmatprep.mubr.bf16.mxu1 %v13053_v31  ;;  %v4437_v54 = vsel %vm4378_vm1, %v14068_v44, %v4253_v33 }
 0x4d1   :  { %v4483_v14 = vmax.f32 %v14069_v28, %v4437_v54  ;;  %5119 = vmatmul.mubr.bf16.gmra.mrb[60].mxu1 %v13051_v9  ;;  %v4255_v1 = vpop.permute.xlu1 %4254  ;;  %v14074_v54 = vld [vmem:[#allocation18_spill] sm:$0xff] }
 0x4d2   :  { %v4438_v3 = vsel %vm4378_vm1, %v14070_v2, %v4255_v1 }
 0x4d3   :  { %v4572_v8 = vadd.f32 %v12661_v23, %v4483_v14  ;;  %v4486_v20 = vmax.f32 %v14071_v15, %v4438_v3  ;;  %v4301_v7 = vpop.permute.xlu0 %4300  ;;  %v14075_v14 = vld [vmem:[#allocation19_spill] sm:$0xff] }
 0x4d4   :  { %v4389_v10 = vsel %vm4378_vm1, %v4301_v7, %v14068_v44  ;;  %v4413_v27 = vsel %vm4378_vm1, %v4253_v33, %v4301_v7 }
 0x4d5   :  { %v4575_v46 = vadd.f32 %v12661_v23, %v4486_v20  ;;  %v4481_v56 = vmax.f32 %v14072_v59, %v4413_v27  ;;  %v4482_v40 = vmax.f32 %v14073_v37, %v4389_v10  ;;  %v4303_v58 = vpop.permute.xlu1 %4302  ;;  %v4644_v41 = vmax.f32 %v4572_v8, 0.0 }
 0x4d6   :  { %v4390_v42 = vsel %vm4378_vm1, %v4303_v58, %v14070_v2  ;;  %v4414_v30 = vsel %vm4378_vm1, %v4255_v1, %v4303_v58 }
 0x4d7   :  { %v4647_v26 = vmax.f32 %v4575_v46, 0.0  ;;  %v4570_v44 = vadd.f32 %v12850_v29, %v4481_v56  ;;  %v4484_v33 = vmax.f32 %v14074_v54, %v4414_v30  ;;  %v4571_v28 = vadd.f32 %v12855_v24, %v4482_v40  ;;  %v14076_v56 = vld [vmem:[#allocation30_spill] sm:$0xff] }
 0x4d8   :  { %v4485_v3 = vmax.f32 %v14075_v14, %v4390_v42  ;;  %v14077_v40 = vld [vmem:[#allocation10_spill] sm:$0xff] }
 0x4d9   :  { %v13083_v15 = vpack.c.bf16 %v4647_v26, %v4644_v41  ;;  %v4573_v20 = vadd.f32 %v12850_v29, %v4484_v33  ;;  %v4642_v2 = vmax.f32 %v4570_v44, 0.0  ;;  %v4643_v27 = vmax.f32 %v4571_v28, 0.0  ;;  %v14078_v26 = vld [vmem:[#allocation11_spill] sm:$0xff] }
 0x4da   :  { %v4574_v7 = vadd.f32 %v12855_v24, %v4485_v3  ;;  %v14079_v3 = vld [vmem:[#allocation20_spill] sm:$0xff] }
 0x4db   :  { %v4645_v10 = vmax.f32 %v4573_v20, 0.0 }
 0x4dc   :  { %v4646_v1 = vmax.f32 %v4574_v7, 0.0  ;;  %v14080_v7 = vld [vmem:[#allocation21_spill] sm:$0xff] }
 0x4dd   :  { %v13087_v8 = vpack.c.bf16 %v4645_v10, %v4642_v2 }
 0x4de   :  { %v13089_v46 = vpack.c.bf16 %v4646_v1, %v4643_v27 }
 0x4df   :  { %v4257_v59 = vpop.permute.xlu0 %4256 }
 0x4e0   :  { %5128 = vmatprep.mubr.bf16.mxu1 %v13089_v46  ;;  %v4439_v37 = vsel %vm4378_vm1, %v14076_v56, %v4257_v59 }
 0x4e1   :  { %v4489_v58 = vmax.f32 %v14077_v40, %v4439_v37  ;;  %5129 = vmatmul.mubr.bf16.gmra.mrb[64].mxu1 %v13087_v8  ;;  %v4259_v42 = vpop.permute.xlu1 %4258 }
 0x4e2   :  { %v4440_v30 = vsel %vm4378_vm1, %v12801_v61, %v4259_v42 }
 0x4e3   :  { %v4578_v41 = vadd.f32 %v12661_v23, %v4489_v58  ;;  %v4492_v44 = vmax.f32 %v14078_v26, %v4440_v30  ;;  %v4305_v54 = vpop.permute.xlu0 %4304  ;;  %v14081_v58 = vld [vmem:[#allocation22_spill] sm:$0xff]  ;;  %v14082_v26 = vld [vmem:[#allocation23_spill] sm:$0xff] }
 0x4e4   :  { %v4391_v33 = vsel %vm4378_vm1, %v4305_v54, %v14076_v56  ;;  %v4415_v28 = vsel %vm4378_vm1, %v4257_v59, %v4305_v54 }
 0x4e5   :  { %v4581_v14 = vadd.f32 %v12661_v23, %v4492_v44  ;;  %v4487_v20 = vmax.f32 %v14079_v3, %v4415_v28  ;;  %v4488_v2 = vmax.f32 %v14080_v7, %v4391_v33  ;;  %v4307_v10 = vpop.permute.xlu1 %4306  ;;  %v4650_v37 = vmax.f32 %v4578_v41, 0.0 }
 0x4e6   :  { %v4392_v27 = vsel %vm4378_vm1, %v4307_v10, %v12801_v61  ;;  %v4416_v1 = vsel %vm4378_vm1, %v4259_v42, %v4307_v10 }
 0x4e7   :  { %v4653_v40 = vmax.f32 %v4581_v14, 0.0  ;;  %v4576_v56 = vadd.f32 %v12850_v29, %v4487_v20  ;;  %v4490_v59 = vmax.f32 %v14081_v58, %v4416_v1  ;;  %v4577_v30 = vadd.f32 %v12855_v24, %v4488_v2  ;;  %v14083_v2 = vld [vmem:[#allocation31_spill] sm:$0xff] }
 0x4e8   :  { %v4491_v44 = vmax.f32 %v14082_v26, %v4392_v27  ;;  %v14084_v27 = vld [vmem:[#allocation12_spill] sm:$0xff] }
 0x4e9   :  { %v13119_v54 = vpack.c.bf16 %v4653_v40, %v4650_v37  ;;  %v4579_v33 = vadd.f32 %v12850_v29, %v4490_v59  ;;  %v4648_v61 = vmax.f32 %v4576_v56, 0.0  ;;  %v4649_v7 = vmax.f32 %v4577_v30, 0.0  ;;  %v14085_v40 = vld [vmem:[#allocation34_spill] sm:$0xff]  ;;  %v14086_v59 = vld [vmem:[#allocation13_spill] sm:$0xff] }
 0x4ea   :  { %v4580_v28 = vadd.f32 %v12855_v24, %v4491_v44 }
 0x4eb   :  { %v4651_v3 = vmax.f32 %v4579_v33, 0.0 }
 0x4ec   :  { %v4652_v42 = vmax.f32 %v4580_v28, 0.0 }
 0x4ed   :  { %v13123_v41 = vpack.c.bf16 %v4651_v3, %v4648_v61  ;;  %v14087_v61 = vld [vmem:[#allocation24_spill] sm:$0xff] }
 0x4ee   :  { %v13125_v14 = vpack.c.bf16 %v4652_v42, %v4649_v7  ;;  %v14088_v7 = vld [vmem:[#allocation25_spill] sm:$0xff] }
 0x4ef   :  { %v4261_v20 = vpop.permute.xlu0 %4260 }
 0x4f0   :  { %5138 = vmatprep.mubr.bf16.mxu1 %v13125_v14  ;;  %v4441_v10 = vsel %vm4378_vm1, %v14083_v2, %v4261_v20 }
 0x4f1   :  { %v4495_v1 = vmax.f32 %v14084_v27, %v4441_v10  ;;  %5139 = vmatmul.mubr.bf16.gmra.mrb[68].mxu1 %v13123_v41  ;;  %v4263_v37 = vpop.permute.xlu1 %4262 }
 0x4f2   :  { %v4442_v56 = vsel %vm4378_vm1, %v14085_v40, %v4263_v37 }
 0x4f3   :  { %v4584_v58 = vadd.f32 %v12661_v23, %v4495_v1  ;;  %v4498_v30 = vmax.f32 %v14086_v59, %v4442_v56  ;;  %v4309_v26 = vpop.permute.xlu0 %4308 }
 0x4f4   :  { %v4393_v44 = vsel %vm4378_vm1, %v4309_v26, %v14083_v2  ;;  %v4417_v33 = vsel %vm4378_vm1, %v4261_v20, %v4309_v26  ;;  %v14090_v26 = vld [vmem:[#allocation27_spill] sm:$0xff] }
 0x4f5   :  { %v4587_v28 = vadd.f32 %v12661_v23, %v4498_v30  ;;  %v4493_v3 = vmax.f32 %v14087_v61, %v4417_v33  ;;  %v4494_v42 = vmax.f32 %v14088_v7, %v4393_v44  ;;  %v4311_v10 = vpop.permute.xlu1 %4310  ;;  %v4656_v56 = vmax.f32 %v4584_v58, 0.0 }
 0x4f6   :  { %v4394_v27 = vsel %vm4378_vm1, %v4311_v10, %v14085_v40  ;;  %v4418_v1 = vsel %vm4378_vm1, %v4263_v37, %v4311_v10 }
 0x4f7   :  { %v4659_v59 = vmax.f32 %v4587_v28, 0.0  ;;  %v4582_v2 = vadd.f32 %v12850_v29, %v4493_v3  ;;  %v4496_v20 = vmax.f32 %v14089_v55, %v4418_v1  ;;  %v4583_v30 = vadd.f32 %v12855_v24, %v4494_v42  ;;  %v4361_v58 = vpop.permute.xlu0 %4360 }
 0x4f8   :  { %v4497_v33 = vmax.f32 %v14090_v26, %v4394_v27  ;;  %v14091_v27 = vld [vmem:[#allocation33_spill] sm:$0xff] }
 0x4f9   :  { %v13155_v61 = vpack.c.bf16 %v4659_v59, %v4656_v56  ;;  %v4585_v44 = vadd.f32 %v12850_v29, %v4496_v20  ;;  %v4654_v40 = vmax.f32 %v4582_v2, 0.0  ;;  %v4655_v12 = vmax.f32 %v4583_v30, 0.0  ;;  %v4363_v55 = vpop.permute.xlu1 %4362  ;;  %v14092_v2 = vld [vmem:[#allocation36_spill] sm:$0xff] }
 0x4fa   :  { %v4586_v7 = vadd.f32 %v12855_v24, %v4497_v33 }
 0x4fb   :  { %v4657_v51 = vmax.f32 %v4585_v44, 0.0  ;;  %v14093_v44 = vld [vmem:[#allocation32_spill] sm:$0xff] }
 0x4fc   :  { %v4658_v37 = vmax.f32 %v4586_v7, 0.0 }
 0x4fd   :  { %v13159_v28 = vpack.c.bf16 %v4657_v51, %v4654_v40  ;;  %v14094_v40 = vld [vmem:[#allocation14_spill] sm:$0xff] }
 0x4fe   :  { %v13161_v3 = vpack.c.bf16 %v4658_v37, %v4655_v12 }
 0x500   :  { %5148 = vmatprep.mubr.bf16.mxu1 %v13161_v3  ;;  %v4313_v42 = vpop.permute.xlu0 %4312 }
 0x501   :  { %5149 = vmatmul.mubr.bf16.gmra.mrb[72].mxu1 %v13159_v28  ;;  %v4395_v10 = vsel %vm4378_vm1, %v4313_v42, %v4361_v58 }
 0x502   :  { %v4500_v1 = vmax.f32 %v14091_v27, %v4395_v10  ;;  %v4315_v56 = vpop.permute.xlu1 %4314 }
 0x503   :  { %v4396_v59 = vsel %vm4378_vm1, %v4315_v56, %v4363_v55 }
 0x504   :  { %v4589_v51 = vadd.f32 %v12855_v24, %v4500_v1  ;;  %v4503_v12 = vmax.f32 %v14092_v2, %v4396_v59  ;;  %v4265_v20 = vpop.permute.xlu0 %4264 }
 0x505   :  { %v4419_v30 = vsel %vm4378_vm1, %v4265_v20, %v4313_v42  ;;  %v4443_v26 = vsel %vm4378_vm1, %v4361_v58, %v4265_v20  ;;  %v14096_v20 = vld [vmem:[#allocation15_spill] sm:$0xff] }
 0x506   :  { %v4592_v33 = vadd.f32 %v12855_v24, %v4503_v12  ;;  %v4499_v7 = vmax.f32 %v14093_v44, %v4419_v30  ;;  %v4501_v37 = vmax.f32 %v14094_v40, %v4443_v26  ;;  %v4267_v10 = vpop.permute.xlu1 %4266  ;;  %v4661_v59 = vmax.f32 %v4589_v51, 0.0 }
 0x507   :  { %v4420_v27 = vsel %vm4378_vm1, %v4267_v10, %v4315_v56  ;;  %v4444_v1 = vsel %vm4378_vm1, %v4363_v55, %v4267_v10 }
 0x508   :  { %v4664_v2 = vmax.f32 %v4592_v33, 0.0  ;;  %v4588_v42 = vadd.f32 %v12850_v29, %v4499_v7  ;;  %v4502_v36 = vmax.f32 %v14095_v45, %v4420_v27  ;;  %v13185_v58 = vpop.permute.xlu0 %4280  ;;  %v4590_v12 = vadd.f32 %v12661_v23, %v4501_v37 }
 0x509   :  { %v4504_v30 = vmax.f32 %v14096_v20, %v4444_v1 }
 0x50a   :  { %v13189_v26 = vpack.c.bf16 %v4664_v2, %v4661_v59  ;;  %v4591_v44 = vadd.f32 %v12850_v29, %v4502_v36  ;;  %v13192_v56 = vpop.permute.xlu1 %4282  ;;  %v4660_v51 = vmax.f32 %v4588_v42, 0.0  ;;  %v4662_v45 = vmax.f32 %v4590_v12, 0.0 }
 0x50b   :  { %v4593_v55 = vadd.f32 %v12661_v23, %v4504_v30  ;;  %v14099_v59 = vmov 0  }
 0x50c   :  { %14097 = vst [vmem:[#allocation28_spill] sm:$0xff] %v13189_v26  ;;  %v4663_v33 = vmax.f32 %v4591_v44, 0.0  ;;  %v13195_v40 = vpop.permute.xlu0 %4328  ;;  %5158 = vmatprep.mubr.bf16.mxu1 %v13189_v26 }
 0x50d   :  { %v4665_v7 = vmax.f32 %v4593_v55, 0.0  ;;  %v10791_v55 = vld [vmem:[#allocation2] ss:$8 sps:$4 sm:$0xff]  }
 0x50e   :  { %v13198_v10 = vpack.c.bf16 %v4663_v33, %v4660_v51  ;;  %v13200_v37 = vpop.permute.xlu1 %4330  ;;  %v10796_v33 = vld [vmem:[#allocation2 + $0x14] ss:$8 sps:$4 sm:$0xff]  }
 0x50f   :  { %v13202_v27 = vpack.c.bf16 %v4665_v7, %v4662_v45 }
 0x510   :  { %14098 = vst [vmem:[#allocation8_spill] sm:$0xff] %v13198_v10  ;;  %v13204_v1 = vpop.permute.xlu0 %4232  ;;  %5159 = vmatmul.mubr.bf16.gmra.mrb[76].mxu1 %v13198_v10  ;;  %v10800_v10 = vld [vmem:[#allocation2 + $0x30] ss:$8 sps:$4 sm:$0xff]  }
 0x511   :  { %v4427_v36 = vsel %vm4378_vm1, %v13195_v40, %v13204_v1  ;;  %5201 = vmatprep.mubr.bf16.mxu1 %v14099_v59 }
 0x512   :  { %v4453_v2 = vmax.f32 %v12436_v6, %v4427_v36  ;;  %v13213_v42 = vpop.permute.xlu1 %4234 }
 0x513   :  { %v4428_v12 = vsel %vm4378_vm1, %v13200_v37, %v13213_v42 }
 0x514   :  { %v13219_v20 = vpop.permute.xlu0 %4364  ;;  %v4542_v30 = vadd.f32 %v12661_v23, %v4453_v2  ;;  %v4456_v44 = vmax.f32 %v12438_v13, %v4428_v12  ;;  %v10799_v13 = vld [vmem:[#allocation2 + $0x24] ss:$8 sps:$4 sm:$0xff]  }
 0x516   :  { %v13223_v51 = vpop.permute.xlu1 %4366  ;;  %v4545_v45 = vadd.f32 %v12661_v23, %v4456_v44  ;;  %v4614_v7 = vmax.f32 %v4542_v30, 0.0  ;;  %v10797_v30 = vld [vmem:[#allocation2 + $0x20] ss:$8 sps:$4 sm:$0xff]  }
 0x518   :  { %5202 = vmatmul.mubr.bf16.vlgmr.msra.gmra.mrb[48].mxu1 %v12867_v35  ;;  %v13227_v6 = vpop.permute.xlu0 %4316  ;;  %v4617_v36 = vmax.f32 %v4545_v45, 0.0 }
 0x519   :  { %5523 = vmatpush1.bf16.msra.mxu1 %v10791_v55  ;;  %5211 = vmatprep.mubr.bf16.mxu1 %v14099_v59 }
 0x51a   :  { %v13230_v21 = vpop.permute.xlu1 %4318  ;;  %5524 = vmatprep.subr.bf16.mxu1 %v10796_v33  ;;  %v13232_v2 = vpack.c.bf16 %v4617_v36, %v4614_v7 }
 0x51c   :  { %v13234_v12 = vpop.permute.xlu0 %4268 }
 0x51d   :  { %14100 = vst [vmem:[#allocation29_spill] sm:$0xff] %v13234_v12  ;;  %v4445_v44 = vsel %vm4378_vm1, %v13219_v20, %v13234_v12  ;;  %5525 = vmatpush1.bf16.msra.mxu1 %v10794_v53  ;;  %v10803_v12 = vld [vmem:[#allocation2 + $0x40] ss:$8 sps:$4 sm:$0xff]  }
 0x51e   :  { %v4507_v55 = vmax.f32 %v12527_v32, %v4445_v44  ;;  %v13241_v45 = vpop.permute.xlu1 %4270  ;;  %5526 = vmatprep.subr.bf16.mxu1 %v10799_v13  ;;  %v10805_v13 = vld [vmem:[#allocation2 + $0x44] ss:$8 sps:$4 sm:$0xff]  }
 0x51f   :  { %14101 = vst [vmem:[#allocation9_spill] sm:$0xff] %v13241_v45  ;;  %v4446_v33 = vsel %vm4378_vm1, %v13223_v51, %v13241_v45 }
 0x520   :  { %5212 = vmatmul.mubr.bf16.gmra.mrb[52].mxu1 %v12932_v22  ;;  %v13248_v7 = vpop.permute.xlu0 %4368  ;;  %v4596_v36 = vadd.f32 %v12661_v23, %v4507_v55  ;;  %v4510_v53 = vmax.f32 %v12529_v25, %v4446_v33  ;;  %v10808_v25 = vld [vmem:[#allocation2 + $0x54] ss:$8 sps:$4 sm:$0xff]   ;;  %v10806_v33 = vld [vmem:[#allocation2 + $0x50] ss:$8 sps:$4 sm:$0xff]  }
 0x521   :  { %14102 = vst [vmem:[#allocation16_spill] sm:$0xff] %v13248_v7  ;;  %5527 = vmatpush1.bf16.msra.mxu1 %v10797_v30  ;;  %5221 = vmatprep.mubr.bf16.mxu1 %v14099_v59 }
 0x522   :  { %v13253_v32 = vpop.permute.xlu1 %4370  ;;  %5528 = vmatprep.subr.bf16.mxu1 %v10802_v50  ;;  %v4599_v44 = vadd.f32 %v12661_v23, %v4510_v53  ;;  %v4668_v47 = vmax.f32 %v4596_v36, 0.0 }
 0x524   :  { %v13256_v16 = vpop.permute.xlu0 %4320  ;;  %v4671_v26 = vmax.f32 %v4599_v44, 0.0  ;;  %v10809_v44 = vld [vmem:[#allocation2 + $0x60] ss:$8 sps:$4 sm:$0xff]  }
 0x525   :  { %14103 = vst [vmem:[#allocation17_spill] sm:$0xff] %v13256_v16  ;;  %5529 = vmatpush1.bf16.msra.mxu1 %v10800_v10 }
 0x526   :  { %v13258_v45 = vpop.permute.xlu1 %4322  ;;  %5530 = vmatprep.subr.bf16.mxu1 %v10805_v13  ;;  %v13260_v30 = vpack.c.bf16 %v4671_v26, %v4668_v47  ;;  %v10811_v47 = vld [vmem:[#allocation2 + $0x64] ss:$8 sps:$4 sm:$0xff]  }
 0x528   :  { %5222 = vmatmul.mubr.bf16.gmra.mrb[56].mxu1 %v12991_v52  ;;  %v13263_v55 = vpop.permute.xlu0 %4272 }
 0x529   :  { %14104 = vst [vmem:[#allocation18_spill] sm:$0xff] %v13263_v55  ;;  %v4447_v50 = vsel %vm4378_vm1, %v13248_v7, %v13263_v55  ;;  %5531 = vmatpush1.bf16.msra.mxu1 %v10803_v12  ;;  %5231 = vmatprep.mubr.bf16.mxu1 %v14099_v59  ;;  %v10812_v7 = vld [vmem:[#allocation2 + $0x70] ss:$8 sps:$4 sm:$0xff]  }
 0x52a   :  { %v4513_v10 = vmax.f32 %v12534_v63, %v4447_v50  ;;  %v13271_v36 = vpop.permute.xlu1 %4274  ;;  %5532 = vmatprep.subr.bf16.mxu1 %v10808_v25  ;;  %v10814_v63 = vld [vmem:[#allocation2 + $0x74] ss:$8 sps:$4 sm:$0xff]  }
 0x52b   :  { %14105 = vst [vmem:[#allocation19_spill] sm:$0xff] %v13271_v36  ;;  %v4448_v26 = vsel %vm4378_vm1, %v13253_v32, %v13271_v36 }
 0x52c   :  { %v13277_v53 = vpop.permute.xlu0 %4372  ;;  %v4602_v13 = vadd.f32 %v12661_v23, %v4513_v10  ;;  %v4516_v12 = vmax.f32 %v12536_v19, %v4448_v26  ;;  %v10817_v19 = vld [vmem:[#allocation2 + $0x84] ss:$8 sps:$4 sm:$0xff]  }
 0x52d   :  { %14106 = vst [vmem:[#allocation30_spill] sm:$0xff] %v13277_v53  ;;  %5533 = vmatpush1.bf16.msra.mxu1 %v10806_v33 }
 0x52e   :  { %v13281_v55 = vpop.permute.xlu1 %4374  ;;  %5534 = vmatprep.subr.bf16.mxu1 %v10811_v47  ;;  %v4605_v25 = vadd.f32 %v12661_v23, %v4516_v12  ;;  %v4674_v16 = vmax.f32 %v4602_v13, 0.0  ;;  %v10815_v13 = vld [vmem:[#allocation2 + $0x80] ss:$8 sps:$4 sm:$0xff]  }
 0x530   :  { %5232 = vmatmul.mubr.bf16.gmra.mrb[60].mxu1 %v13047_v62  ;;  %v13285_v50 = vpop.permute.xlu0 %4324  ;;  %v4677_v36 = vmax.f32 %v4605_v25, 0.0  ;;  %v10820_v25 = vld [vmem:[#allocation2 + $0x94] ss:$8 sps:$4 sm:$0xff]  }
 0x531   :  { %14107 = vst [vmem:[#allocation10_spill] sm:$0xff] %v13285_v50  ;;  %5535 = vmatpush1.bf16.msra.mxu1 %v10809_v44  ;;  %5241 = vmatprep.mubr.bf16.mxu1 %v14099_v59  ;;  %v10821_v50 = vld [vmem:[#allocation2 + $0xa0] ss:$8 sps:$4 sm:$0xff]  }
 0x532   :  { %v13288_v10 = vpop.permute.xlu1 %4326  ;;  %5536 = vmatprep.subr.bf16.mxu1 %v10814_v63  ;;  %v13290_v33 = vpack.c.bf16 %v4677_v36, %v4674_v16 }
 0x534   :  { %v13292_v47 = vpop.permute.xlu0 %4276 }
 0x535   :  { %14108 = vst [vmem:[#allocation11_spill] sm:$0xff] %v13292_v47  ;;  %v4449_v26 = vsel %vm4378_vm1, %v13277_v53, %v13292_v47  ;;  %5537 = vmatpush1.bf16.msra.mxu1 %v10812_v7  ;;  %v10818_v7 = vld [vmem:[#allocation2 + $0x90] ss:$8 sps:$4 sm:$0xff]  }
 0x536   :  { %v4519_v12 = vmax.f32 %v12541_v38, %v4449_v26  ;;  %v13299_v44 = vpop.permute.xlu1 %4278  ;;  %5538 = vmatprep.subr.bf16.mxu1 %v10817_v19  ;;  %v10823_v38 = vld [vmem:[#allocation2 + $0xa4] ss:$8 sps:$4 sm:$0xff]  }
 0x537   :  { %14109 = vst [vmem:[#allocation20_spill] sm:$0xff] %v13299_v44  ;;  %v4450_v16 = vsel %vm4378_vm1, %v13281_v55, %v13299_v44  ;;  %v10826_v44 = vld [vmem:[#allocation2 + $0xb4] ss:$8 sps:$4 sm:$0xff]  }
 0x538   :  { %5242 = vmatmul.mubr.bf16.gmra.mrb[64].mxu1 %v13083_v15  ;;  %v4608_v36 = vadd.f32 %v12661_v23, %v4519_v12  ;;  %v4522_v63 = vmax.f32 %v12543_v11, %v4450_v16  ;;  %v4380_v11 = vsel %vm4378_vm1, %v13192_v56, %v13200_v37  ;;  %v10829_v12 = vld [vmem:[#allocation2 + $0xc4] ss:$8 sps:$4 sm:$0xff]   ;;  %v10827_v16 = vld [vmem:[#allocation2 + $0xc0] ss:$8 sps:$4 sm:$0xff]   ;;  %v10832_v37 = vld [vmem:[#allocation2 + $0xd4] ss:$8 sps:$4 sm:$0xff]  }
 0x539   :  { %5539 = vmatpush1.bf16.msra.mxu1 %v10815_v13  ;;  %5251 = vmatprep.mubr.bf16.mxu1 %v14099_v59  ;;  %v10824_v13 = vld [vmem:[#allocation2 + $0xb0] ss:$8 sps:$4 sm:$0xff]  }
 0x53a   :  { %5540 = vmatprep.subr.bf16.mxu1 %v10820_v25  ;;  %v4611_v19 = vadd.f32 %v12661_v23, %v4522_v63  ;;  %v4680_v26 = vmax.f32 %v4608_v36, 0.0  ;;  %v4379_v23 = vsel %vm4378_vm1, %v13185_v58, %v13195_v40  ;;  %v4404_v36 = vsel %vm4378_vm1, %v13213_v42, %v13192_v56  ;;  %v10835_v63 = vld [vmem:[#allocation2 + $0xe4] ss:$8 sps:$4 sm:$0xff]  }
 0x53b   :  { %v4452_v25 = vmax.f32 %v12645_v18, %v4379_v23  ;;  %v4403_v18 = vsel %vm4378_vm1, %v13204_v1, %v13185_v58 }
 0x53c   :  { %v4683_v47 = vmax.f32 %v4611_v19, 0.0  ;;  %v4451_v56 = vmax.f32 %v12643_v4, %v4403_v18  ;;  %v10839_v4 = vld [vmem:[#allocation2 + $0x100] ss:$8 sps:$4 sm:$0xff]   ;;  %v10853_v18 = vld [vmem:[#allocation2 + $0x144] ss:$8 sps:$4 sm:$0xff]  }
 0x53d   :  { %5541 = vmatpush1.bf16.msra.mxu1 %v10818_v7  ;;  %v4541_v40 = vadd.f32 %v12855_v24, %v4452_v25  ;;  %v10842_v25 = vld [vmem:[#allocation2 + $0x110] ss:$8 sps:$4 sm:$0xff]  }
 0x53e   :  { %5542 = vmatprep.subr.bf16.mxu1 %v10823_v38  ;;  %v13310_v53 = vpack.c.bf16 %v4683_v47, %v4680_v26  ;;  %v4455_v47 = vmax.f32 %v12652_v5, %v4380_v11  ;;  %v10830_v5 = vld [vmem:[#allocation2 + $0xd0] ss:$8 sps:$4 sm:$0xff]   ;;  %v10833_v38 = vld [vmem:[#allocation2 + $0xe0] ss:$8 sps:$4 sm:$0xff]   ;;  %v10838_v26 = vld [vmem:[#allocation2 + $0xf4] ss:$8 sps:$4 sm:$0xff]   ;;  %v4540_v58 = vadd.f32 %v12850_v29, %v4451_v56 }
 0x53f   :  { %v4613_v42 = vmax.f32 %v4541_v40, 0.0  ;;  %v10848_v40 = vld [vmem:[#allocation2 + $0x130] ss:$8 sps:$4 sm:$0xff]   ;;  %v10862_v56 = vld [vmem:[#allocation2 + $0x174] ss:$8 sps:$4 sm:$0xff]  }
 0x540   :  { %5252 = vmatmul.mubr.bf16.gmra.mrb[68].mxu1 %v13119_v54  ;;  %v4612_v23 = vmax.f32 %v4540_v58, 0.0  ;;  %v10871_v58 = vld [vmem:[#allocation2 + $0x324] ss:$8 sps:$4 sm:$0xff]  }
 0x541   :  { %5543 = vmatpush1.bf16.msra.mxu1 %v10821_v50  ;;  %5261 = vmatprep.mubr.bf16.mxu1 %v14099_v59  ;;  %v4544_v50 = vadd.f32 %v12855_v24, %v4455_v47  ;;  %v10844_v47 = vld [vmem:[#allocation2 + $0x114] ss:$8 sps:$4 sm:$0xff]  }
 0x542   :  { %5544 = vmatprep.subr.bf16.mxu1 %v10826_v44  ;;  %v4454_v44 = vmax.f32 %v12647_v60, %v4404_v36  ;;  %v10836_v60 = vld [vmem:[#allocation2 + $0xf0] ss:$8 sps:$4 sm:$0xff]   ;;  %v14110_v36 = vld [vmem:[#allocation41_spill] sm:$0xff] }
 0x543   :  { %v4616_v7 = vmax.f32 %v4544_v50, 0.0  ;;  %v10850_v50 = vld [vmem:[#allocation2 + $0x134] ss:$8 sps:$4 sm:$0xff]  }
 0x544   :  { %v4543_v19 = vadd.f32 %v12850_v29, %v4454_v44  ;;  %v10854_v44 = vld [vmem:[#allocation2 + $0x150] ss:$8 sps:$4 sm:$0xff]  }
 0x545   :  { %5545 = vmatpush1.bf16.msra.mxu1 %v10824_v13  ;;  %v4685_v11 = vpack.c.bf16 %v4616_v7, %v4613_v42  ;;  %v10841_v13 = vld [vmem:[#allocation2 + $0x104] ss:$8 sps:$4 sm:$0xff]   ;;  %v10857_v7 = vld [vmem:[#allocation2 + $0x160] ss:$8 sps:$4 sm:$0xff]   ;;  %v10860_v42 = vld [vmem:[#allocation2 + $0x170] ss:$8 sps:$4 sm:$0xff]  }
 0x546   :  { %5546 = vmatprep.subr.bf16.mxu1 %v10829_v12  ;;  %v4615_v1 = vmax.f32 %v4543_v19, 0.0  ;;  %v10863_v19 = vld [vmem:[#allocation2 + $0x300] ss:$8 sps:$4 sm:$0xff]  }
 0x548   :  { %5262 = vmatmul.mubr.bf16.gmra.mrb[72].mxu1 %v13155_v61  ;;  %v4684_v12 = vpack.c.bf16 %v4615_v1, %v4612_v23  ;;  %v10874_v1 = vld [vmem:[#allocation2 + $0x334] ss:$8 sps:$4 sm:$0xff]   ;;  %v10877_v23 = vld [vmem:[#allocation2 + $0x344] ss:$8 sps:$4 sm:$0xff]  }
 0x549   :  { %5547 = vmatpush1.bf16.msra.mxu1 %v10827_v16  ;;  %5271 = vmatprep.mubr.bf16.mxu1 %v14099_v59  ;;  %v10847_v16 = vld [vmem:[#allocation2 + $0x124] ss:$8 sps:$4 sm:$0xff]  }
 0x54a   :  { %5548 = vmatprep.subr.bf16.mxu1 %v10832_v37  ;;  %v10845_v37 = vld [vmem:[#allocation2 + $0x120] ss:$8 sps:$4 sm:$0xff]  }
 0x54d   :  { %5549 = vmatpush1.bf16.msra.mxu1 %v10830_v5  ;;  %v10851_v5 = vld [vmem:[#allocation2 + $0x140] ss:$8 sps:$4 sm:$0xff]  }
 0x54e   :  { %5550 = vmatprep.subr.bf16.mxu1 %v10835_v63  ;;  %v10859_v63 = vld [vmem:[#allocation2 + $0x164] ss:$8 sps:$4 sm:$0xff]  }
 0x550   :  { %5272 = vmatmul.mubr.bf16.gmra.mrb[76].mxu1 %v13202_v27 }
 0x551   :  { %5551 = vmatpush1.bf16.msra.mxu1 %v10833_v38  ;;  %5554 = vmatprep.mubr.bf16.mxu1 %v4685_v11  ;;  %v10865_v38 = vld [vmem:[#allocation2 + $0x304] ss:$8 sps:$4 sm:$0xff]   ;;  %v10866_v11 = vld [vmem:[#allocation2 + $0x310] ss:$8 sps:$4 sm:$0xff]  }
 0x552   :  { %5552 = vmatprep.subr.bf16.mxu1 %v10838_v26  ;;  %v10868_v26 = vld [vmem:[#allocation2 + $0x314] ss:$8 sps:$4 sm:$0xff]  }
 0x555   :  { %5553 = vmatpush1.bf16.msra.mxu1 %v10836_v60  ;;  %v10869_v60 = vld [vmem:[#allocation2 + $0x320] ss:$8 sps:$4 sm:$0xff]  }
 0x556   :  { %5635 = vmatprep.subr.bf16.mxu1 %v10841_v13  ;;  %v10872_v13 = vld [vmem:[#allocation2 + $0x330] ss:$8 sps:$4 sm:$0xff]  }
 0x558   :  { %5555 = vmatmul.mubr.bf16.vlgmr.msra.gmra.mrb[48].mxu1 %v4684_v12  ;;  %v10878_v12 = vld [vmem:[#allocation2 + $0x350] ss:$8 sps:$4 sm:$0xff]  }
 0x559   :  { %5564 = vmatprep.mubr.bf16.mxu1 %v12896_v43  ;;  %5636 = vmatpush1.bf16.msra.mxu1 %v10839_v4  ;;  %v10856_v43 = vld [vmem:[#allocation2 + $0x154] ss:$8 sps:$4 sm:$0xff]  }
 0x55a   :  { %5637 = vmatprep.subr.bf16.mxu1 %v10844_v47  ;;  %v10880_v4 = vld [vmem:[#allocation2 + $0x354] ss:$8 sps:$4 sm:$0xff]   ;;  %v10883_v47 = vld [vmem:[#allocation2 + $0x364] ss:$8 sps:$4 sm:$0xff]  }
 0x55d   :  { %5638 = vmatpush1.bf16.msra.mxu1 %v10842_v25  ;;  %v10886_v25 = vld [vmem:[#allocation2 + $0x374] ss:$8 sps:$4 sm:$0xff]  }
 0x55e   :  { %5639 = vmatprep.subr.bf16.mxu1 %v10847_v16  ;;  %v10884_v16 = vld [vmem:[#allocation2 + $0x370] ss:$8 sps:$4 sm:$0xff]  }
 0x560   :  { %5565 = vmatmul.mubr.bf16.gmra.mrb[52].mxu1 %v14110_v36  ;;  %v10892_v36 = vld [vmem:[#allocation2 + $0x394] ss:$8 sps:$4 sm:$0xff]  }
 0x561   :  { %5574 = vmatprep.mubr.bf16.mxu1 %v12951_v39  ;;  %5640 = vmatpush1.bf16.msra.mxu1 %v10845_v37  ;;  %v10889_v37 = vld [vmem:[#allocation2 + $0x384] ss:$8 sps:$4 sm:$0xff]  }
 0x562   :  { %5641 = vmatprep.subr.bf16.mxu1 %v10850_v50  ;;  %v10887_v50 = vld [vmem:[#allocation2 + $0x380] ss:$8 sps:$4 sm:$0xff]  }
 0x565   :  { %5642 = vmatpush1.bf16.msra.mxu1 %v10848_v40  ;;  %v10890_v40 = vld [vmem:[#allocation2 + $0x390] ss:$8 sps:$4 sm:$0xff]  }
 0x566   :  { %5643 = vmatprep.subr.bf16.mxu1 %v10853_v18  ;;  %v10895_v18 = vld [vmem:[#allocation2 + $0x3a4] ss:$8 sps:$4 sm:$0xff]  }
 0x568   :  { %5575 = vmatmul.mubr.bf16.gmra.mrb[56].mxu1 %v12945_v34 }
 0x569   :  { %5584 = vmatprep.mubr.bf16.mxu1 %v13007_v48  ;;  %5644 = vmatpush1.bf16.msra.mxu1 %v10851_v5  ;;  %v10893_v5 = vld [vmem:[#allocation2 + $0x3a0] ss:$8 sps:$4 sm:$0xff]  }
 0x56a   :  { %5645 = vmatprep.subr.bf16.mxu1 %v10856_v43  ;;  %v10898_v43 = vld [vmem:[#allocation2 + $0x3b4] ss:$8 sps:$4 sm:$0xff]  }
 0x56d   :  { %5646 = vmatpush1.bf16.msra.mxu1 %v10854_v44  ;;  %v10896_v44 = vld [vmem:[#allocation2 + $0x3b0] ss:$8 sps:$4 sm:$0xff]  }
 0x56e   :  { %5647 = vmatprep.subr.bf16.mxu1 %v10859_v63  ;;  %v10901_v63 = vld [vmem:[#allocation2 + $0x3c4] ss:$8 sps:$4 sm:$0xff]  }
 0x570   :  { %5585 = vmatmul.mubr.bf16.gmra.mrb[60].mxu1 %v13003_v49 }
 0x571   :  { %5594 = vmatprep.mubr.bf16.mxu1 %v13053_v31  ;;  %5648 = vmatpush1.bf16.msra.mxu1 %v10857_v7  ;;  %v10899_v7 = vld [vmem:[#allocation2 + $0x3c0] ss:$8 sps:$4 sm:$0xff]  }
 0x572   :  { %5649 = vmatprep.subr.bf16.mxu1 %v10862_v56  ;;  %v10904_v56 = vld [vmem:[#allocation2 + $0x3d4] ss:$8 sps:$4 sm:$0xff]  }
 0x575   :  { %5650 = vmatpush1.bf16.msra.mxu1 %v10860_v42  ;;  %v10902_v42 = vld [vmem:[#allocation2 + $0x3d0] ss:$8 sps:$4 sm:$0xff]  }
 0x576   :  { %6036 = vmatprep.subr.bf16.mxu1 %v10865_v38  ;;  %v10907_v38 = vld [vmem:[#allocation2 + $0x3e4] ss:$8 sps:$4 sm:$0xff]  }
 0x578   :  { %5595 = vmatmul.mubr.bf16.gmra.mrb[64].mxu1 %v13051_v9 }
 0x579   :  { %5604 = vmatprep.mubr.bf16.mxu1 %v13089_v46 }
 0x580   :  { %5605 = vmatmul.mubr.bf16.gmra.mrb[68].mxu1 %v13087_v8 }
 0x581   :  { %5614 = vmatprep.mubr.bf16.mxu1 %v13125_v14 }
 0x588   :  { %5615 = vmatmul.mubr.bf16.gmra.mrb[72].mxu1 %v13123_v41 }
 0x589   :  { %5624 = vmatprep.mubr.bf16.mxu1 %v13161_v3 }
 0x590   :  { %5625 = vmatmul.mubr.bf16.gmra.mrb[76].mxu1 %v13159_v28 }
 0x591   :  { %5667 = vmatprep.mubr.bf16.mxu1 %v14099_v59 }
 0x598   :  { %5668 = vmatmul.mubr.bf16.vlgmr.msra.gmra.mrb[48].mxu1 %v13232_v2  ;;  %v10875_v2 = vld [vmem:[#allocation2 + $0x340] ss:$8 sps:$4 sm:$0xff]  }
 0x599   :  { %6037 = vmatpush1.bf16.msra.mxu1 %v10863_v19  ;;  %5677 = vmatprep.mubr.bf16.mxu1 %v14099_v59  ;;  %v10905_v19 = vld [vmem:[#allocation2 + $0x3e0] ss:$8 sps:$4 sm:$0xff]  }
 0x59a   :  { %6038 = vmatprep.subr.bf16.mxu1 %v10868_v26  ;;  %v10910_v26 = vld [vmem:[#allocation2 + $0x3f4] ss:$8 sps:$4 sm:$0xff]  }
 0x59d   :  { %6039 = vmatpush1.bf16.msra.mxu1 %v10866_v11  ;;  %v10908_v11 = vld [vmem:[#allocation2 + $0x3f0] ss:$8 sps:$4 sm:$0xff]  }
 0x59e   :  { %6040 = vmatprep.subr.bf16.mxu1 %v10871_v58  ;;  %v10913_v58 = vld [vmem:[#allocation2 + $0x404] ss:$8 sps:$4 sm:$0xff]  }
 0x5a0   :  { %5678 = vmatmul.mubr.bf16.gmra.mrb[52].mxu1 %v12867_v35  ;;  %v10881_v35 = vld [vmem:[#allocation2 + $0x360] ss:$8 sps:$4 sm:$0xff]  }
 0x5a1   :  { %6041 = vmatpush1.bf16.msra.mxu1 %v10869_v60  ;;  %5687 = vmatprep.mubr.bf16.mxu1 %v14099_v59  ;;  %v10911_v60 = vld [vmem:[#allocation2 + $0x400] ss:$8 sps:$4 sm:$0xff]  }
 0x5a2   :  { %6042 = vmatprep.subr.bf16.mxu1 %v10874_v1  ;;  %v10916_v1 = vld [vmem:[#allocation2 + $0x414] ss:$8 sps:$4 sm:$0xff]  }
 0x5a5   :  { %6043 = vmatpush1.bf16.msra.mxu1 %v10872_v13  ;;  %v10914_v13 = vld [vmem:[#allocation2 + $0x410] ss:$8 sps:$4 sm:$0xff]  }
 0x5a6   :  { %6044 = vmatprep.subr.bf16.mxu1 %v10877_v23  ;;  %v10919_v23 = vld [vmem:[#allocation2 + $0x424] ss:$8 sps:$4 sm:$0xff]  }
 0x5a8   :  { %5688 = vmatmul.mubr.bf16.gmra.mrb[56].mxu1 %v12932_v22 }
 0x5a9   :  { %6045 = vmatpush1.bf16.msra.mxu1 %v10875_v2  ;;  %5697 = vmatprep.mubr.bf16.mxu1 %v14099_v59  ;;  %v10917_v2 = vld [vmem:[#allocation2 + $0x420] ss:$8 sps:$4 sm:$0xff]  }
 0x5aa   :  { %6046 = vmatprep.subr.bf16.mxu1 %v10880_v4  ;;  %v10922_v4 = vld [vmem:[#allocation2 + $0x434] ss:$8 sps:$4 sm:$0xff]  }
 0x5ad   :  { %6047 = vmatpush1.bf16.msra.mxu1 %v10878_v12  ;;  %v10925_v12 = vld [vmem:[#allocation2 + $0x444] ss:$8 sps:$4 sm:$0xff]  }
 0x5ae   :  { %6048 = vmatprep.subr.bf16.mxu1 %v10883_v47  ;;  %v10928_v47 = vld [vmem:[#allocation2 + $0x454] ss:$8 sps:$4 sm:$0xff]  }
 0x5b0   :  { %5698 = vmatmul.mubr.bf16.gmra.mrb[60].mxu1 %v12991_v52 }
 0x5b1   :  { %6049 = vmatpush1.bf16.msra.mxu1 %v10881_v35  ;;  %5707 = vmatprep.mubr.bf16.mxu1 %v14099_v59  ;;  %v10926_v35 = vld [vmem:[#allocation2 + $0x450] ss:$8 sps:$4 sm:$0xff]  }
 0x5b2   :  { %6050 = vmatprep.subr.bf16.mxu1 %v10886_v25  ;;  %v10931_v25 = vld [vmem:[#allocation2 + $0x464] ss:$8 sps:$4 sm:$0xff]  }
 0x5b5   :  { %6051 = vmatpush1.bf16.msra.mxu1 %v10884_v16  ;;  %v10929_v16 = vld [vmem:[#allocation2 + $0x460] ss:$8 sps:$4 sm:$0xff]  }
 0x5b6   :  { %6052 = vmatprep.subr.bf16.mxu1 %v10889_v37  ;;  %v10934_v37 = vld [vmem:[#allocation2 + $0x474] ss:$8 sps:$4 sm:$0xff]  }
 0x5b8   :  { %5708 = vmatmul.mubr.bf16.gmra.mrb[64].mxu1 %v13047_v62 }
 0x5b9   :  { %6053 = vmatpush1.bf16.msra.mxu1 %v10887_v50  ;;  %5717 = vmatprep.mubr.bf16.mxu1 %v14099_v59  ;;  %v10932_v50 = vld [vmem:[#allocation2 + $0x470] ss:$8 sps:$4 sm:$0xff]  }
 0x5ba   :  { %6054 = vmatprep.subr.bf16.mxu1 %v10892_v36  ;;  %v10937_v36 = vld [vmem:[#allocation2 + $0x484] ss:$8 sps:$4 sm:$0xff]  }
 0x5bd   :  { %6055 = vmatpush1.bf16.msra.mxu1 %v10890_v40  ;;  %v4398_v40 = vsel %vm4378_vm1, %v13230_v21, %v13223_v51 }
 0x5be   :  { %6056 = vmatprep.subr.bf16.mxu1 %v10895_v18  ;;  %v4397_v18 = vsel %vm4378_vm1, %v13227_v6, %v13219_v20 }
 0x5c0   :  { %5718 = vmatmul.mubr.bf16.gmra.mrb[68].mxu1 %v13083_v15 }
 0x5c1   :  { %6057 = vmatpush1.bf16.msra.mxu1 %v10893_v5  ;;  %5727 = vmatprep.mubr.bf16.mxu1 %v14099_v59  ;;  %v4509_v5 = vmax.f32 %v12885_v57, %v4398_v40  ;;  %v14114_v57 = vld [vmem:[#allocation40_spill] sm:$0xff]  ;;  %v10958_v40 = vld [vmem:[#allocation2 + $0x4f4] ss:$8 sps:$4 sm:$0xff]  }
 0x5c2   :  { %6058 = vmatprep.subr.bf16.mxu1 %v10898_v43  ;;  %v4506_v43 = vmax.f32 %v12879_v17, %v4397_v18  ;;  %v10956_v18 = vld [vmem:[#allocation2 + $0x4f0] ss:$8 sps:$4 sm:$0xff]  }
 0x5c5   :  { %6059 = vmatpush1.bf16.msra.mxu1 %v10896_v44  ;;  %v4598_v44 = vadd.f32 %v12855_v24, %v4509_v5  ;;  %v10961_v5 = vld [vmem:[#allocation2 + $0x504] ss:$8 sps:$4 sm:$0xff]  }
 0x5c6   :  { %6060 = vmatprep.subr.bf16.mxu1 %v10901_v63  ;;  %v14111_v63 = vld [vmem:[#allocation9_spill] sm:$0xff] }
 0x5c7   :  { %v4422_v51 = vsel %vm4378_vm1, %v14111_v63, %v13230_v21  ;;  %v10962_v63 = vld [vmem:[#allocation2 + $0x510] ss:$8 sps:$4 sm:$0xff]  }
 0x5c8   :  { %5728 = vmatmul.mubr.bf16.gmra.mrb[72].mxu1 %v13119_v54  ;;  %v4508_v17 = vmax.f32 %v14114_v57, %v4422_v51  ;;  %v10967_v51 = vld [vmem:[#allocation2 + $0x524] ss:$8 sps:$4 sm:$0xff]  }
 0x5c9   :  { %6061 = vmatpush1.bf16.msra.mxu1 %v10899_v7  ;;  %5737 = vmatprep.mubr.bf16.mxu1 %v14099_v59  ;;  %v4595_v7 = vadd.f32 %v12855_v24, %v4506_v43  ;;  %v10959_v43 = vld [vmem:[#allocation2 + $0x500] ss:$8 sps:$4 sm:$0xff]   ;;  %v10973_v57 = vld [vmem:[#allocation2 + $0x544] ss:$8 sps:$4 sm:$0xff]  }
 0x5ca   :  { %6062 = vmatprep.subr.bf16.mxu1 %v10904_v56  ;;  %v14112_v56 = vld [vmem:[#allocation29_spill] sm:$0xff] }
 0x5cb   :  { %v4421_v20 = vsel %vm4378_vm1, %v14112_v56, %v13227_v6  ;;  %v10970_v56 = vld [vmem:[#allocation2 + $0x534] ss:$8 sps:$4 sm:$0xff]  }
 0x5cd   :  { %6063 = vmatpush1.bf16.msra.mxu1 %v10902_v42  ;;  %v14113_v42 = vld [vmem:[#allocation28_spill] sm:$0xff] }
 0x5ce   :  { %6064 = vmatprep.subr.bf16.mxu1 %v10907_v38  ;;  %v4670_v38 = vmax.f32 %v4598_v44, 0.0  ;;  %v10964_v44 = vld [vmem:[#allocation2 + $0x514] ss:$8 sps:$4 sm:$0xff]  }
 0x5d0   :  { %5738 = vmatmul.mubr.bf16.gmra.mrb[76].mxu1 %v13155_v61 }
 0x5d1   :  { %6065 = vmatpush1.bf16.msra.mxu1 %v10905_v19  ;;  %6068 = vmatprep.mubr.bf16.mxu1 %v12951_v39  ;;  %v10920_v39 = vld [vmem:[#allocation2 + $0x430] ss:$8 sps:$4 sm:$0xff]  }
 0x5d2   :  { %6066 = vmatprep.subr.bf16.mxu1 %v10910_v26  ;;  %v14115_v19 = vld [vmem:[#allocation39_spill] sm:$0xff] }
 0x5d3   :  { %v4505_v26 = vmax.f32 %v14115_v19, %v4421_v20  ;;  %v10968_v20 = vld [vmem:[#allocation2 + $0x530] ss:$8 sps:$4 sm:$0xff]  }
 0x5d4   :  { %v10974_v19 = vld [vmem:[#allocation2 + $0x550] ss:$8 sps:$4 sm:$0xff]  }
 0x5d5   :  { %6067 = vmatpush1.bf16.msra.mxu1 %v10908_v11  ;;  %v4667_v11 = vmax.f32 %v4595_v7, 0.0  ;;  %v10965_v7 = vld [vmem:[#allocation2 + $0x520] ss:$8 sps:$4 sm:$0xff]  }
 0x5d6   :  { %6149 = vmatprep.subr.bf16.mxu1 %v10913_v58  ;;  %v4597_v58 = vadd.f32 %v12850_v29, %v4508_v17  ;;  %v10971_v17 = vld [vmem:[#allocation2 + $0x540] ss:$8 sps:$4 sm:$0xff]  }
 0x5d7   :  { %v13407_v21 = vpack.c.bf16 %v4670_v38, %v4667_v11  ;;  %v10976_v38 = vld [vmem:[#allocation2 + $0x554] ss:$8 sps:$4 sm:$0xff]   ;;  %v10977_v11 = vld [vmem:[#allocation2 + $0x560] ss:$8 sps:$4 sm:$0xff]  }
 0x5d8   :  { %6069 = vmatmul.mubr.bf16.vlgmr.msra.gmra.mrb[48].mxu1 %v12945_v34  ;;  %v10923_v34 = vld [vmem:[#allocation2 + $0x440] ss:$8 sps:$4 sm:$0xff]  }
 0x5d9   :  { %6078 = vmatprep.mubr.bf16.mxu1 %v13007_v48  ;;  %6150 = vmatpush1.bf16.msra.mxu1 %v10911_v60  ;;  %v4594_v60 = vadd.f32 %v12850_v29, %v4505_v26  ;;  %v10979_v26 = vld [vmem:[#allocation2 + $0x564] ss:$8 sps:$4 sm:$0xff]  }
 0x5da   :  { %6151 = vmatprep.subr.bf16.mxu1 %v10916_v1  ;;  %v14116_v1 = vld [vmem:[#allocation8_spill] sm:$0xff] }
 0x5db   :  { %v4666_v6 = vmax.f32 %v4594_v60, 0.0  ;;  %v10980_v60 = vld [vmem:[#allocation2 + $0x570] ss:$8 sps:$4 sm:$0xff]  }
 0x5dd   :  { %6152 = vmatpush1.bf16.msra.mxu1 %v10914_v13  ;;  %v4669_v13 = vmax.f32 %v4597_v58, 0.0  ;;  %v10982_v58 = vld [vmem:[#allocation2 + $0x574] ss:$8 sps:$4 sm:$0xff]  }
 0x5de   :  { %6153 = vmatprep.subr.bf16.mxu1 %v10919_v23 }
 0x5df   :  { %v13412_v23 = vpack.c.bf16 %v4669_v13, %v4666_v6  ;;  %v10985_v13 = vld [vmem:[#allocation2 + $0x584] ss:$8 sps:$4 sm:$0xff]   ;;  %v10983_v6 = vld [vmem:[#allocation2 + $0x580] ss:$8 sps:$4 sm:$0xff]  }
 0x5e0   :  { %6079 = vmatmul.mubr.bf16.gmra.mrb[52].mxu1 %v13003_v49 }
 0x5e1   :  { %6088 = vmatprep.mubr.bf16.mxu1 %v13053_v31  ;;  %6154 = vmatpush1.bf16.msra.mxu1 %v10917_v2  ;;  %v10935_v2 = vld [vmem:[#allocation2 + $0x480] ss:$8 sps:$4 sm:$0xff]  }
 0x5e2   :  { %6155 = vmatprep.subr.bf16.mxu1 %v10922_v4  ;;  %v10940_v4 = vld [vmem:[#allocation2 + $0x494] ss:$8 sps:$4 sm:$0xff]  }
 0x5e5   :  { %6156 = vmatpush1.bf16.msra.mxu1 %v10920_v39  ;;  %v10938_v39 = vld [vmem:[#allocation2 + $0x490] ss:$8 sps:$4 sm:$0xff]  }
 0x5e6   :  { %6157 = vmatprep.subr.bf16.mxu1 %v10925_v12  ;;  %v10943_v12 = vld [vmem:[#allocation2 + $0x4a4] ss:$8 sps:$4 sm:$0xff]  }
 0x5e8   :  { %6089 = vmatmul.mubr.bf16.gmra.mrb[56].mxu1 %v13051_v9 }
 0x5e9   :  { %6098 = vmatprep.mubr.bf16.mxu1 %v13089_v46  ;;  %6158 = vmatpush1.bf16.msra.mxu1 %v10923_v34  ;;  %v10941_v34 = vld [vmem:[#allocation2 + $0x4a0] ss:$8 sps:$4 sm:$0xff]  }
 0x5ea   :  { %6159 = vmatprep.subr.bf16.mxu1 %v10928_v47  ;;  %v10946_v47 = vld [vmem:[#allocation2 + $0x4b4] ss:$8 sps:$4 sm:$0xff]  }
 0x5ed   :  { %6160 = vmatpush1.bf16.msra.mxu1 %v10926_v35  ;;  %v10944_v35 = vld [vmem:[#allocation2 + $0x4b0] ss:$8 sps:$4 sm:$0xff]  }
 0x5ee   :  { %6161 = vmatprep.subr.bf16.mxu1 %v10931_v25  ;;  %v10949_v25 = vld [vmem:[#allocation2 + $0x4c4] ss:$8 sps:$4 sm:$0xff]  }
 0x5f0   :  { %6099 = vmatmul.mubr.bf16.gmra.mrb[60].mxu1 %v13087_v8 }
 0x5f1   :  { %6108 = vmatprep.mubr.bf16.mxu1 %v13125_v14  ;;  %6162 = vmatpush1.bf16.msra.mxu1 %v10929_v16  ;;  %v10952_v16 = vld [vmem:[#allocation2 + $0x4d4] ss:$8 sps:$4 sm:$0xff]  }
 0x5f2   :  { %6163 = vmatprep.subr.bf16.mxu1 %v10934_v37  ;;  %v10950_v37 = vld [vmem:[#allocation2 + $0x4d0] ss:$8 sps:$4 sm:$0xff]  }
 0x5f5   :  { %6164 = vmatpush1.bf16.msra.mxu1 %v10932_v50  ;;  %v10955_v50 = vld [vmem:[#allocation2 + $0x4e4] ss:$8 sps:$4 sm:$0xff]  }
 0x5f6   :  { %6582 = vmatprep.subr.bf16.mxu1 %v10937_v36  ;;  %v10953_v36 = vld [vmem:[#allocation2 + $0x4e0] ss:$8 sps:$4 sm:$0xff]  }
 0x5f8   :  { %6109 = vmatmul.mubr.bf16.gmra.mrb[64].mxu1 %v13123_v41 }
 0x5f9   :  { %6118 = vmatprep.mubr.bf16.mxu1 %v13161_v3 }
 0x600   :  { %6119 = vmatmul.mubr.bf16.gmra.mrb[68].mxu1 %v13159_v28 }
 0x601   :  { %6128 = vmatprep.mubr.bf16.mxu1 %v14113_v42 }
 0x608   :  { %6129 = vmatmul.mubr.bf16.gmra.mrb[72].mxu1 %v14116_v1 }
 0x609   :  { %6138 = vmatprep.mubr.bf16.mxu1 %v13407_v21 }
 0x610   :  { %6139 = vmatmul.mubr.bf16.gmra.mrb[76].mxu1 %v13412_v23 }
 0x611   :  { %6181 = vmatprep.mubr.bf16.mxu1 %v14099_v59 }
 0x618   :  { %6182 = vmatmul.mubr.bf16.vlgmr.msra.gmra.mrb[48].mxu1 %v12932_v22  ;;  %v10947_v22 = vld [vmem:[#allocation2 + $0x4c0] ss:$8 sps:$4 sm:$0xff]  }
 0x619   :  { %6583 = vmatpush1.bf16.msra.mxu1 %v10935_v2  ;;  %6191 = vmatprep.mubr.bf16.mxu1 %v14099_v59  ;;  %v10988_v2 = vld [vmem:[#allocation2 + $0x594] ss:$8 sps:$4 sm:$0xff]  }
 0x61a   :  { %6584 = vmatprep.subr.bf16.mxu1 %v10940_v4  ;;  %v10986_v4 = vld [vmem:[#allocation2 + $0x590] ss:$8 sps:$4 sm:$0xff]  }
 0x61d   :  { %6585 = vmatpush1.bf16.msra.mxu1 %v10938_v39  ;;  %v10991_v39 = vld [vmem:[#allocation2 + $0x5a4] ss:$8 sps:$4 sm:$0xff]  }
 0x61e   :  { %6586 = vmatprep.subr.bf16.mxu1 %v10943_v12  ;;  %v10989_v12 = vld [vmem:[#allocation2 + $0x5a0] ss:$8 sps:$4 sm:$0xff]  }
 0x620   :  { %6192 = vmatmul.mubr.bf16.gmra.mrb[52].mxu1 %v12991_v52 }
 0x621   :  { %6587 = vmatpush1.bf16.msra.mxu1 %v10941_v34  ;;  %6201 = vmatprep.mubr.bf16.mxu1 %v14099_v59  ;;  %v10994_v34 = vld [vmem:[#allocation2 + $0x5b4] ss:$8 sps:$4 sm:$0xff]  }
 0x622   :  { %6588 = vmatprep.subr.bf16.mxu1 %v10946_v47  ;;  %v10997_v47 = vld [vmem:[#allocation2 + $0x5c4] ss:$8 sps:$4 sm:$0xff]  }
 0x625   :  { %6589 = vmatpush1.bf16.msra.mxu1 %v10944_v35  ;;  %v11000_v35 = vld [vmem:[#allocation2 + $0x5d4] ss:$8 sps:$4 sm:$0xff]  }
 0x626   :  { %6590 = vmatprep.subr.bf16.mxu1 %v10949_v25  ;;  %v10998_v25 = vld [vmem:[#allocation2 + $0x5d0] ss:$8 sps:$4 sm:$0xff]  }
 0x628   :  { %6202 = vmatmul.mubr.bf16.gmra.mrb[56].mxu1 %v13047_v62 }
 0x629   :  { %6591 = vmatpush1.bf16.msra.mxu1 %v10947_v22  ;;  %6211 = vmatprep.mubr.bf16.mxu1 %v14099_v59  ;;  %v11003_v22 = vld [vmem:[#allocation2 + $0x5e4] ss:$8 sps:$4 sm:$0xff]  }
 0x62a   :  { %6592 = vmatprep.subr.bf16.mxu1 %v10952_v16  ;;  %v11001_v16 = vld [vmem:[#allocation2 + $0x5e0] ss:$8 sps:$4 sm:$0xff]  }
 0x62d   :  { %6593 = vmatpush1.bf16.msra.mxu1 %v10950_v37  ;;  %v11006_v37 = vld [vmem:[#allocation2 + $0x5f4] ss:$8 sps:$4 sm:$0xff]  }
 0x62e   :  { %6594 = vmatprep.subr.bf16.mxu1 %v10955_v50  ;;  %v11004_v50 = vld [vmem:[#allocation2 + $0x5f0] ss:$8 sps:$4 sm:$0xff]  }
 0x630   :  { %6212 = vmatmul.mubr.bf16.gmra.mrb[60].mxu1 %v13083_v15 }
 0x631   :  { %6595 = vmatpush1.bf16.msra.mxu1 %v10953_v36  ;;  %6221 = vmatprep.mubr.bf16.mxu1 %v14099_v59  ;;  %v11009_v36 = vld [vmem:[#allocation2 + $0x604] ss:$8 sps:$4 sm:$0xff]  }
 0x632   :  { %6596 = vmatprep.subr.bf16.mxu1 %v10958_v40  ;;  %v4400_v40 = vsel %vm4378_vm1, %v13258_v45, %v13253_v32 }
 0x635   :  { %6597 = vmatpush1.bf16.msra.mxu1 %v10956_v18  ;;  %v14117_v18 = vld [vmem:[#allocation16_spill] sm:$0xff] }
 0x636   :  { %6598 = vmatprep.subr.bf16.mxu1 %v10961_v5  ;;  %v14118_v5 = vld [vmem:[#allocation17_spill] sm:$0xff] }
 0x638   :  { %6222 = vmatmul.mubr.bf16.gmra.mrb[64].mxu1 %v13119_v54 }
 0x639   :  { %6599 = vmatpush1.bf16.msra.mxu1 %v10959_v43  ;;  %6231 = vmatprep.mubr.bf16.mxu1 %v14099_v59  ;;  %v4399_v43 = vsel %vm4378_vm1, %v14118_v5, %v14117_v18  ;;  %v11030_v18 = vld [vmem:[#allocation2 + $0x674] ss:$8 sps:$4 sm:$0xff]  }
 0x63a   :  { %6600 = vmatprep.subr.bf16.mxu1 %v10964_v44  ;;  %v14119_v44 = vld [vmem:[#allocation45_spill] sm:$0xff] }
 0x63d   :  { %6601 = vmatpush1.bf16.msra.mxu1 %v10962_v63  ;;  %v4515_v63 = vmax.f32 %v14119_v44, %v4400_v40  ;;  %v11025_v40 = vld [vmem:[#allocation2 + $0x660] ss:$8 sps:$4 sm:$0xff]  }
 0x63e   :  { %6602 = vmatprep.subr.bf16.mxu1 %v10967_v51  ;;  %v14120_v51 = vld [vmem:[#allocation43_spill] sm:$0xff]  ;;  %v11031_v44 = vld [vmem:[#allocation2 + $0x680] ss:$8 sps:$4 sm:$0xff]  }
 0x640   :  { %6232 = vmatmul.mubr.bf16.gmra.mrb[68].mxu1 %v13155_v61 }
 0x641   :  { %6603 = vmatpush1.bf16.msra.mxu1 %v10965_v7  ;;  %6241 = vmatprep.mubr.bf16.mxu1 %v14099_v59  ;;  %v4512_v7 = vmax.f32 %v14120_v51, %v4399_v43  ;;  %v11033_v43 = vld [vmem:[#allocation2 + $0x684] ss:$8 sps:$4 sm:$0xff]   ;;  %v11034_v51 = vld [vmem:[#allocation2 + $0x690] ss:$8 sps:$4 sm:$0xff]  }
 0x642   :  { %6604 = vmatprep.subr.bf16.mxu1 %v10970_v56  ;;  %v4604_v56 = vadd.f32 %v12855_v24, %v4515_v63  ;;  %v11036_v63 = vld [vmem:[#allocation2 + $0x694] ss:$8 sps:$4 sm:$0xff]  }
 0x645   :  { %6605 = vmatpush1.bf16.msra.mxu1 %v10968_v20  ;;  %v14121_v20 = vld [vmem:[#allocation19_spill] sm:$0xff] }
 0x646   :  { %6606 = vmatprep.subr.bf16.mxu1 %v10973_v57  ;;  %v4424_v32 = vsel %vm4378_vm1, %v14121_v20, %v13258_v45  ;;  %v4601_v57 = vadd.f32 %v12855_v24, %v4512_v7  ;;  %v11039_v7 = vld [vmem:[#allocation2 + $0x6a4] ss:$8 sps:$4 sm:$0xff]   ;;  %v11042_v20 = vld [vmem:[#allocation2 + $0x6b4] ss:$8 sps:$4 sm:$0xff]  }
 0x648   :  { %6242 = vmatmul.mubr.bf16.gmra.mrb[72].mxu1 %v13202_v27 }
 0x649   :  { %6607 = vmatpush1.bf16.msra.mxu1 %v10971_v17  ;;  %6251 = vmatprep.mubr.bf16.mxu1 %v14099_v59  ;;  %v14122_v17 = vld [vmem:[#allocation18_spill] sm:$0xff] }
 0x64a   :  { %6608 = vmatprep.subr.bf16.mxu1 %v10976_v38  ;;  %v4423_v38 = vsel %vm4378_vm1, %v14122_v17, %v14118_v5  ;;  %v11028_v5 = vld [vmem:[#allocation2 + $0x670] ss:$8 sps:$4 sm:$0xff]   ;;  %v11043_v17 = vld [vmem:[#allocation2 + $0x6c0] ss:$8 sps:$4 sm:$0xff]  }
 0x64d   :  { %6609 = vmatpush1.bf16.msra.mxu1 %v10974_v19  ;;  %v14123_v19 = vld [vmem:[#allocation44_spill] sm:$0xff] }
 0x64e   :  { %6610 = vmatprep.subr.bf16.mxu1 %v10979_v26  ;;  %v4514_v26 = vmax.f32 %v14123_v19, %v4424_v32  ;;  %v11040_v32 = vld [vmem:[#allocation2 + $0x6b0] ss:$8 sps:$4 sm:$0xff]  }
 0x64f   :  { %v11046_v19 = vld [vmem:[#allocation2 + $0x6d0] ss:$8 sps:$4 sm:$0xff]  }
 0x650   :  { %6252 = vmatmul.mubr.bf16.gmra.mrb[76].mxu1 %v13260_v30 }
 0x651   :  { %6611 = vmatpush1.bf16.msra.mxu1 %v10977_v11  ;;  %6614 = vmatprep.mubr.bf16.mxu1 %v13007_v48  ;;  %v10992_v48 = vld [vmem:[#allocation2 + $0x5b0] ss:$8 sps:$4 sm:$0xff]   ;;  %v4676_v11 = vmax.f32 %v4604_v56, 0.0  ;;  %v11037_v56 = vld [vmem:[#allocation2 + $0x6a0] ss:$8 sps:$4 sm:$0xff]  }
 0x652   :  { %6612 = vmatprep.subr.bf16.mxu1 %v10982_v58  ;;  %v14124_v58 = vld [vmem:[#allocation42_spill] sm:$0xff] }
 0x655   :  { %6613 = vmatpush1.bf16.msra.mxu1 %v10980_v60  ;;  %v4511_v60 = vmax.f32 %v14124_v58, %v4423_v38  ;;  %v11048_v38 = vld [vmem:[#allocation2 + $0x6d4] ss:$8 sps:$4 sm:$0xff]  }
 0x656   :  { %6695 = vmatprep.subr.bf16.mxu1 %v10985_v13  ;;  %v4673_v13 = vmax.f32 %v4601_v57, 0.0  ;;  %v11045_v57 = vld [vmem:[#allocation2 + $0x6c4] ss:$8 sps:$4 sm:$0xff]   ;;  %v11054_v58 = vld [vmem:[#allocation2 + $0x6f4] ss:$8 sps:$4 sm:$0xff]  }
 0x658   :  { %6615 = vmatmul.mubr.bf16.vlgmr.msra.gmra.mrb[48].mxu1 %v13003_v49  ;;  %v10995_v49 = vld [vmem:[#allocation2 + $0x5c0] ss:$8 sps:$4 sm:$0xff]   ;;  %v13467_v45 = vpack.c.bf16 %v4676_v11, %v4673_v13 }
 0x659   :  { %6624 = vmatprep.mubr.bf16.mxu1 %v13053_v31  ;;  %6696 = vmatpush1.bf16.msra.mxu1 %v10983_v6  ;;  %v4603_v6 = vadd.f32 %v12850_v29, %v4514_v26  ;;  %v11051_v26 = vld [vmem:[#allocation2 + $0x6e4] ss:$8 sps:$4 sm:$0xff]   ;;  %v11049_v11 = vld [vmem:[#allocation2 + $0x6e0] ss:$8 sps:$4 sm:$0xff]  }
 0x65a   :  { %6697 = vmatprep.subr.bf16.mxu1 %v10988_v2  ;;  %v4600_v2 = vadd.f32 %v12850_v29, %v4511_v60  ;;  %v11079_v60 = vld [vmem:[%s13957_s5 + $0xc0] sm:$0xff]  }
 0x65b   :  { %v11080_v13 = vld [vmem:[%s13957_s5 + $0x80] sm:$0xff]   ;;  %9343 = vmatprep.subr.bf16.mxu0 %v11079_v60 }
 0x65c   :  { %9344 = vmatpush3.bf16.msra.mxu0 %v11080_v13 }
 0x65d   :  { %6698 = vmatpush1.bf16.msra.mxu1 %v10986_v4  ;;  %v4675_v4 = vmax.f32 %v4603_v6, 0.0  ;;  %v11081_v6 = vld [vmem:[%s13957_s5 + $0xc8] sm:$0xff]  }
 0x65e   :  { %6699 = vmatprep.subr.bf16.mxu1 %v10991_v39  ;;  %v4672_v39 = vmax.f32 %v4600_v2, 0.0  ;;  %v11052_v2 = vld [vmem:[#allocation2 + $0x6f0] ss:$8 sps:$4 sm:$0xff]   ;;  %9345 = vmatprep.subr.bf16.mxu0 %v11081_v6 }
 0x660   :  { %6625 = vmatmul.mubr.bf16.gmra.mrb[52].mxu1 %v13051_v9 }
 0x661   :  { %6634 = vmatprep.mubr.bf16.mxu1 %v13089_v46  ;;  %6700 = vmatpush1.bf16.msra.mxu1 %v10989_v12  ;;  %v13472_v12 = vpack.c.bf16 %v4675_v4, %v4672_v39  ;;  %v11057_v4 = vld [vmem:[#allocation2 + $0x704] ss:$8 sps:$4 sm:$0xff]  }
 0x662   :  { %6701 = vmatprep.subr.bf16.mxu1 %v10994_v34  ;;  %v11007_v34 = vld [vmem:[#allocation2 + $0x600] ss:$8 sps:$4 sm:$0xff]  }
 0x663   :  { %v11082_v39 = vld [vmem:[%s13957_s5 + $0x88] sm:$0xff]  }
 0x664   :  { %9346 = vmatpush3.bf16.msra.mxu0 %v11082_v39 }
 0x665   :  { %6702 = vmatpush1.bf16.msra.mxu1 %v10992_v48  ;;  %v11012_v48 = vld [vmem:[#allocation2 + $0x614] ss:$8 sps:$4 sm:$0xff]  }
 0x666   :  { %6703 = vmatprep.subr.bf16.mxu1 %v10997_v47  ;;  %v11010_v47 = vld [vmem:[#allocation2 + $0x610] ss:$8 sps:$4 sm:$0xff]  }
 0x668   :  { %6635 = vmatmul.mubr.bf16.gmra.mrb[56].mxu1 %v13087_v8 }
 0x669   :  { %6644 = vmatprep.mubr.bf16.mxu1 %v13125_v14  ;;  %6704 = vmatpush1.bf16.msra.mxu1 %v10995_v49  ;;  %v11015_v49 = vld [vmem:[#allocation2 + $0x624] ss:$8 sps:$4 sm:$0xff]  }
 0x66a   :  { %6705 = vmatprep.subr.bf16.mxu1 %v11000_v35  ;;  %v11013_v35 = vld [vmem:[#allocation2 + $0x620] ss:$8 sps:$4 sm:$0xff]  }
 0x66d   :  { %6706 = vmatpush1.bf16.msra.mxu1 %v10998_v25  ;;  %v11018_v25 = vld [vmem:[#allocation2 + $0x634] ss:$8 sps:$4 sm:$0xff]  }
 0x66e   :  { %6707 = vmatprep.subr.bf16.mxu1 %v11003_v22  ;;  %v11016_v22 = vld [vmem:[#allocation2 + $0x630] ss:$8 sps:$4 sm:$0xff]  }
 0x670   :  { %6645 = vmatmul.mubr.bf16.gmra.mrb[60].mxu1 %v13123_v41 }
 0x671   :  { %6654 = vmatprep.mubr.bf16.mxu1 %v13161_v3  ;;  %6708 = vmatpush1.bf16.msra.mxu1 %v11001_v16  ;;  %v11021_v16 = vld [vmem:[#allocation2 + $0x644] ss:$8 sps:$4 sm:$0xff]  }
 0x672   :  { %6709 = vmatprep.subr.bf16.mxu1 %v11006_v37  ;;  %v11024_v37 = vld [vmem:[#allocation2 + $0x654] ss:$8 sps:$4 sm:$0xff]  }
 0x675   :  { %6710 = vmatpush1.bf16.msra.mxu1 %v11004_v50  ;;  %v11022_v50 = vld [vmem:[#allocation2 + $0x650] ss:$8 sps:$4 sm:$0xff]  }
 0x676   :  { %7128 = vmatprep.subr.bf16.mxu1 %v11009_v36  ;;  %v11027_v36 = vld [vmem:[#allocation2 + $0x664] ss:$8 sps:$4 sm:$0xff]  }
 0x678   :  { %6655 = vmatmul.mubr.bf16.gmra.mrb[64].mxu1 %v13159_v28 }
 0x679   :  { %6664 = vmatprep.mubr.bf16.mxu1 %v14113_v42 }
 0x680   :  { %6665 = vmatmul.mubr.bf16.gmra.mrb[68].mxu1 %v14116_v1 }
 0x681   :  { %6674 = vmatprep.mubr.bf16.mxu1 %v13407_v21 }
 0x688   :  { %6675 = vmatmul.mubr.bf16.gmra.mrb[72].mxu1 %v13412_v23 }
 0x689   :  { %6684 = vmatprep.mubr.bf16.mxu1 %v13467_v45 }
 0x690   :  { %6685 = vmatmul.mubr.bf16.gmra.mrb[76].mxu1 %v13472_v12 }
 0x691   :  { %6727 = vmatprep.mubr.bf16.mxu1 %v14099_v59 }
 0x698   :  { %6728 = vmatmul.mubr.bf16.vlgmr.msra.gmra.mrb[48].mxu1 %v12991_v52  ;;  %v11019_v52 = vld [vmem:[#allocation2 + $0x640] ss:$8 sps:$4 sm:$0xff]  }
 0x699   :  { %7129 = vmatpush1.bf16.msra.mxu1 %v11007_v34  ;;  %6737 = vmatprep.mubr.bf16.mxu1 %v14099_v59  ;;  %v11055_v34 = vld [vmem:[#allocation2 + $0x700] ss:$8 sps:$4 sm:$0xff]  }
 0x69a   :  { %7130 = vmatprep.subr.bf16.mxu1 %v11012_v48  ;;  %v11060_v48 = vld [vmem:[#allocation2 + $0x714] ss:$8 sps:$4 sm:$0xff]  }
 0x69d   :  { %7131 = vmatpush1.bf16.msra.mxu1 %v11010_v47  ;;  %v11063_v47 = vld [vmem:[#allocation2 + $0x724] ss:$8 sps:$4 sm:$0xff]  }
 0x69e   :  { %7132 = vmatprep.subr.bf16.mxu1 %v11015_v49  ;;  %v11061_v49 = vld [vmem:[#allocation2 + $0x720] ss:$8 sps:$4 sm:$0xff]  }
 0x6a0   :  { %6738 = vmatmul.mubr.bf16.gmra.mrb[52].mxu1 %v13047_v62 }
 0x6a1   :  { %7133 = vmatpush1.bf16.msra.mxu1 %v11013_v35  ;;  %6747 = vmatprep.mubr.bf16.mxu1 %v14099_v59  ;;  %v11066_v35 = vld [vmem:[#allocation2 + $0x734] ss:$8 sps:$4 sm:$0xff]  }
 0x6a2   :  { %7134 = vmatprep.subr.bf16.mxu1 %v11018_v25  ;;  %v11064_v25 = vld [vmem:[#allocation2 + $0x730] ss:$8 sps:$4 sm:$0xff]  }
 0x6a5   :  { %7135 = vmatpush1.bf16.msra.mxu1 %v11016_v22  ;;  %v11069_v22 = vld [vmem:[#allocation2 + $0x744] ss:$8 sps:$4 sm:$0xff]  }
 0x6a6   :  { %7136 = vmatprep.subr.bf16.mxu1 %v11021_v16  ;;  %v11070_v16 = vld [vmem:[#allocation2 + $0x750] ss:$8 sps:$4 sm:$0xff]  }
 0x6a8   :  { %6748 = vmatmul.mubr.bf16.gmra.mrb[56].mxu1 %v13083_v15 }
 0x6a9   :  { %7137 = vmatpush1.bf16.msra.mxu1 %v11019_v52  ;;  %6757 = vmatprep.mubr.bf16.mxu1 %v14099_v59  ;;  %v11075_v52 = vld [vmem:[#allocation2 + $0x764] ss:$8 sps:$4 sm:$0xff]  }
 0x6aa   :  { %7138 = vmatprep.subr.bf16.mxu1 %v11024_v37  ;;  %v11076_v37 = vld [vmem:[#allocation2 + $0x770] ss:$8 sps:$4 sm:$0xff]  }
 0x6ad   :  { %7139 = vmatpush1.bf16.msra.mxu1 %v11022_v50  ;;  %v14126_v50 = vld [vmem:[#allocation10_spill] sm:$0xff] }
 0x6ae   :  { %7140 = vmatprep.subr.bf16.mxu1 %v11027_v36  ;;  %v14127_v36 = vld [vmem:[#allocation49_spill] sm:$0xff] }
 0x6b0   :  { %6758 = vmatmul.mubr.bf16.gmra.mrb[60].mxu1 %v13119_v54 }
 0x6b1   :  { %7141 = vmatpush1.bf16.msra.mxu1 %v11025_v40  ;;  %6767 = vmatprep.mubr.bf16.mxu1 %v14099_v59  ;;  %v14128_v40 = vld [vmem:[#allocation47_spill] sm:$0xff] }
 0x6b2   :  { %7142 = vmatprep.subr.bf16.mxu1 %v11030_v18 }
 0x6b5   :  { %7143 = vmatpush1.bf16.msra.mxu1 %v11028_v5 }
 0x6b6   :  { %7144 = vmatprep.subr.bf16.mxu1 %v11033_v43  ;;  %v14129_v43 = vld [vmem:[#allocation20_spill] sm:$0xff] }
 0x6b8   :  { %6768 = vmatmul.mubr.bf16.gmra.mrb[64].mxu1 %v13155_v61 }
 0x6b9   :  { %7145 = vmatpush1.bf16.msra.mxu1 %v11031_v44  ;;  %6777 = vmatprep.mubr.bf16.mxu1 %v14099_v59 }
 0x6ba   :  { %7146 = vmatprep.subr.bf16.mxu1 %v11036_v63  ;;  %v14131_v63 = vld [vmem:[#allocation48_spill] sm:$0xff] }
 0x6bd   :  { %7147 = vmatpush1.bf16.msra.mxu1 %v11034_v51 }
 0x6be   :  { %7148 = vmatprep.subr.bf16.mxu1 %v11039_v7 }
 0x6c0   :  { %6778 = vmatmul.mubr.bf16.gmra.mrb[68].mxu1 %v13202_v27 }
 0x6c1   :  { %7149 = vmatpush1.bf16.msra.mxu1 %v11037_v56  ;;  %6787 = vmatprep.mubr.bf16.mxu1 %v14099_v59  ;;  %v14132_v56 = vld [vmem:[#allocation46_spill] sm:$0xff] }
 0x6c2   :  { %7150 = vmatprep.subr.bf16.mxu1 %v11042_v20 }
 0x6c5   :  { %7151 = vmatpush1.bf16.msra.mxu1 %v11040_v32 }
 0x6c6   :  { %7152 = vmatprep.subr.bf16.mxu1 %v11045_v57 }
 0x6c8   :  { %6788 = vmatmul.mubr.bf16.gmra.mrb[72].mxu1 %v13260_v30 }
 0x6c9   :  { %7153 = vmatpush1.bf16.msra.mxu1 %v11043_v17  ;;  %6797 = vmatprep.mubr.bf16.mxu1 %v14099_v59 }
 0x6ca   :  { %7154 = vmatprep.subr.bf16.mxu1 %v11048_v38 }
 0x6cd   :  { %7155 = vmatpush1.bf16.msra.mxu1 %v11046_v19 }
 0x6ce   :  { %7156 = vmatprep.subr.bf16.mxu1 %v11051_v26 }
 0x6d0   :  { %6798 = vmatmul.mubr.bf16.gmra.mrb[76].mxu1 %v13290_v33 }
 0x6d1   :  { %7157 = vmatpush1.bf16.msra.mxu1 %v11049_v11  ;;  %7160 = vmatprep.mubr.bf16.mxu1 %v13053_v31  ;;  %v11058_v31 = vld [vmem:[#allocation2 + $0x710] ss:$8 sps:$4 sm:$0xff]  }
 0x6d2   :  { %7158 = vmatprep.subr.bf16.mxu1 %v11054_v58 }
 0x6d5   :  { %7159 = vmatpush1.bf16.msra.mxu1 %v11052_v2 }
 0x6d6   :  { %7241 = vmatprep.subr.bf16.mxu1 %v11057_v4 }
 0x6d8   :  { %7161 = vmatmul.mubr.bf16.vlgmr.msra.gmra.mrb[48].mxu1 %v13051_v9  ;;  %v11067_v9 = vld [vmem:[#allocation2 + $0x740] ss:$8 sps:$4 sm:$0xff]  }
 0x6d9   :  { %7170 = vmatprep.mubr.bf16.mxu1 %v13089_v46  ;;  %7242 = vmatpush1.bf16.msra.mxu1 %v11055_v34  ;;  %v11072_v46 = vld [vmem:[#allocation2 + $0x754] ss:$8 sps:$4 sm:$0xff]  }
 0x6da   :  { %7243 = vmatprep.subr.bf16.mxu1 %v11060_v48 }
 0x6dd   :  { %7244 = vmatpush1.bf16.msra.mxu1 %v11058_v31 }
 0x6de   :  { %7245 = vmatprep.subr.bf16.mxu1 %v11063_v47 }
 0x6e0   :  { %7171 = vmatmul.mubr.bf16.gmra.mrb[52].mxu1 %v13087_v8  ;;  %v11073_v8 = vld [vmem:[#allocation2 + $0x760] ss:$8 sps:$4 sm:$0xff]  }
 0x6e1   :  { %7180 = vmatprep.mubr.bf16.mxu1 %v13125_v14  ;;  %7246 = vmatpush1.bf16.msra.mxu1 %v11061_v49  ;;  %v11078_v14 = vld [vmem:[#allocation2 + $0x774] ss:$8 sps:$4 sm:$0xff]  }
 0x6e2   :  { %7247 = vmatprep.subr.bf16.mxu1 %v11066_v35 }
 0x6e5   :  { %7248 = vmatpush1.bf16.msra.mxu1 %v11064_v25 }
 0x6e6   :  { %7249 = vmatprep.subr.bf16.mxu1 %v11069_v22 }
 0x6e8   :  { %7181 = vmatmul.mubr.bf16.gmra.mrb[56].mxu1 %v13123_v41  ;;  %v4402_v41 = vsel %vm4378_vm1, %v13288_v10, %v13281_v55  ;;  %v4426_v55 = vsel %vm4378_vm1, %v14129_v43, %v13288_v10 }
 0x6e9   :  { %7190 = vmatprep.mubr.bf16.mxu1 %v13161_v3  ;;  %7250 = vmatpush1.bf16.msra.mxu1 %v11067_v9  ;;  %v14125_v3 = vld [vmem:[#allocation30_spill] sm:$0xff]  ;;  %v4520_v51 = vmax.f32 %v14131_v63, %v4426_v55 }
 0x6ea   :  { %7251 = vmatprep.subr.bf16.mxu1 %v11072_v46 }
 0x6eb   :  { %v4609_v57 = vadd.f32 %v12850_v29, %v4520_v51 }
 0x6ed   :  { %7252 = vmatpush1.bf16.msra.mxu1 %v11070_v16 }
 0x6ee   :  { %7253 = vmatprep.subr.bf16.mxu1 %v11075_v52 }
 0x6f0   :  { %7191 = vmatmul.mubr.bf16.gmra.mrb[60].mxu1 %v13159_v28  ;;  %v4401_v28 = vsel %vm4378_vm1, %v14126_v50, %v14125_v3 }
 0x6f1   :  { %7200 = vmatprep.mubr.bf16.mxu1 %v14113_v42  ;;  %7254 = vmatpush1.bf16.msra.mxu1 %v11073_v8  ;;  %v4521_v42 = vmax.f32 %v14127_v36, %v4402_v41  ;;  %v4518_v18 = vmax.f32 %v14128_v40, %v4401_v28 }
 0x6f2   :  { %7255 = vmatprep.subr.bf16.mxu1 %v11078_v14 }
 0x6f3   :  { %v4610_v5 = vadd.f32 %v12855_v24, %v4521_v42 }
 0x6f5   :  { %7256 = vmatpush1.bf16.msra.mxu1 %v11076_v37  ;;  %v4682_v7 = vmax.f32 %v4610_v5, 0.0  ;;  %v11095_v37 = vld [vmem:[%s13957_s5 + $0x40] sm:$0xff]  }
 0x6f8   :  { %7201 = vmatmul.mubr.bf16.gmra.mrb[64].mxu1 %v14116_v1  ;;  %v14130_v1 = vld [vmem:[#allocation11_spill] sm:$0xff] }
 0x6f9   :  { %7210 = vmatprep.mubr.bf16.mxu1 %v13407_v21  ;;  %v4607_v21 = vadd.f32 %v12855_v24, %v4518_v18  ;;  %v4425_v44 = vsel %vm4378_vm1, %v14130_v1, %v14126_v50  ;;  %v4681_v24 = vmax.f32 %v4609_v57, 0.0 }
 0x6fa   :  { %v4517_v20 = vmax.f32 %v14132_v56, %v4425_v44 }
 0x6fb   :  { %v4679_v32 = vmax.f32 %v4607_v21, 0.0 }
 0x6fd   :  { %v4718_v10 = vpack.c.bf16 %v4682_v7, %v4679_v32 }
 0x700   :  { %7211 = vmatmul.mubr.bf16.gmra.mrb[68].mxu1 %v13412_v23  ;;  %v4606_v23 = vadd.f32 %v12850_v29, %v4517_v20  ;;  %v11083_v29 = vld [vmem:[%s13957_s5 + $0xd0] sm:$0xff]  }
 0x701   :  { %7220 = vmatprep.mubr.bf16.mxu1 %v13467_v45  ;;  %9347 = vmatprep.subr.bf16.mxu0 %v11083_v29  ;;  %v11093_v45 = vld [vmem:[%s13957_s5 + $0xf8] sm:$0xff]  }
 0x702   :  { %v4678_v17 = vmax.f32 %v4606_v23, 0.0 }
 0x704   :  { %v4717_v38 = vpack.c.bf16 %v4681_v24, %v4678_v17 }
 0x708   :  { %7221 = vmatmul.mubr.bf16.gmra.mrb[72].mxu1 %v13472_v12  ;;  %v11094_v12 = vld [vmem:[%s13957_s5 + $0xb8] sm:$0xff]  }
 0x709   :  { %7230 = vmatprep.mubr.bf16.mxu1 %v4718_v10 }
 0x710   :  { %7231 = vmatmul.mubr.bf16.gmra.mrb[76].mxu1 %v4717_v38  ;;  %v7467_v38 = vld [vmem:[%s13956_s4] sm:$0x3] }
 0x711   :  { %7273 = vmatprep.mubr.bf16.mxu1 %v14099_v59 }
 0x718   :  { %7274 = vmatmul.mubr.bf16.vlgmr.msra.gmra.mrb[48].mxu1 %v13047_v62  ;;  %v11084_v62 = vld [vmem:[%s13957_s5 + $0x90] sm:$0xff]  }
 0x719   :  { %7283 = vmatprep.mubr.bf16.mxu1 %v14099_v59  ;;  %9348 = vmatpush3.bf16.msra.mxu0 %v11084_v62  ;;  %v14133_v62 = vld [vmem:[#allocation37_spill] sm:$0xff] }
 0x720   :  { %7284 = vmatmul.mubr.bf16.gmra.mrb[52].mxu1 %v13083_v15  ;;  %v11085_v15 = vld [vmem:[%s13957_s5 + $0xd8] sm:$0xff]  }
 0x721   :  { %7293 = vmatprep.mubr.bf16.mxu1 %v14099_v59  ;;  %9349 = vmatprep.subr.bf16.mxu0 %v11085_v15  ;;  %v13662_v15 = vrot.slane %v7467_v38, %v14133_v62 }
 0x728   :  { %7294 = vmatmul.mubr.bf16.gmra.mrb[56].mxu1 %v13119_v54  ;;  %v11086_v54 = vld [vmem:[%s13957_s5 + $0x98] sm:$0xff]  }
 0x729   :  { %7303 = vmatprep.mubr.bf16.mxu1 %v14099_v59  ;;  %9350 = vmatpush3.bf16.msra.mxu0 %v11086_v54  ;;  %v14134_v54 = vld [vmem:[#allocation38_spill] sm:$0xff] }
 0x730   :  { %7304 = vmatmul.mubr.bf16.gmra.mrb[60].mxu1 %v13155_v61  ;;  %v11087_v61 = vld [vmem:[%s13957_s5 + $0xe0] sm:$0xff]  }
 0x731   :  { %7313 = vmatprep.mubr.bf16.mxu1 %v14099_v59  ;;  %9351 = vmatprep.subr.bf16.mxu0 %v11087_v61  ;;  %v13665_v61 = vrot.slane %v7467_v38, %v14134_v54 }
 0x738   :  { %7314 = vmatmul.mubr.bf16.gmra.mrb[64].mxu1 %v13202_v27  ;;  %v11088_v27 = vld [vmem:[%s13957_s5 + $0xa0] sm:$0xff]  }
 0x739   :  { %7323 = vmatprep.mubr.bf16.mxu1 %v14099_v59  ;;  %9352 = vmatpush3.bf16.msra.mxu0 %v11088_v27 }
 0x740   :  { %7324 = vmatmul.mubr.bf16.gmra.mrb[68].mxu1 %v13260_v30  ;;  %v11090_v30 = vld [vmem:[%s13957_s5 + $0xa8] sm:$0xff]  }
 0x741   :  { %7333 = vmatprep.mubr.bf16.mxu1 %v14099_v59 }
 0x748   :  { %7334 = vmatmul.mubr.bf16.gmra.mrb[72].mxu1 %v13290_v33  ;;  %v11092_v33 = vld [vmem:[%s13957_s5 + $0xb0] sm:$0xff]  }
 0x749   :  { %7343 = vmatprep.mubr.bf16.mxu1 %v14099_v59  ;;  %v11089_v59 = vld [vmem:[%s13957_s5 + $0xe8] sm:$0xff]  }
 0x74a   :  { %9353 = vmatprep.subr.bf16.mxu0 %v11089_v59 }
 0x74b   :  { %9354 = vmatpush3.bf16.msra.mxu0 %v11090_v30 }
 0x750   :  { %7344 = vmatmul.mubr.bf16.gmra.mrb[76].mxu1 %v13310_v53  ;;  %v11091_v53 = vld [vmem:[%s13957_s5 + $0xf0] sm:$0xff]  }
 0x751   :  { %9355 = vmatprep.subr.bf16.mxu0 %v11091_v53 }
 0x752   :  { %9356 = vmatpush3.bf16.msra.mxu0 %v11092_v33 }
 0x753   :  { %9357 = vmatprep.subr.bf16.mxu0 %v11093_v45 }
 0x756   :  { %9358 = vmatpush3.bf16.msra.mxu0 %v11094_v12 }
 0x757   :  { %9371 = vmatprep.subr.bf16.mxu0 %v11095_v37 }
 0x7eb   :  { %v7275_v19 = vpop.f32.mrb[48].mxu1 }
 0x7ec   :  { %v7277_v26 = vpop.f32.mrb[49].mxu1 }
 0x7ed   :  { %v7279_v11 = vpop.f32.mrb[50].mxu1 }
 0x7ee   :  { %v7281_v58 = vpop.f32.mrb[51].mxu1 }
 0x7f3   :  { %v7285_v60 = vpop.f32.mrb[52].mxu1 }
 0x7f4   :  { %v13593_v13 = vmax.f32 %v7275_v19, %v7285_v60  ;;  %v7287_v6 = vpop.f32.mrb[53].mxu1 }
 0x7f5   :  { %v13595_v2 = vmax.f32 %v7277_v26, %v7287_v6  ;;  %v7289_v4 = vpop.f32.mrb[54].mxu1 }
 0x7f6   :  { %v13597_v39 = vmax.f32 %v7279_v11, %v7289_v4  ;;  %v7291_v34 = vpop.f32.mrb[55].mxu1 }
 0x7f7   :  { %v13599_v48 = vmax.f32 %v7281_v58, %v7291_v34 }
 0x7fb   :  { %v7295_v31 = vpop.f32.mrb[56].mxu1 }
 0x7fc   :  { %v7297_v47 = vpop.f32.mrb[57].mxu1 }
 0x7fd   :  { %v7299_v49 = vpop.f32.mrb[58].mxu1 }
 0x7fe   :  { %v7301_v35 = vpop.f32.mrb[59].mxu1 }
 0x803   :  { %v7305_v25 = vpop.f32.mrb[60].mxu1 }
 0x804   :  { %v13601_v22 = vmax.f32 %v7295_v31, %v7305_v25  ;;  %v7307_v9 = vpop.f32.mrb[61].mxu1 }
 0x805   :  { %v13603_v46 = vmax.f32 %v7297_v47, %v7307_v9  ;;  %v7309_v16 = vpop.f32.mrb[62].mxu1  ;;  %v11097_v9 = vld [vmem:[%s13957_s5 + $0x48] sm:$0xff]  }
 0x806   :  { %v13605_v52 = vmax.f32 %v7299_v49, %v7309_v16  ;;  %7406 = vrot.lane.b32.xlu0 %v13601_v22, %s11270_s20  ;;  %v7311_v8 = vpop.f32.mrb[63].mxu1 }
 0x807   :  { %v7393_v14 = vmax.f32 %v7301_v35, %v7311_v8  ;;  %v11099_v8 = vld [vmem:[%s13957_s5 + $0x50] sm:$0xff]  }
 0x808   :  { %7408 = vrot.lane.b32.xlu1 %v13605_v52, %s11270_s20 }
 0x80a   :  { %7422 = vrot.lane.b32.xlu0 %v13603_v46, %s11270_s20 }
 0x80b   :  { %v7315_v41 = vpop.f32.mrb[64].mxu1 }
 0x80c   :  { %7424 = vrot.lane.b32.xlu1 %v7393_v14, %s11270_s20  ;;  %v7317_v3 = vpop.f32.mrb[65].mxu1 }
 0x80d   :  { %v7319_v50 = vpop.f32.mrb[66].mxu1 }
 0x80e   :  { %v7321_v28 = vpop.f32.mrb[67].mxu1 }
 0x813   :  { %v7325_v36 = vpop.f32.mrb[68].mxu1 }
 0x814   :  { %v13617_v42 = vmax.f32 %v7315_v41, %v7325_v36  ;;  %v7327_v40 = vpop.f32.mrb[69].mxu1  ;;  %v11100_v36 = vld [vmem:[%s13957_s5 + $0x10] sm:$0xff]  }
 0x815   :  { %v13619_v18 = vmax.f32 %v7317_v3, %v7327_v40  ;;  %v7329_v5 = vpop.f32.mrb[70].mxu1 }
 0x816   :  { %v13621_v43 = vmax.f32 %v7319_v50, %v7329_v5  ;;  %7410 = vrot.lane.b32.xlu0 %v13617_v42, %s11270_s20  ;;  %v7331_v55 = vpop.f32.mrb[71].mxu1 }
 0x817   :  { %v13625_v21 = vmax.f32 %v7321_v28, %v7331_v55  ;;  %v11101_v55 = vld [vmem:[%s13957_s5 + $0x58] sm:$0xff]  }
 0x818   :  { %7412 = vrot.lane.b32.xlu1 %v13621_v43, %s11270_s20 }
 0x81a   :  { %7426 = vrot.lane.b32.xlu0 %v13619_v18, %s11270_s20 }
 0x81b   :  { %v7335_v1 = vpop.f32.mrb[72].mxu1 }
 0x81c   :  { %7428 = vrot.lane.b32.xlu1 %v13625_v21, %s11270_s20  ;;  %v7337_v44 = vpop.f32.mrb[73].mxu1 }
 0x81d   :  { %v7339_v63 = vpop.f32.mrb[74].mxu1 }
 0x81e   :  { %7402 = vrot.lane.b32.xlu0 %v13593_v13, %s11270_s20  ;;  %v7341_v51 = vpop.f32.mrb[75].mxu1 }
 0x820   :  { %7404 = vrot.lane.b32.xlu1 %v13597_v39, %s11270_s20 }
 0x822   :  { %7418 = vrot.lane.b32.xlu0 %v13595_v2, %s11270_s20 }
 0x823   :  { %v7345_v7 = vpop.f32.mrb[76].mxu1 }
 0x824   :  { %v13639_v56 = vmax.f32 %v7335_v1, %v7345_v7  ;;  %7420 = vrot.lane.b32.xlu1 %v13599_v48, %s11270_s20  ;;  %v7347_v20 = vpop.f32.mrb[77].mxu1 }
 0x825   :  { %v13643_v32 = vmax.f32 %v7337_v44, %v7347_v20  ;;  %v7349_v57 = vpop.f32.mrb[78].mxu1 }
 0x826   :  { %v13645_v10 = vmax.f32 %v7339_v63, %v7349_v57  ;;  %7414 = vrot.lane.b32.xlu0 %v13639_v56, %s11270_s20  ;;  %v7351_v23 = vpop.f32.mrb[79].mxu1  ;;  %v11102_v57 = vld [vmem:[%s13957_s5 + $0x18] sm:$0xff]  }
 0x827   :  { %v13649_v24 = vmax.f32 %v7341_v51, %v7351_v23  ;;  %v11103_v23 = vld [vmem:[%s13957_s5 + $0x60] sm:$0xff]  }
 0x828   :  { %7416 = vrot.lane.b32.xlu1 %v13645_v10, %s11270_s20 }
 0x82a   :  { %7430 = vrot.lane.b32.xlu0 %v13643_v32, %s11270_s20 }
 0x82c   :  { %7432 = vrot.lane.b32.xlu1 %v13649_v24, %s11270_s20 }
 0x878   :  { %v7407_v17 = vpop.permute.xlu0 %7406 }
 0x87a   :  { %v7409_v29 = vpop.permute.xlu1 %7408 }
 0x87c   :  { %v7423_v27 = vpop.permute.xlu0 %7422 }
 0x87d   :  { %v7437_v59 = vsel %vm7434_vm2, %v7407_v17, %v7423_v27  ;;  %v7445_v30 = vsel %vm7434_vm2, %v7423_v27, %v7407_v17 }
 0x87e   :  { %v7455_v53 = vmax.f32 %v13601_v22, %v7437_v59  ;;  %v7456_v33 = vmax.f32 %v13603_v46, %v7445_v30  ;;  %v7425_v45 = vpop.permute.xlu1 %7424  ;;  %v11096_v22 = vld [vmem:[%s13957_s5] sm:$0xff]  }
 0x87f   :  { %v7438_v12 = vsel %vm7434_vm2, %v7409_v29, %v7425_v45  ;;  %v7446_v19 = vsel %vm7434_vm2, %v7425_v45, %v7409_v29  ;;  %v11104_v45 = vld [vmem:[%s13957_s5 + $0x20] sm:$0xff]  }
 0x880   :  { %v7483_v26 = vadd.f32 %v13662_v15, %v7455_v53  ;;  %v7484_v11 = vadd.f32 %v13665_v61, %v7456_v33  ;;  %v7457_v58 = vmax.f32 %v13605_v52, %v7438_v12  ;;  %v7458_v60 = vmax.f32 %v7393_v14, %v7446_v19  ;;  %v11098_v52 = vld [vmem:[%s13957_s5 + $0x8] sm:$0xff]  }
 0x881   :  { %v11105_v19 = vld [vmem:[%s13957_s5 + $0x68] sm:$0xff]  }
 0x882   :  { %v7485_v6 = vadd.f32 %v13662_v15, %v7457_v58  ;;  %v7486_v4 = vadd.f32 %v13665_v61, %v7458_v60  ;;  %v7499_v34 = vmax.f32 %v7483_v26, 0.0  ;;  %v7500_v31 = vmax.f32 %v7484_v11, 0.0 }
 0x884   :  { %v7501_v47 = vmax.f32 %v7485_v6, 0.0  ;;  %v7502_v49 = vmax.f32 %v7486_v4, 0.0 }
 0x886   :  { %v13682_v35 = vpack.c.bf16 %v7501_v47, %v7499_v34  ;;  %v13684_v25 = vpack.c.bf16 %v7502_v49, %v7500_v31  ;;  %v11106_v34 = vld [vmem:[%s13957_s5 + $0x28] sm:$0xff]  }
 0x888   :  { %7711 = vmatprep.mubr.bf16.mxu0 %v13684_v25  ;;  %v7411_v46 = vpop.permute.xlu0 %7410 }
 0x889   :  { %7712 = vmatmul.mubr.bf16.vlgmr.msra.gmra.mrb[96].mxu0 %v13682_v35 }
 0x88a   :  { %9372 = vmatpush3.bf16.msra.mxu0 %v11096_v22  ;;  %v7413_v16 = vpop.permute.xlu1 %7412 }
 0x88b   :  { %9373 = vmatprep.subr.bf16.mxu0 %v11097_v9 }
 0x88c   :  { %v7427_v14 = vpop.permute.xlu0 %7426 }
 0x88d   :  { %v7439_v37 = vsel %vm7434_vm2, %v7411_v46, %v7427_v14  ;;  %v7447_v41 = vsel %vm7434_vm2, %v7427_v14, %v7411_v46 }
 0x88e   :  { %v7459_v3 = vmax.f32 %v13617_v42, %v7439_v37  ;;  %v7460_v50 = vmax.f32 %v13619_v18, %v7447_v41  ;;  %9374 = vmatpush3.bf16.msra.mxu0 %v11098_v52  ;;  %v7429_v28 = vpop.permute.xlu1 %7428  ;;  %v11108_v37 = vld [vmem:[%s13957_s5 + $0x30] sm:$0xff]  }
 0x88f   :  { %v7440_v40 = vsel %vm7434_vm2, %v7413_v16, %v7429_v28  ;;  %v7448_v5 = vsel %vm7434_vm2, %v7429_v28, %v7413_v16  ;;  %9375 = vmatprep.subr.bf16.mxu0 %v11099_v8 }
 0x890   :  { %v7487_v42 = vadd.f32 %v13662_v15, %v7459_v3  ;;  %v7488_v18 = vadd.f32 %v13665_v61, %v7460_v50  ;;  %v7461_v1 = vmax.f32 %v13621_v43, %v7440_v40  ;;  %v7462_v44 = vmax.f32 %v13625_v21, %v7448_v5  ;;  %v7403_v63 = vpop.permute.xlu0 %7402 }
 0x892   :  { %v7489_v51 = vadd.f32 %v13662_v15, %v7461_v1  ;;  %v7490_v7 = vadd.f32 %v13665_v61, %v7462_v44  ;;  %9376 = vmatpush3.bf16.msra.mxu0 %v11100_v36  ;;  %v7405_v20 = vpop.permute.xlu1 %7404  ;;  %v7503_v17 = vmax.f32 %v7487_v42, 0.0  ;;  %v7504_v43 = vmax.f32 %v7488_v18, 0.0 }
 0x893   :  { %9377 = vmatprep.subr.bf16.mxu0 %v11101_v55  ;;  %v11110_v55 = vld [vmem:[%s13957_s5 + $0x38] sm:$0xff]  }
 0x894   :  { %v7505_v38 = vmax.f32 %v7489_v51, 0.0  ;;  %v7506_v21 = vmax.f32 %v7490_v7, 0.0  ;;  %v7419_v29 = vpop.permute.xlu0 %7418 }
 0x895   :  { %v7443_v27 = vsel %vm7434_vm2, %v7419_v29, %v7403_v63  ;;  %v7435_v60 = vsel %vm7434_vm2, %v7403_v63, %v7419_v29  ;;  %v11122_v29 = vld [vmem:[%s13957_s5 + $0x128] sm:$0xff]  }
 0x896   :  { %v7452_v59 = vmax.f32 %v13595_v2, %v7443_v27  ;;  %9378 = vmatpush3.bf16.msra.mxu0 %v11102_v57  ;;  %v7421_v30 = vpop.permute.xlu1 %7420  ;;  %v13731_v53 = vpack.c.bf16 %v7506_v21, %v7504_v43  ;;  %v13733_v33 = vpack.c.bf16 %v7505_v38, %v7503_v17  ;;  %v7451_v9 = vmax.f32 %v13593_v13, %v7435_v60  ;;  %v11114_v57 = vld [vmem:[%s13957_s5 + $0x108] sm:$0xff]   ;;  %v11116_v17 = vld [vmem:[%s13957_s5 + $0x110] sm:$0xff]   ;;  %v11118_v43 = vld [vmem:[%s13957_s5 + $0x118] sm:$0xff]  }
 0x897   :  { %v7444_v12 = vsel %vm7434_vm2, %v7421_v30, %v7405_v20  ;;  %9379 = vmatprep.subr.bf16.mxu0 %v11103_v23  ;;  %v7436_v26 = vsel %vm7434_vm2, %v7405_v20, %v7421_v30  ;;  %v11113_v20 = vld [vmem:[%s13957_s5 + $0x148] sm:$0xff]   ;;  %v11115_v23 = vld [vmem:[%s13957_s5 + $0x150] sm:$0xff]   ;;  %v11119_v38 = vld [vmem:[%s13957_s5 + $0x160] sm:$0xff]  }
 0x898   :  { %v7480_v2 = vadd.f32 %v13665_v61, %v7452_v59  ;;  %v7454_v11 = vmax.f32 %v13599_v48, %v7444_v12  ;;  %7719 = vmatprep.mubr.bf16.mxu0 %v13731_v53  ;;  %v7415_v58 = vpop.permute.xlu0 %7414  ;;  %v7453_v31 = vmax.f32 %v13597_v39, %v7436_v26  ;;  %v11107_v48 = vld [vmem:[%s13957_s5 + $0x70] sm:$0xff]   ;;  %v7479_v40 = vadd.f32 %v13662_v15, %v7451_v9  ;;  %v11120_v21 = vld [vmem:[%s13957_s5 + $0x120] sm:$0xff]   ;;  %v11125_v30 = vld [vmem:[%s13957_s5 + $0x178] sm:$0xff]  }
 0x899   :  { %7720 = vmatmul.mubr.bf16.gmra.mrb[100].mxu0 %v13733_v33  ;;  %v11123_v27 = vld [vmem:[%s13957_s5 + $0x170] sm:$0xff]   ;;  %v11129_v12 = vld [vmem:[%s13959_s7 + $0x4] ss:$8 sps:$4 sm:$0xff]   ;;  %v11133_v26 = vld [vmem:[%s13959_s7 + $0x20] ss:$8 sps:$4 sm:$0xff]  }
 0x89a   :  { %v7482_v6 = vadd.f32 %v13665_v61, %v7454_v11  ;;  %9380 = vmatpush3.bf16.msra.mxu0 %v11104_v45  ;;  %v7417_v4 = vpop.permute.xlu1 %7416  ;;  %v7496_v47 = vmax.f32 %v7480_v2, 0.0  ;;  %v7481_v41 = vadd.f32 %v13662_v15, %v7453_v31  ;;  %v7495_v63 = vmax.f32 %v7479_v40, 0.0  ;;  %v11124_v59 = vld [vmem:[%s13957_s5 + $0x130] sm:$0xff]   ;;  %v11127_v45 = vld [vmem:[%s13959_s7] ss:$8 sps:$4 sm:$0xff]  }
 0x89b   :  { %9381 = vmatprep.subr.bf16.mxu0 %v11105_v19  ;;  %v11132_v19 = vld [vmem:[%s13959_s7 + $0x14] ss:$8 sps:$4 sm:$0xff]   ;;  %v11135_v2 = vld [vmem:[%s13959_s7 + $0x24] ss:$8 sps:$4 sm:$0xff]   ;;  %v11151_v9 = vld [vmem:[%s13959_s7 + $0x80] ss:$8 sps:$4 sm:$0xff]  }
 0x89c   :  { %v7498_v49 = vmax.f32 %v7482_v6, 0.0  ;;  %v7431_v22 = vpop.permute.xlu0 %7430  ;;  %v7497_v42 = vmax.f32 %v7481_v41, 0.0  ;;  %v11138_v11 = vld [vmem:[%s13959_s7 + $0x34] ss:$8 sps:$4 sm:$0xff]   ;;  %v11141_v60 = vld [vmem:[%s13959_s7 + $0x44] ss:$8 sps:$4 sm:$0xff]  }
 0x89d   :  { %v7441_v46 = vsel %vm7434_vm2, %v7415_v58, %v7431_v22  ;;  %v7449_v16 = vsel %vm7434_vm2, %v7431_v22, %v7415_v58  ;;  %v11136_v58 = vld [vmem:[%s13959_s7 + $0x30] ss:$8 sps:$4 sm:$0xff]   ;;  %v11139_v6 = vld [vmem:[%s13959_s7 + $0x40] ss:$8 sps:$4 sm:$0xff]   ;;  %v11147_v31 = vld [vmem:[%s13959_s7 + $0x64] ss:$8 sps:$4 sm:$0xff]  }
 0x89e   :  { %v7463_v52 = vmax.f32 %v13639_v56, %v7441_v46  ;;  %v7464_v39 = vmax.f32 %v13643_v32, %v7449_v16  ;;  %9382 = vmatpush3.bf16.msra.mxu0 %v11106_v34  ;;  %v7433_v8 = vpop.permute.xlu1 %7432  ;;  %v7512_v14 = vpack.c.bf16 %v7498_v49, %v7496_v47  ;;  %v11109_v56 = vld [vmem:[%s13957_s5 + $0x78] sm:$0xff]   ;;  %v7511_v7 = vpack.c.bf16 %v7497_v42, %v7495_v63  ;;  %v11153_v22 = vld [vmem:[%s13959_s7 + $0x84] ss:$8 sps:$4 sm:$0xff]   ;;  %v11163_v41 = vld [vmem:[%s13959_s7 + $0xc0] ss:$8 sps:$4 sm:$0xff]  }
 0x89f   :  { %v7442_v13 = vsel %vm7434_vm2, %v7417_v4, %v7433_v8  ;;  %v7450_v3 = vsel %vm7434_vm2, %v7433_v8, %v7417_v4  ;;  %9383 = vmatprep.subr.bf16.mxu0 %v11107_v48  ;;  %v11144_v4 = vld [vmem:[%s13959_s7 + $0x54] ss:$8 sps:$4 sm:$0xff]   ;;  %v11142_v34 = vld [vmem:[%s13959_s7 + $0x50] ss:$8 sps:$4 sm:$0xff]   ;;  %v11145_v48 = vld [vmem:[%s13959_s7 + $0x60] ss:$8 sps:$4 sm:$0xff]  }
 0x8a0   :  { %v7491_v32 = vadd.f32 %v13662_v15, %v7463_v52  ;;  %v7492_v50 = vadd.f32 %v13665_v61, %v7464_v39  ;;  %v7465_v28 = vmax.f32 %v13645_v10, %v7442_v13  ;;  %v7466_v36 = vmax.f32 %v13649_v24, %v7450_v3  ;;  %7856 = vmatprep.mubr.bf16.mxu0 %v7512_v14  ;;  %v11111_v10 = vld [vmem:[%s13957_s5 + $0x140] sm:$0xff]   ;;  %v11150_v47 = vld [vmem:[%s13959_s7 + $0x74] ss:$8 sps:$4 sm:$0xff]   ;;  %v11148_v49 = vld [vmem:[%s13959_s7 + $0x70] ss:$8 sps:$4 sm:$0xff]  }
 0x8a1   :  { %v11156_v46 = vld [vmem:[%s13959_s7 + $0x94] ss:$8 sps:$4 sm:$0xff]   ;;  %v11154_v16 = vld [vmem:[%s13959_s7 + $0x90] ss:$8 sps:$4 sm:$0xff]   ;;  %v11159_v52 = vld [vmem:[%s13959_s7 + $0xa4] ss:$8 sps:$4 sm:$0xff]  }
 0x8a2   :  { %v7493_v5 = vadd.f32 %v13662_v15, %v7465_v28  ;;  %v7494_v0 = vadd.f32 %v13665_v61, %v7466_v36  ;;  %9384 = vmatpush3.bf16.msra.mxu0 %v11108_v37  ;;  %v7507_v18 = vmax.f32 %v7491_v32, 0.0  ;;  %v7508_v24 = vmax.f32 %v7492_v50, 0.0  ;;  %v11112_v15 = vld [vmem:[%s13957_s5 + $0x100] sm:$0xff]   ;;  %v11162_v8 = vld [vmem:[%s13959_s7 + $0xb4] ss:$8 sps:$4 sm:$0xff]  }
 0x8a3   :  { %9385 = vmatprep.subr.bf16.mxu0 %v11109_v56  ;;  %v11157_v39 = vld [vmem:[%s13959_s7 + $0xa0] ss:$8 sps:$4 sm:$0xff]   ;;  %v11160_v14 = vld [vmem:[%s13959_s7 + $0xb0] ss:$8 sps:$4 sm:$0xff]   ;;  %v11165_v37 = vld [vmem:[%s13959_s7 + $0xc4] ss:$8 sps:$4 sm:$0xff]  }
 0x8a4   :  { %v7509_v1 = vmax.f32 %v7493_v5, 0.0  ;;  %v7510_v44 = vmax.f32 %v7494_v0, 0.0  ;;  %v11168_v13 = vld [vmem:[%s13959_s7 + $0xd4] ss:$8 sps:$4 sm:$0xff]   ;;  %v11166_v3 = vld [vmem:[%s13959_s7 + $0xd0] ss:$8 sps:$4 sm:$0xff]  }
 0x8a5   :  { %v11171_v56 = vld [vmem:[%s13959_s7 + $0xe4] ss:$8 sps:$4 sm:$0xff]   ;;  %v11169_v32 = vld [vmem:[%s13959_s7 + $0xe0] ss:$8 sps:$4 sm:$0xff]   ;;  %v11174_v50 = vld [vmem:[%s13959_s7 + $0xf4] ss:$8 sps:$4 sm:$0xff]  }
 0x8a6   :  { %9386 = vmatpush3.bf16.msra.mxu0 %v11110_v55  ;;  %v7518_v61 = vpack.c.bf16 %v7510_v44, %v7508_v24  ;;  %v7517_v51 = vpack.c.bf16 %v7509_v1, %v7507_v18  ;;  %v11172_v28 = vld [vmem:[%s13959_s7 + $0xf0] ss:$8 sps:$4 sm:$0xff]   ;;  %v11175_v36 = vld [vmem:[#allocation4 + $0x40] sm:$0xff]  }
 0x8a7   :  { %9399 = vmatprep.subr.bf16.mxu0 %v11111_v10 }
 0x8a9   :  { %7857 = vmatmul.mubr.bf16.vlgmr.msra.gmra.mrb[104].mxu0 %v7511_v7 }
 0x8aa   :  { %7864 = vmatprep.mubr.bf16.mxu0 %v13684_v25  ;;  %9400 = vmatpush3.bf16.msra.mxu0 %v11112_v15  ;;  %v11117_v25 = vld [vmem:[%s13957_s5 + $0x158] sm:$0xff]  }
 0x8ab   :  { %9401 = vmatprep.subr.bf16.mxu0 %v11113_v20 }
 0x8ae   :  { %9402 = vmatpush3.bf16.msra.mxu0 %v11114_v57 }
 0x8af   :  { %9403 = vmatprep.subr.bf16.mxu0 %v11115_v23 }
 0x8b1   :  { %7865 = vmatmul.mubr.bf16.gmra.mrb[108].mxu0 %v13682_v35  ;;  %v11121_v35 = vld [vmem:[%s13957_s5 + $0x168] sm:$0xff]  }
 0x8b2   :  { %9404 = vmatpush3.bf16.msra.mxu0 %v11116_v17  ;;  %8033 = vmatprep.mubr.bf16.mxu0 %v13731_v53  ;;  %v11126_v53 = vld [vmem:[%s13957_s5 + $0x138] sm:$0xff]  }
 0x8b3   :  { %9405 = vmatprep.subr.bf16.mxu0 %v11117_v25 }
 0x8b6   :  { %9406 = vmatpush3.bf16.msra.mxu0 %v11118_v43 }
 0x8b7   :  { %9407 = vmatprep.subr.bf16.mxu0 %v11119_v38 }
 0x8ba   :  { %9408 = vmatpush3.bf16.msra.mxu0 %v11120_v21 }
 0x8bb   :  { %9409 = vmatprep.subr.bf16.mxu0 %v11121_v35 }
 0x8be   :  { %9410 = vmatpush3.bf16.msra.mxu0 %v11122_v29 }
 0x8bf   :  { %9411 = vmatprep.subr.bf16.mxu0 %v11123_v27 }
 0x8c2   :  { %9412 = vmatpush3.bf16.msra.mxu0 %v11124_v59 }
 0x8c3   :  { %9413 = vmatprep.subr.bf16.mxu0 %v11125_v30 }
 0x8c6   :  { %9414 = vmatpush3.bf16.msra.mxu0 %v11126_v53 }
 0x8c7   :  { %8275 = vmatprep.subr.bf16.mxu0 %v11129_v12 }
 0x8c9   :  { %8034 = vmatmul.mubr.bf16.vlgmr.msra.gmra.mrb[112].mxu0 %v13733_v33  ;;  %v11130_v33 = vld [vmem:[%s13959_s7 + $0x10] ss:$8 sps:$4 sm:$0xff]  }
 0x8ca   :  { %8041 = vmatprep.mubr.bf16.mxu0 %v7518_v61  ;;  %8276 = vmatpush1.bf16.msra.mxu0 %v11127_v45 }
 0x8cb   :  { %8277 = vmatprep.subr.bf16.mxu0 %v11132_v19 }
 0x8ce   :  { %8278 = vmatpush1.bf16.msra.mxu0 %v11130_v33  ;;  %v9163_v33 = vld [vmem:[%s13958_s6] ss:$0 sm:$0xff] }
 0x8cf   :  { %8279 = vmatprep.subr.bf16.mxu0 %v11135_v2 }
 0x8d1   :  { %8042 = vmatmul.mubr.bf16.gmra.mrb[116].mxu0 %v7517_v51 }
 0x8d2   :  { %8280 = vmatpush1.bf16.msra.mxu0 %v11133_v26 }
 0x8d3   :  { %8281 = vmatprep.subr.bf16.mxu0 %v11138_v11 }
 0x8d6   :  { %8282 = vmatpush1.bf16.msra.mxu0 %v11136_v58 }
 0x8d7   :  { %8283 = vmatprep.subr.bf16.mxu0 %v11141_v60 }
 0x8da   :  { %8284 = vmatpush1.bf16.msra.mxu0 %v11139_v6 }
 0x8db   :  { %8285 = vmatprep.subr.bf16.mxu0 %v11144_v4 }
 0x8de   :  { %8286 = vmatpush1.bf16.msra.mxu0 %v11142_v34 }
 0x8df   :  { %8287 = vmatprep.subr.bf16.mxu0 %v11147_v31 }
 0x8e2   :  { %8288 = vmatpush1.bf16.msra.mxu0 %v11145_v48 }
 0x8e3   :  { %8289 = vmatprep.subr.bf16.mxu0 %v11150_v47 }
 0x8e6   :  { %8290 = vmatpush1.bf16.msra.mxu0 %v11148_v49 }
 0x8e7   :  { %8291 = vmatprep.subr.bf16.mxu0 %v11153_v22 }
 0x8ea   :  { %8292 = vmatpush1.bf16.msra.mxu0 %v11151_v9 }
 0x8eb   :  { %8293 = vmatprep.subr.bf16.mxu0 %v11156_v46 }
 0x8ee   :  { %8294 = vmatpush1.bf16.msra.mxu0 %v11154_v16 }
 0x8ef   :  { %8295 = vmatprep.subr.bf16.mxu0 %v11159_v52 }
 0x8f2   :  { %8296 = vmatpush1.bf16.msra.mxu0 %v11157_v39 }
 0x8f3   :  { %8297 = vmatprep.subr.bf16.mxu0 %v11162_v8 }
 0x8f6   :  { %8298 = vmatpush1.bf16.msra.mxu0 %v11160_v14 }
 0x8f7   :  { %8299 = vmatprep.subr.bf16.mxu0 %v11165_v37 }
 0x8fa   :  { %8300 = vmatpush1.bf16.msra.mxu0 %v11163_v41 }
 0x8fb   :  { %8301 = vmatprep.subr.bf16.mxu0 %v11168_v13  ;;  %v11176_v13 = vld [vmem:[#allocation4] sm:$0xff]  }
 0x8fe   :  { %8302 = vmatpush1.bf16.msra.mxu0 %v11166_v3  ;;  %v11177_v3 = vld [vmem:[#allocation4 + $0x48] sm:$0xff]  }
 0x8ff   :  { %8303 = vmatprep.subr.bf16.mxu0 %v11171_v56  ;;  %v11178_v56 = vld [vmem:[#allocation4 + $0x8] sm:$0xff]  }
 0x902   :  { %8304 = vmatpush1.bf16.msra.mxu0 %v11169_v32  ;;  %v11179_v32 = vld [vmem:[#allocation4 + $0x50] sm:$0xff]  }
 0x903   :  { %8305 = vmatprep.subr.bf16.mxu0 %v11174_v50  ;;  %v11180_v50 = vld [vmem:[#allocation4 + $0x10] sm:$0xff]  }
 0x906   :  { %8306 = vmatpush1.bf16.msra.mxu0 %v11172_v28  ;;  %v11181_v28 = vld [vmem:[#allocation4 + $0x58] sm:$0xff]  }
 0x907   :  { %9427 = vmatprep.subr.bf16.mxu0 %v11175_v36  ;;  %v11182_v36 = vld [vmem:[#allocation4 + $0x18] sm:$0xff]  }
 0x95c   :  { %v9359_v40 = vpop.f32.mrb[96].mxu0 }
 0x95d   :  { %v9360_v5 = vpop.f32.mrb[97].mxu0 }
 0x95e   :  { %v9361_v0 = vadd.f32 %v9360_v5, %v9359_v40  ;;  %v9362_v55 = vpop.f32.mrb[98].mxu0  ;;  %v11183_v40 = vld [vmem:[#allocation4 + $0x60] sm:$0xff]  }
 0x95f   :  { %v9363_v42 = vpop.f32.mrb[99].mxu0  ;;  %v11184_v5 = vld [vmem:[#allocation4 + $0x20] sm:$0xff]  }
 0x960   :  { %v9364_v10 = vadd.f32 %v9363_v42, %v9362_v55  ;;  %v11186_v55 = vld [vmem:[#allocation4 + $0x28] sm:$0xff]   ;;  %v11187_v42 = vld [vmem:[#allocation4 + $0x70] sm:$0xff]  }
 0x96c   :  { %v9365_v18 = vpop.f32.mrb[100].mxu0 }
 0x96d   :  { %v9366_v24 = vpop.f32.mrb[101].mxu0 }
 0x96e   :  { %v9367_v1 = vadd.f32 %v9366_v24, %v9365_v18  ;;  %v9368_v44 = vpop.f32.mrb[102].mxu0  ;;  %v11189_v18 = vld [vmem:[#allocation4 + $0x78] sm:$0xff]  }
 0x96f   :  { %v9369_v63 = vpop.f32.mrb[103].mxu0  ;;  %v11190_v24 = vld [vmem:[#allocation4 + $0x38] sm:$0xff]  }
 0x970   :  { %v9370_v15 = vadd.f32 %v9369_v63, %v9368_v44 }
 0x97c   :  { %v9387_v61 = vpop.f32.mrb[104].mxu0 }
 0x97d   :  { %v9388_v51 = vpop.f32.mrb[105].mxu0 }
 0x97e   :  { %v9389_v7 = vadd.f32 %v9388_v51, %v9387_v61  ;;  %v9390_v20 = vpop.f32.mrb[106].mxu0 }
 0x97f   :  { %v9391_v57 = vpop.f32.mrb[107].mxu0 }
 0x980   :  { %v7859_v23 = vadd.f32 %v9389_v7, %v9361_v0  ;;  %v9392_v17 = vadd.f32 %v9391_v57, %v9390_v20  ;;  %v11185_v0 = vld [vmem:[#allocation4 + $0x68] sm:$0xff]  }
 0x982   :  { %v7862_v25 = vadd.f32 %v9392_v17, %v9364_v10  ;;  %v11188_v10 = vld [vmem:[#allocation4 + $0x30] sm:$0xff]  }
 0x984   :  { %v9393_v43 = vpop.f32.mrb[108].mxu0 }
 0x985   :  { %v9394_v38 = vpop.f32.mrb[109].mxu0 }
 0x986   :  { %v9395_v21 = vadd.f32 %v9394_v38, %v9393_v43  ;;  %v9396_v35 = vpop.f32.mrb[110].mxu0 }
 0x987   :  { %v9397_v29 = vpop.f32.mrb[111].mxu0 }
 0x988   :  { %v7867_v27 = vadd.f32 %v9395_v21, %v9367_v1  ;;  %v9398_v59 = vadd.f32 %v9397_v29, %v9396_v35  ;;  %v8103_v1 = vld [vmem:[%s13960_s8] sm:$0x3] }
 0x989   :  { %v8108_v44 = vrot.slane %v8103_v1, %v14133_v62  ;;  %v8112_v63 = vrot.slane %v8103_v1, %v14134_v54  ;;  %v9196_v62 = vld [vmem:[%s13962_s10] ss:$0 sm:$0xff] }
 0x98a   :  { %v7870_v30 = vadd.f32 %v9398_v59, %v9370_v15 }
 0x99c   :  { %v9415_v53 = vpop.f32.mrb[112].mxu0 }
 0x99d   :  { %v9416_v45 = vpop.f32.mrb[113].mxu0 }
 0x99e   :  { %v9417_v12 = vadd.f32 %v9416_v45, %v9415_v53  ;;  %v9418_v19 = vpop.f32.mrb[114].mxu0 }
 0x99f   :  { %v9419_v2 = vpop.f32.mrb[115].mxu0 }
 0x9a0   :  { %v8050_v26 = vadd.f32 %v9417_v12, %v7859_v23  ;;  %v9420_v11 = vadd.f32 %v9419_v2, %v9418_v19 }
 0x9a2   :  { %v8061_v58 = vadd.f32 %v9163_v33, %v8050_v26  ;;  %v8051_v60 = vadd.f32 %v9420_v11, %v7862_v25 }
 0x9a4   :  { %v8062_v6 = vadd.f32 %v9163_v33, %v8051_v60  ;;  %v9421_v4 = vpop.f32.mrb[116].mxu0  ;;  %v8065_v31 = vmax.f32 %v8061_v58, 0.0 }
 0x9a5   :  { %v9422_v34 = vpop.f32.mrb[117].mxu0 }
 0x9a6   :  { %v8066_v48 = vmax.f32 %v8062_v6, 0.0  ;;  %v9423_v47 = vadd.f32 %v9422_v34, %v9421_v4  ;;  %v9424_v49 = vpop.f32.mrb[118].mxu0 }
 0x9a7   :  { %v9425_v22 = vpop.f32.mrb[119].mxu0 }
 0x9a8   :  { %v8069_v9 = vpack.c.bf16 %v8066_v48, %v8065_v31  ;;  %v8052_v46 = vadd.f32 %v9423_v47, %v7867_v27  ;;  %v9426_v16 = vadd.f32 %v9425_v22, %v9424_v49 }
 0x9aa   :  { %v8063_v52 = vadd.f32 %v9163_v33, %v8052_v46  ;;  %v8053_v39 = vadd.f32 %v9426_v16, %v7870_v30 }
 0x9ac   :  { %v8064_v8 = vadd.f32 %v9163_v33, %v8053_v39  ;;  %v8067_v14 = vmax.f32 %v8063_v52, 0.0 }
 0x9ae   :  { %v8068_v37 = vmax.f32 %v8064_v8, 0.0 }
 0x9b0   :  { %v8070_v41 = vpack.c.bf16 %v8068_v37, %v8067_v14 }
 0x9b2   :  { %8307 = vmatprep.mubr.bf16.mxu0 %v8070_v41 }
 0x9b3   :  { %8308 = vmatmul.mubr.bf16.vlgmr.msra.gmra.mrb[120].mxu0 %v8069_v9 }
 0x9b4   :  { %9428 = vmatpush3.bf16.msra.mxu0 %v11176_v13 }
 0x9b5   :  { %9429 = vmatprep.subr.bf16.mxu0 %v11177_v3 }
 0x9b8   :  { %9430 = vmatpush3.bf16.msra.mxu0 %v11178_v56 }
 0x9b9   :  { %9431 = vmatprep.subr.bf16.mxu0 %v11179_v32 }
 0x9bc   :  { %9432 = vmatpush3.bf16.msra.mxu0 %v11180_v50 }
 0x9bd   :  { %9433 = vmatprep.subr.bf16.mxu0 %v11181_v28 }
 0x9c0   :  { %9434 = vmatpush3.bf16.msra.mxu0 %v11182_v36 }
 0x9c1   :  { %9435 = vmatprep.subr.bf16.mxu0 %v11183_v40 }
 0x9c4   :  { %9436 = vmatpush3.bf16.msra.mxu0 %v11184_v5 }
 0x9c5   :  { %9437 = vmatprep.subr.bf16.mxu0 %v11185_v0 }
 0x9c8   :  { %9438 = vmatpush3.bf16.msra.mxu0 %v11186_v55 }
 0x9c9   :  { %9439 = vmatprep.subr.bf16.mxu0 %v11187_v42 }
 0x9cc   :  { %9440 = vmatpush3.bf16.msra.mxu0 %v11188_v10 }
 0x9cd   :  { %9441 = vmatprep.subr.bf16.mxu0 %v11189_v18 }
 0x9d0   :  { %9442 = vmatpush3.bf16.msra.mxu0 %v11190_v24 }
 0xa86   :  { %v8309_v15 = vpop.f32.mrb[120].mxu0 }
 0xa87   :  { %v8310_v61 = vadd.f32 %v8309_v15, %v8108_v44  ;;  %v8311_v51 = vpop.f32.mrb[121].mxu0 }
 0xa88   :  { %v8312_v7 = vadd.f32 %v8311_v51, %v8112_v63  ;;  %v8313_v20 = vpop.f32.mrb[122].mxu0 }
 0xa89   :  { %v8314_v57 = vadd.f32 %v8313_v20, %v8108_v44  ;;  %v8315_v23 = vpop.f32.mrb[123].mxu0  ;;  %v8318_v25 = vmax.f32 %v8310_v61, 0.0 }
 0xa8a   :  { %v8316_v17 = vadd.f32 %v8315_v23, %v8112_v63  ;;  %v8319_v38 = vmax.f32 %v8312_v7, 0.0 }
 0xa8b   :  { %v8320_v43 = vmax.f32 %v8314_v57, 0.0 }
 0xa8c   :  { %v8321_v21 = vmax.f32 %v8316_v17, 0.0 }
 0xa8d   :  { %v8322_v35 = vpack.c.bf16 %v8320_v43, %v8318_v25 }
 0xa8e   :  { %v8323_v29 = vpack.c.bf16 %v8321_v21, %v8319_v38 }
 0xa90   :  { %8491 = vmatprep.mubr.bf16.mxu0 %v8323_v29 }
 0xa91   :  { %8492 = vmatmul.mubr.bf16.vlgmr.msra.gmra.mrb[124].mxu0 %v8322_v35 }
 0xb64   :  { %v9443_v27 = vpop.f32.mrb[124].mxu0 }
 0xb65   :  { %v9444_v54 = vpop.f32.mrb[125].mxu0 }
 0xb66   :  { %v9445_v59 = vadd.f32 %v9444_v54, %v9443_v27  ;;  %v9446_v30 = vpop.f32.mrb[126].mxu0 }
 0xb67   :  { %v9447_v53 = vpop.f32.mrb[127].mxu0 }
 0xb68   :  { %v8494_v45 = vadd.f32 %v9445_v59, %v9196_v62  ;;  %v9448_v12 = vadd.f32 %v9447_v53, %v9446_v30 }
 0xb6a   :  { %8500 = vst [vmem:[%s13963_s11] sm:$0xff] %v8494_v45  ;;  %v8497_v19 = vadd.f32 %v9448_v12, %v9196_v62 }
 0xb6c   :  { %8501 = vst [vmem:[%s13963_s11 + $0x8] sm:$0xff] %v8497_v19 }
 0xb6d   :  { %8506 = vsyncpa [#allocation3], 1 }
 0xb6e   :  { %8507 = vsyncpa [#allocation5], 1 }

</bundles_post_ra>
